<compile_context>
chip_gen: v6e
topology: v6e:2x2x1
jax: 0.10.0
libtpu: 0.0.40
codegen_flags: <defaults>
</compile_context>

<pallas_src>
import functools
import math

import jax
import jax.numpy as jnp
from jax.experimental import pallas as pl
from jax.experimental.pallas import tpu as pltpu


# ---------------------------------------------------------------------------
# Kernel
# ---------------------------------------------------------------------------
def attention_kernel(x_ref, wq_ref, wk_ref, wv_ref, wo_ref, cos_ref, sin_ref,
                     o_ref, k_scr, v_scr, *,
                     num_heads, num_kv_heads, head_dim, q_tile):
    """One grid step = (batch b, query tile qt).

    x_ref       : (S, H)   full token slab of batch b (resident across q-tiles)
    w*_ref      : projection weights (VMEM-resident, constant index_map)
    cos/sin_ref : (S, head_dim) RoPE tables (VMEM-resident)
    o_ref       : (q_tile, H) output tile
    k_scr/v_scr : (num_heads, S, head_dim) bf16 persistent scratch holding the
                  RoPE'd and GQA-expanded K / V of batch b (filled at qt == 0).
    """
    qt = pl.program_id(1)
    S = x_ref.shape[0]
    H = num_heads * head_dim
    groups = num_heads // num_kv_heads
    half = head_dim // 2
    scale = 1.0 / math.sqrt(head_dim)

    def rope(t, c, s):
        # t: (L, n_heads, hd) f32, c/s: (L, 1, hd) -- one vectorized rotate-half
        # for all heads (replaces the old per-head Python loop / 32-lane slices).
        t_rot = jnp.concatenate([-t[..., half:], t[..., :half]], axis=-1)
        return t * c + t_rot * s

    # ---- K / V for the whole sequence: computed once per batch element ----
    @pl.when(qt == 0)
    def _():
        xs = x_ref[...].astype(jnp.bfloat16)                                # (S, H)
        k = jnp.dot(xs, wk_ref[...], preferred_element_type=jnp.float32)    # (S, dkv)
        v = jnp.dot(xs, wv_ref[...], preferred_element_type=jnp.float32)    # (S, dkv)
        cos = cos_ref[...]
        sin = sin_ref[...]
        k3 = rope(k.reshape(S, num_kv_heads, head_dim),
                  cos[:, None, :], sin[:, None, :])                         # (S, nkv, hd)
        k_t = jnp.transpose(k3, (1, 0, 2)).astype(jnp.bfloat16)             # (nkv, S, hd)
        v_t = jnp.transpose(v.reshape(S, num_kv_heads, head_dim),
                            (1, 0, 2)).astype(jnp.bfloat16)                 # (nkv, S, hd)
        # Grouped-query attention: repeat_interleave KV heads up to num_heads,
        # done once per batch here instead of once per q-tile / per head.
        k_scr[...] = jnp.broadcast_to(
            k_t[:, None], (num_kv_heads, groups, S, head_dim)
        ).reshape(num_heads, S, head_dim)
        v_scr[...] = jnp.broadcast_to(
            v_t[:, None], (num_kv_heads, groups, S, head_dim)
        ).reshape(num_heads, S, head_dim)

    # ---- Q projection + RoPE for this q-tile (rows already resident in x_ref) ----
    q0 = pl.multiple_of(qt * q_tile, q_tile)
    xq = x_ref[pl.ds(q0, q_tile), :].astype(jnp.bfloat16)                   # (tq, H)
    q = jnp.dot(xq, wq_ref[...], preferred_element_type=jnp.float32)        # (tq, H)
    # Fold the 1/sqrt(head_dim) score scale into the small (tq, hd) RoPE tables
    # instead of scaling the (tq, S) score matrices: O(tq*hd) vs O(tq*S) VPU work.
    cos_q = cos_ref[pl.ds(q0, q_tile), :] * scale
    sin_q = sin_ref[pl.ds(q0, q_tile), :] * scale
    q3 = rope(q.reshape(q_tile, num_heads, head_dim),
              cos_q[:, None, :], sin_q[:, None, :]).astype(jnp.bfloat16)    # (tq, nh, hd)

    # ---- attention: head-batched MXU contractions, per-q-tile softmax ----
    k_all = k_scr[...]                                                      # (nh, S, hd)
    v_all = v_scr[...]
    s = jnp.einsum('qhd,hkd->hqk', q3, k_all,
                   preferred_element_type=jnp.float32)                      # (nh, tq, S)
    m = jnp.max(s, axis=-1, keepdims=True)
    p = jnp.exp(s - m)                      # EUP; unnormalized but <= 1 -> safe bf16
    l = jnp.sum(p, axis=-1, keepdims=True)
    pv = jnp.einsum('hqk,hkd->hqd', p.astype(jnp.bfloat16), v_all,
                    preferred_element_type=jnp.float32)                     # (nh, tq, hd)
    # Deferred softmax normalization: one multiply on (nh, tq, hd) using the approx
    # reciprocal (EUP slot) instead of dividing the (nh, tq, S) probabilities.
    o_heads = pv * pl.reciprocal(l, approx=True)
    attn = jnp.transpose(o_heads, (1, 0, 2)).reshape(q_tile, H).astype(jnp.bfloat16)
    out = jnp.dot(attn, wo_ref[...], preferred_element_type=jnp.float32)    # (tq, H)
    o_ref[...] = out.astype(o_ref.dtype)


# ---------------------------------------------------------------------------
# Wrapper / pallas_call construction
# ---------------------------------------------------------------------------
def _tpu_budget():
    """Generation-specific (max q-tile, vmem_limit_bytes).

    v7x has 64 MiB VMEM per TensorCore -> smaller q-tiles and a <=56 MiB cap.
    v5e / v6e have 128 MiB -> larger tiles and a ~100 MiB cap amortize the
    per-grid-step overhead and DMAs better.
    """
    try:
        kind = jax.devices()[0].device_kind.lower()
    except Exception:
        kind = ""
    if "v5" in kind or "v6" in kind:
        return 1024, 100 * 1024 * 1024
    return 256, 56 * 1024 * 1024            # v7x (or unknown): conservative


def _pick_q_tile(seq_len, max_tile):
    """Largest multiple-of-8 tile <= max_tile that divides seq_len."""
    if seq_len <= max_tile:
        return seq_len
    t = (max_tile // 8) * 8
    while t >= 8:
        if seq_len % t == 0:
            return t
        t -= 8
    return seq_len


def _resident_spec(block_shape, single_buffer):
    """Constant-index operand (weights / RoPE tables): never re-DMA'd across the
    grid; single-buffer it so it does not pay 2x VMEM (critical on v7x, 64 MiB)."""
    index_map = lambda b, qt: (0,) * len(block_shape)
    if single_buffer:
        return pl.BlockSpec(block_shape, index_map, pipeline_mode=pl.Buffered(1))
    return pl.BlockSpec(block_shape, index_map)


def _build_attention(B, S, H, d_kv, head_dim, num_heads, num_kv_heads, q_tile,
                     vmem_limit_bytes, out_dtype, single_buffer):
    kernel = functools.partial(attention_kernel, num_heads=num_heads,
                               num_kv_heads=num_kv_heads, head_dim=head_dim,
                               q_tile=q_tile)
    num_q_tiles = S // q_tile

    flops = B * (2 * S * H * H                               # q_proj
                 + 2 * 2 * S * H * d_kv                      # k_proj + v_proj
                 + num_heads * 2 * 2 * S * S * head_dim      # q k^T + p v
                 + 2 * S * H * H)                            # o_proj
    bytes_accessed = (2 * B * S * H * 4                      # x in / out (f32)
                      + 2 * (2 * H * H + 2 * H * d_kv)       # bf16 weights
                      + 2 * 4 * S * head_dim)                # cos / sin (f32)

    return pl.pallas_call(
        kernel,
        out_shape=jax.ShapeDtypeStruct((B, S, H), out_dtype),
        grid_spec=pltpu.PrefetchScalarGridSpec(
            num_scalar_prefetch=0,
            grid=(B, num_q_tiles),
            in_specs=[
                # Full token slab of batch b; index_map ignores qt -> the block
                # stays resident in VMEM for every q-tile of that batch.
                pl.BlockSpec((None, S, H), lambda b, qt: (b, 0, 0)),
                _resident_spec((H, H), single_buffer),          # Wq
                _resident_spec((H, d_kv), single_buffer),       # Wk
                _resident_spec((H, d_kv), single_buffer),       # Wv
                _resident_spec((H, H), single_buffer),          # Wo
                _resident_spec((S, head_dim), single_buffer),   # cos
                _resident_spec((S, head_dim), single_buffer),   # sin
            ],
            out_specs=pl.BlockSpec((None, q_tile, H), lambda b, qt: (b, qt, 0)),
            scratch_shapes=[
                pltpu.VMEM((num_heads, S, head_dim), jnp.bfloat16),  # K (RoPE'd, GQA)
                pltpu.VMEM((num_heads, S, head_dim), jnp.bfloat16),  # V (GQA)
            ],
        ),
        compiler_params=pltpu.CompilerParams(
            # Batch axis megacore-shardable; the q-tile axis is sequential because
            # the K/V scratch is filled at qt == 0 and reused by later q-tiles.
            dimension_semantics=("parallel", "arbitrary"),
            vmem_limit_bytes=vmem_limit_bytes,
        ),
        cost_estimate=pl.CostEstimate(
            flops=flops,
            transcendentals=B * num_heads * S * S,
            bytes_accessed=bytes_accessed,
        ),
    )


def stable_attention_3d(x, wq, wk, wv, wo, cos, sin, *, num_heads, num_kv_heads,
                        q_tile=None):
    """x: [B, S, H] (f32 or bf16); wq/wo: [H, H] bf16; wk/wv: [H, n_kv*hd] bf16;
    cos/sin: [S, head_dim] f32.  Returns [B, S, H] in x.dtype."""
    B, S, H = x.shape
    head_dim = H // num_heads
    d_kv = num_kv_heads * head_dim

    max_tile, vmem_limit = _tpu_budget()
    if q_tile is None:
        q_tile = _pick_q_tile(S, max_tile)
    assert S % q_tile == 0, (S, q_tile)

    args = (x, wq, wk, wv, wo, cos, sin)
    try:
        fn = _build_attention(B, S, H, d_kv, head_dim, num_heads, num_kv_heads,
                              q_tile, vmem_limit, x.dtype, single_buffer=True)
        return fn(*args)
    except Exception:
        # Fallback: if this jax/Mosaic build rejects pipeline_mode=pl.Buffered(1),
        # retry with default double-buffered resident operands (same semantics).
        fn = _build_attention(B, S, H, d_kv, head_dim, num_heads, num_kv_heads,
                              q_tile, vmem_limit, x.dtype, single_buffer=False)
        return fn(*args)


# ---------------------------------------------------------------------------
# Host-side precompute (mirrors Rotary3DEmbedding / _init_weights_stable)
# ---------------------------------------------------------------------------
def rotary_3d_cos_sin(seq_len, head_dim, base=10000.0):
    """Pure-JAX replica of Rotary3DEmbedding.forward (use_3d=True, no CLS token)."""
    assert head_dim % 4 == 0
    dim_h = head_dim // 4
    dim_w = head_dim // 4
    dim_d = head_dim // 2
    grid = int(math.sqrt(seq_len))
    assert grid * grid == seq_len
    inv_freq_h = 1.0 / base ** (jnp.arange(0, dim_h, 2, dtype=jnp.float32) / dim_h)
    inv_freq_w = 1.0 / base ** (jnp.arange(0, dim_w, 2, dtype=jnp.float32) / dim_w)
    pos = jnp.arange(grid, dtype=jnp.float32)
    freqs_h = pos[:, None] * inv_freq_h[None, :]
    freqs_w = pos[:, None] * inv_freq_w[None, :]
    h_emb = jnp.concatenate([freqs_h, freqs_h], axis=-1)        # (grid, dim_h)
    w_emb = jnp.concatenate([freqs_w, freqs_w], axis=-1)        # (grid, dim_w)
    d_emb = jnp.zeros((1, dim_d), jnp.float32)                  # depth position = 0
    h_full = jnp.repeat(h_emb, grid, axis=0)                    # h varies slowly
    w_full = jnp.tile(w_emb, (grid, 1))                         # w varies fast
    d_full = jnp.tile(d_emb, (seq_len, 1))
    emb = jnp.concatenate([h_full, w_full, d_full], axis=-1)    # (S, head_dim)
    return jnp.cos(emb), jnp.sin(emb)


def make_params(key, hidden_size, num_heads, num_kv_heads, num_hidden_layers,
                initializer_range):
    """Mirror StableAttention3D._init_weights_stable; store weights [in, out] bf16."""
    head_dim = hidden_size // num_heads
    d_kv = num_kv_heads * head_dim
    scale = 1.0 / math.sqrt(num_hidden_layers)
    head_scale = 1.0 / math.sqrt(num_heads)
    std_qkv = initializer_range * scale
    std_o = initializer_range * scale * head_scale
    kq, kk, kv, ko = jax.random.split(key, 4)
    wq = (jax.random.normal(kq, (hidden_size, hidden_size), jnp.float32) * std_qkv).T
    wk = (jax.random.normal(kk, (d_kv, hidden_size), jnp.float32) * std_qkv).T
    wv = (jax.random.normal(kv, (d_kv, hidden_size), jnp.float32) * std_qkv).T
    wo = (jax.random.normal(ko, (hidden_size, hidden_size), jnp.float32) * std_o).T
    return (wq.astype(jnp.bfloat16), wk.astype(jnp.bfloat16),
            wv.astype(jnp.bfloat16), wo.astype(jnp.bfloat16))


def attention_ref(x, wq, wk, wv, wo, cos, sin, *, num_heads, num_kv_heads):
    """Pure-JAX reference mirroring the module forward at kernel precision."""
    B, S, H = x.shape
    hd = H // num_heads
    g = num_heads // num_kv_heads
    half = hd // 2
    scale = 1.0 / math.sqrt(hd)
    xb = x.astype(jnp.bfloat16)
    q = jnp.dot(xb, wq, preferred_element_type=jnp.float32).reshape(B, S, num_heads, hd)
    k = jnp.dot(xb, wk, preferred_element_type=jnp.float32).reshape(B, S, num_kv_heads, hd)
    v = jnp.dot(xb, wv, preferred_element_type=jnp.float32).reshape(B, S, num_kv_heads, hd)

    def rope(t):
        tr = jnp.concatenate([-t[..., half:], t[..., :half]], axis=-1)
        return t * cos[None, :, None, :] + tr * sin[None, :, None, :]

    q, k = rope(q), rope(k)
    k = jnp.repeat(k, g, axis=2)
    v = jnp.repeat(v, g, axis=2)
    s = jnp.einsum('bqhd,bkhd->bhqk', q.astype(jnp.bfloat16), k.astype(jnp.bfloat16),
                   preferred_element_type=jnp.float32) * scale
    p = jax.nn.softmax(s, axis=-1)
    o = jnp.einsum('bhqk,bkhd->bqhd', p.astype(jnp.bfloat16), v.astype(jnp.bfloat16),
                   preferred_element_type=jnp.float32)
    o = o.reshape(B, S, H).astype(jnp.bfloat16)
    return jnp.dot(o, wo, preferred_element_type=jnp.float32).astype(x.dtype)


# ---------------------------------------------------------------------------
# Demo / self-check
# ---------------------------------------------------------------------------
if __name__ == "__main__":
    # Small shapes consistent with the module: 4x4 spatial grid -> 16 tokens,
    # hidden=128, 4 query heads / 2 kv heads (GQA), head_dim=32 (divisible by 4).
    B = 2
    grid = 4
    S = grid * grid
    num_heads = 4
    num_kv_heads = 2
    head_dim = 32
    H = num_heads * head_dim
    num_hidden_layers = 12
    initializer_range = 0.01

    key = jax.random.PRNGKey(0)
    kx, kp = jax.random.split(key)
    x = jax.random.normal(kx, (B, S, H), jnp.float32)
    wq, wk, wv, wo = make_params(kp, H, num_heads, num_kv_heads,
                                 num_hidden_layers, initializer_range)
    cos, sin = rotary_3d_cos_sin(S, head_dim)

    y = stable_attention_3d(x, wq, wk, wv, wo, cos, sin,
                            num_heads=num_heads, num_kv_heads=num_kv_heads)
    y = jax.block_until_ready(y)

    y_ref = attention_ref(x, wq, wk, wv, wo, cos, sin,
                          num_heads=num_heads, num_kv_heads=num_kv_heads)
    assert y.shape == (B, S, H)
    err = float(jnp.max(jnp.abs(y - y_ref)))
    # bf16 matmul operands + EUP approx reciprocal -> compare against a
    # precision-matched reference with a correspondingly scaled tolerance.
    assert jnp.allclose(y, y_ref, atol=5e-5, rtol=2e-2), \
        f"mismatch vs ref, max abs err={err}"

    print("KERNEL_OK")
</pallas_src>

<mosaic_0001>
module attributes {stable_mosaic.version = 11 : i64} {
  func.func @attention_kernel(%arg0: i32, %arg1: i32, %arg2: memref<1x16x128xf32, #tpu.memory_space<vmem>>, %arg3: memref<128x128xbf16, #tpu.memory_space<vmem>>, %arg4: memref<128x64xbf16, #tpu.memory_space<vmem>>, %arg5: memref<128x64xbf16, #tpu.memory_space<vmem>>, %arg6: memref<128x128xbf16, #tpu.memory_space<vmem>>, %arg7: memref<16x32xf32, #tpu.memory_space<vmem>>, %arg8: memref<16x32xf32, #tpu.memory_space<vmem>>, %arg9: memref<1x16x128xf32, #tpu.memory_space<vmem>>, %arg10: memref<4x16x32xbf16, #tpu.memory_space<vmem>>, %arg11: memref<4x16x32xbf16, #tpu.memory_space<vmem>>) attributes {dimension_semantics = [#tpu.dimension_semantics<parallel>, #tpu.dimension_semantics<arbitrary>], iteration_bounds = array<i64: 2, 1>, scalar_prefetch = 0 : i64, scratch_operands = 2 : i64, tpu.core_type = #tpu.core_type<tc>, window_params = [{transform_indices = @transform_0, window_bounds = array<i64: 1, 16, 128>}, {pipeline_mode = #tpu.pipeline_mode<synchronous>, transform_indices = @transform_1, window_bounds = array<i64: 128, 128>}, {pipeline_mode = #tpu.pipeline_mode<synchronous>, transform_indices = @transform_2, window_bounds = array<i64: 128, 64>}, {pipeline_mode = #tpu.pipeline_mode<synchronous>, transform_indices = @transform_3, window_bounds = array<i64: 128, 64>}, {pipeline_mode = #tpu.pipeline_mode<synchronous>, transform_indices = @transform_4, window_bounds = array<i64: 128, 128>}, {pipeline_mode = #tpu.pipeline_mode<synchronous>, transform_indices = @transform_5, window_bounds = array<i64: 16, 32>}, {pipeline_mode = #tpu.pipeline_mode<synchronous>, transform_indices = @transform_6, window_bounds = array<i64: 16, 32>}, {transform_indices = @transform_7, window_bounds = array<i64: 1, 16, 128>}]} {
    %c0_i32 = arith.constant 0 : i32
    %0 = arith.cmpi eq, %arg1, %c0_i32 : i32
    %1 = arith.extui %0 : i1 to i32
    %c0_i32_0 = arith.constant 0 : i32
    %2 = arith.cmpi ne, %1, %c0_i32_0 : i32
    scf.if %2 {
      %c0_25 = arith.constant 0 : index
      %c0_26 = arith.constant 0 : index
      %c0_27 = arith.constant 0 : index
      %56 = vector.load %arg2[%c0_25, %c0_26, %c0_27] : memref<1x16x128xf32, #tpu.memory_space<vmem>>, vector<1x16x128xf32>
      %57 = vector.shape_cast %56 : vector<1x16x128xf32> to vector<16x128xf32>
      %58 = arith.truncf %57 : vector<16x128xf32> to vector<16x128xbf16>
      %c0_28 = arith.constant 0 : index
      %c0_29 = arith.constant 0 : index
      %59 = vector.load %arg4[%c0_28, %c0_29] : memref<128x64xbf16, #tpu.memory_space<vmem>>, vector<128x64xbf16>
      %cst_30 = arith.constant dense<0.000000e+00> : vector<16x64xf32>
      %60 = tpu.matmul %58, %59, %cst_30 {dimension_numbers = #tpu.dot_dimension_numbers<[1], [0], [0], [1], [0, 0, 1, 1], [], []>} : vector<16x128xbf16>, vector<128x64xbf16>, vector<16x64xf32> -> vector<16x64xf32>
      %c0_31 = arith.constant 0 : index
      %c0_32 = arith.constant 0 : index
      %61 = vector.load %arg5[%c0_31, %c0_32] : memref<128x64xbf16, #tpu.memory_space<vmem>>, vector<128x64xbf16>
      %cst_33 = arith.constant dense<0.000000e+00> : vector<16x64xf32>
      %62 = tpu.matmul %58, %61, %cst_33 {dimension_numbers = #tpu.dot_dimension_numbers<[1], [0], [0], [1], [0, 0, 1, 1], [], []>} : vector<16x128xbf16>, vector<128x64xbf16>, vector<16x64xf32> -> vector<16x64xf32>
      %c0_34 = arith.constant 0 : index
      %c0_35 = arith.constant 0 : index
      %63 = vector.load %arg7[%c0_34, %c0_35] : memref<16x32xf32, #tpu.memory_space<vmem>>, vector<16x32xf32>
      %c0_36 = arith.constant 0 : index
      %c0_37 = arith.constant 0 : index
      %64 = vector.load %arg8[%c0_36, %c0_37] : memref<16x32xf32, #tpu.memory_space<vmem>>, vector<16x32xf32>
      %65 = vector.shape_cast %60 : vector<16x64xf32> to vector<16x2x32xf32>
      %66 = vector.shape_cast %63 : vector<16x32xf32> to vector<16x1x32xf32>
      %67 = vector.shape_cast %64 : vector<16x32xf32> to vector<16x1x32xf32>
      %68 = vector.extract_strided_slice %65 {offsets = [0, 0, 16], sizes = [16, 2, 16], strides = [1, 1, 1]} : vector<16x2x32xf32> to vector<16x2x16xf32>
      %cst_38 = arith.constant 0.000000e+00 : f32
      %69 = vector.broadcast %cst_38 : f32 to vector<16x2x16xf32>
      %70 = arith.subf %69, %68 : vector<16x2x16xf32>
      %71 = vector.extract_strided_slice %65 {offsets = [0, 0, 0], sizes = [16, 2, 16], strides = [1, 1, 1]} : vector<16x2x32xf32> to vector<16x2x16xf32>
      %72 = tpu.concatenate %70, %71 in 2 : vector<16x2x16xf32>, vector<16x2x16xf32> -> vector<16x2x32xf32>
      %73 = vector.broadcast %66 : vector<16x1x32xf32> to vector<16x2x32xf32>
      %74 = arith.mulf %65, %73 : vector<16x2x32xf32>
      %75 = vector.broadcast %67 : vector<16x1x32xf32> to vector<16x2x32xf32>
      %76 = arith.mulf %72, %75 : vector<16x2x32xf32>
      %77 = arith.addf %74, %76 : vector<16x2x32xf32>
      %78 = tpu.transpose %77, [1, 0, 2] : vector<16x2x32xf32> -> vector<2x16x32xf32>
      %79 = arith.truncf %78 : vector<2x16x32xf32> to vector<2x16x32xbf16>
      %80 = vector.shape_cast %62 : vector<16x64xf32> to vector<16x2x32xf32>
      %81 = tpu.transpose %80, [1, 0, 2] : vector<16x2x32xf32> -> vector<2x16x32xf32>
      %82 = arith.truncf %81 : vector<2x16x32xf32> to vector<2x16x32xbf16>
      %83 = vector.shape_cast %79 : vector<2x16x32xbf16> to vector<2x1x16x32xbf16>
      %84 = vector.shape_cast %83 : vector<2x1x16x32xbf16> to vector<2x1x16x32xbf16>
      %85 = vector.broadcast %84 : vector<2x1x16x32xbf16> to vector<2x2x16x32xbf16>
      %86 = vector.shape_cast %85 : vector<2x2x16x32xbf16> to vector<4x16x32xbf16>
      %c0_39 = arith.constant 0 : index
      %c0_40 = arith.constant 0 : index
      %c0_41 = arith.constant 0 : index
      %87 = vector.load %arg10[%c0_39, %c0_40, %c0_41] : memref<4x16x32xbf16, #tpu.memory_space<vmem>>, vector<4x16x32xbf16>
      tpu.vector_store %arg10[%c0_39, %c0_40, %c0_41], %86 {strides = array<i32>} : memref<4x16x32xbf16, #tpu.memory_space<vmem>>, vector<4x16x32xbf16>,
      %88 = vector.shape_cast %82 : vector<2x16x32xbf16> to vector<2x1x16x32xbf16>
      %89 = vector.shape_cast %88 : vector<2x1x16x32xbf16> to vector<2x1x16x32xbf16>
      %90 = vector.broadcast %89 : vector<2x1x16x32xbf16> to vector<2x2x16x32xbf16>
      %91 = vector.shape_cast %90 : vector<2x2x16x32xbf16> to vector<4x16x32xbf16>
      %c0_42 = arith.constant 0 : index
      %c0_43 = arith.constant 0 : index
      %c0_44 = arith.constant 0 : index
      %92 = vector.load %arg11[%c0_42, %c0_43, %c0_44] : memref<4x16x32xbf16, #tpu.memory_space<vmem>>, vector<4x16x32xbf16>
      tpu.vector_store %arg11[%c0_42, %c0_43, %c0_44], %91 {strides = array<i32>} : memref<4x16x32xbf16, #tpu.memory_space<vmem>>, vector<4x16x32xbf16>,
    } else {
    }
    %c16_i32 = arith.constant 16 : i32
    %3 = arith.muli %arg1, %c16_i32 : i32
    %4 = tpu.assume_multiple %3, 16 : i32
    %c0 = arith.constant 0 : index
    %5 = arith.index_cast %4 : i32 to index
    %c0_1 = arith.constant 0 : index
    %6 = vector.load %arg2[%c0, %5, %c0_1] : memref<1x16x128xf32, #tpu.memory_space<vmem>>, vector<1x16x128xf32>
    %7 = vector.shape_cast %6 : vector<1x16x128xf32> to vector<16x128xf32>
    %8 = arith.truncf %7 : vector<16x128xf32> to vector<16x128xbf16>
    %c0_2 = arith.constant 0 : index
    %c0_3 = arith.constant 0 : index
    %9 = vector.load %arg3[%c0_2, %c0_3] : memref<128x128xbf16, #tpu.memory_space<vmem>>, vector<128x128xbf16>
    %cst = arith.constant dense<0.000000e+00> : vector<16x128xf32>
    %10 = tpu.matmul %8, %9, %cst {dimension_numbers = #tpu.dot_dimension_numbers<[1], [0], [0], [1], [0, 0, 1, 1], [], []>} : vector<16x128xbf16>, vector<128x128xbf16>, vector<16x128xf32> -> vector<16x128xf32>
    %11 = arith.index_cast %4 : i32 to index
    %c0_4 = arith.constant 0 : index
    %12 = vector.load %arg7[%11, %c0_4] : memref<16x32xf32, #tpu.memory_space<vmem>>, vector<16x32xf32>
    %cst_5 = arith.constant 0.176776692 : f32
    %13 = vector.broadcast %cst_5 : f32 to vector<16x32xf32>
    %14 = arith.mulf %12, %13 : vector<16x32xf32>
    %15 = arith.index_cast %4 : i32 to index
    %c0_6 = arith.constant 0 : index
    %16 = vector.load %arg8[%15, %c0_6] : memref<16x32xf32, #tpu.memory_space<vmem>>, vector<16x32xf32>
    %cst_7 = arith.constant 0.176776692 : f32
    %17 = vector.broadcast %cst_7 : f32 to vector<16x32xf32>
    %18 = arith.mulf %16, %17 : vector<16x32xf32>
    %19 = vector.shape_cast %10 : vector<16x128xf32> to vector<16x4x32xf32>
    %20 = vector.shape_cast %14 : vector<16x32xf32> to vector<16x1x32xf32>
    %21 = vector.shape_cast %18 : vector<16x32xf32> to vector<16x1x32xf32>
    %22 = vector.extract_strided_slice %19 {offsets = [0, 0, 16], sizes = [16, 4, 16], strides = [1, 1, 1]} : vector<16x4x32xf32> to vector<16x4x16xf32>
    %cst_8 = arith.constant 0.000000e+00 : f32
    %23 = vector.broadcast %cst_8 : f32 to vector<16x4x16xf32>
    %24 = arith.subf %23, %22 : vector<16x4x16xf32>
    %25 = vector.extract_strided_slice %19 {offsets = [0, 0, 0], sizes = [16, 4, 16], strides = [1, 1, 1]} : vector<16x4x32xf32> to vector<16x4x16xf32>
    %26 = tpu.concatenate %24, %25 in 2 : vector<16x4x16xf32>, vector<16x4x16xf32> -> vector<16x4x32xf32>
    %27 = vector.broadcast %20 : vector<16x1x32xf32> to vector<16x4x32xf32>
    %28 = arith.mulf %19, %27 : vector<16x4x32xf32>
    %29 = vector.broadcast %21 : vector<16x1x32xf32> to vector<16x4x32xf32>
    %30 = arith.mulf %26, %29 : vector<16x4x32xf32>
    %31 = arith.addf %28, %30 : vector<16x4x32xf32>
    %32 = arith.truncf %31 : vector<16x4x32xf32> to vector<16x4x32xbf16>
    %c0_9 = arith.constant 0 : index
    %c0_10 = arith.constant 0 : index
    %c0_11 = arith.constant 0 : index
    %33 = vector.load %arg10[%c0_9, %c0_10, %c0_11] : memref<4x16x32xbf16, #tpu.memory_space<vmem>>, vector<4x16x32xbf16>
    %c0_12 = arith.constant 0 : index
    %c0_13 = arith.constant 0 : index
    %c0_14 = arith.constant 0 : index
    %34 = vector.load %arg11[%c0_12, %c0_13, %c0_14] : memref<4x16x32xbf16, #tpu.memory_space<vmem>>, vector<4x16x32xbf16>
    "tpu.trace_start"() <{level = 10 : i32, message = "qhd,hkd->hqk"}> : () -> ()
    %cst_15 = arith.constant dense<0.000000e+00> : vector<4x16x16xf32>
    %35 = tpu.matmul %32, %33, %cst_15 {dimension_numbers = #tpu.dot_dimension_numbers<[2], [2], [0], [1], [0, 1, 0, 0, 1, 1], [1], [0]>} : vector<16x4x32xbf16>, vector<4x16x32xbf16>, vector<4x16x16xf32> -> vector<4x16x16xf32>
    "tpu.trace_stop"() : () -> ()
    %cst_16 = arith.constant dense<0xFF800000> : vector<4x16xf32>
    %36 = vector.multi_reduction <maximumf>, %35, %cst_16 [2] : vector<4x16x16xf32> to vector<4x16xf32>
    %37 = vector.shape_cast %36 : vector<4x16xf32> to vector<4x16x1xf32>
    %38 = vector.broadcast %37 : vector<4x16x1xf32> to vector<4x16x16xf32>
    %39 = arith.subf %35, %38 : vector<4x16x16xf32>
    %40 = math.exp %39 : vector<4x16x16xf32>
    %cst_17 = arith.constant dense<0.000000e+00> : vector<4x16xf32>
    %41 = vector.multi_reduction <add>, %40, %cst_17 [2] : vector<4x16x16xf32> to vector<4x16xf32>
    %42 = vector.shape_cast %41 : vector<4x16xf32> to vector<4x16x1xf32>
    %43 = arith.truncf %40 : vector<4x16x16xf32> to vector<4x16x16xbf16>
    "tpu.trace_start"() <{level = 10 : i32, message = "hqk,hkd->hqd"}> : () -> ()
    %cst_18 = arith.constant dense<0.000000e+00> : vector<4x16x32xf32>
    %44 = tpu.matmul %43, %34, %cst_18 {dimension_numbers = #tpu.dot_dimension_numbers<[2], [1], [1], [2], [0, 0, 0, 1, 1, 2], [0], [0]>} : vector<4x16x16xbf16>, vector<4x16x32xbf16>, vector<4x16x32xf32> -> vector<4x16x32xf32>
    "tpu.trace_stop"() : () -> ()
    %45 = tpu.reciprocal %42 {approx = true} : vector<4x16x1xf32> -> vector<4x16x1xf32>
    %46 = vector.broadcast %45 : vector<4x16x1xf32> to vector<4x16x32xf32>
    %47 = arith.mulf %44, %46 : vector<4x16x32xf32>
    %48 = tpu.transpose %47, [1, 0, 2] : vector<4x16x32xf32> -> vector<16x4x32xf32>
    %49 = vector.shape_cast %48 : vector<16x4x32xf32> to vector<16x128xf32>
    %50 = arith.truncf %49 : vector<16x128xf32> to vector<16x128xbf16>
    %c0_19 = arith.constant 0 : index
    %c0_20 = arith.constant 0 : index
    %51 = vector.load %arg6[%c0_19, %c0_20] : memref<128x128xbf16, #tpu.memory_space<vmem>>, vector<128x128xbf16>
    %cst_21 = arith.constant dense<0.000000e+00> : vector<16x128xf32>
    %52 = tpu.matmul %50, %51, %cst_21 {dimension_numbers = #tpu.dot_dimension_numbers<[1], [0], [0], [1], [0, 0, 1, 1], [], []>} : vector<16x128xbf16>, vector<128x128xbf16>, vector<16x128xf32> -> vector<16x128xf32>
    %c0_22 = arith.constant 0 : index
    %c0_23 = arith.constant 0 : index
    %c0_24 = arith.constant 0 : index
    %53 = vector.load %arg9[%c0_22, %c0_23, %c0_24] : memref<1x16x128xf32, #tpu.memory_space<vmem>>, vector<1x16x128xf32>
    %54 = vector.shape_cast %53 : vector<1x16x128xf32> to vector<16x128xf32>
    %55 = vector.shape_cast %52 : vector<16x128xf32> to vector<1x16x128xf32>
    tpu.vector_store %arg9[%c0_22, %c0_23, %c0_24], %55 {strides = array<i32>} : memref<1x16x128xf32, #tpu.memory_space<vmem>>, vector<1x16x128xf32>,
    return
  }
  func.func @transform_0(%arg0: i32, %arg1: i32) -> (i32, i32, i32) {
    %c0_i32 = arith.constant 0 : i32
    %c0_i32_0 = arith.constant 0 : i32
    %c0_i32_1 = arith.constant 0 : i32
    return %arg0, %c0_i32, %c0_i32_0 : i32, i32, i32
  }
  func.func @transform_1(%arg0: i32, %arg1: i32) -> (i32, i32) {
    %c0_i32 = arith.constant 0 : i32
    %c0_i32_0 = arith.constant 0 : i32
    %c0_i32_1 = arith.constant 0 : i32
    return %c0_i32, %c0_i32_0 : i32, i32
  }
  func.func @transform_2(%arg0: i32, %arg1: i32) -> (i32, i32) {
    %c0_i32 = arith.constant 0 : i32
    %c0_i32_0 = arith.constant 0 : i32
    %c0_i32_1 = arith.constant 0 : i32
    return %c0_i32, %c0_i32_0 : i32, i32
  }
  func.func @transform_3(%arg0: i32, %arg1: i32) -> (i32, i32) {
    %c0_i32 = arith.constant 0 : i32
    %c0_i32_0 = arith.constant 0 : i32
    %c0_i32_1 = arith.constant 0 : i32
    return %c0_i32, %c0_i32_0 : i32, i32
  }
  func.func @transform_4(%arg0: i32, %arg1: i32) -> (i32, i32) {
    %c0_i32 = arith.constant 0 : i32
    %c0_i32_0 = arith.constant 0 : i32
    %c0_i32_1 = arith.constant 0 : i32
    return %c0_i32, %c0_i32_0 : i32, i32
  }
  func.func @transform_5(%arg0: i32, %arg1: i32) -> (i32, i32) {
    %c0_i32 = arith.constant 0 : i32
    %c0_i32_0 = arith.constant 0 : i32
    %c0_i32_1 = arith.constant 0 : i32
    return %c0_i32, %c0_i32_0 : i32, i32
  }
  func.func @transform_6(%arg0: i32, %arg1: i32) -> (i32, i32) {
    %c0_i32 = arith.constant 0 : i32
    %c0_i32_0 = arith.constant 0 : i32
    %c0_i32_1 = arith.constant 0 : i32
    return %c0_i32, %c0_i32_0 : i32, i32
  }
  func.func @transform_7(%arg0: i32, %arg1: i32) -> (i32, i32, i32) {
    %c0_i32 = arith.constant 0 : i32
    %c0_i32_0 = arith.constant 0 : i32
    return %arg0, %arg1, %c0_i32 : i32, i32, i32
  }
}

module attributes {stable_mosaic.version = 11 : i64} {
  func.func @attention_kernel(%arg0: i32, %arg1: i32, %arg2: memref<1x16x128xf32, #tpu.memory_space<vmem>>, %arg3: memref<128x128xbf16, #tpu.memory_space<vmem>>, %arg4: memref<128x64xbf16, #tpu.memory_space<vmem>>, %arg5: memref<128x64xbf16, #tpu.memory_space<vmem>>, %arg6: memref<128x128xbf16, #tpu.memory_space<vmem>>, %arg7: memref<16x32xf32, #tpu.memory_space<vmem>>, %arg8: memref<16x32xf32, #tpu.memory_space<vmem>>, %arg9: memref<1x16x128xf32, #tpu.memory_space<vmem>>, %arg10: memref<4x16x32xbf16, #tpu.memory_space<vmem>>, %arg11: memref<4x16x32xbf16, #tpu.memory_space<vmem>>) attributes {dimension_semantics = [#tpu.dimension_semantics<parallel>, #tpu.dimension_semantics<arbitrary>], iteration_bounds = array<i64: 2, 1>, scalar_prefetch = 0 : i64, scratch_operands = 2 : i64, tpu.core_type = #tpu.core_type<tc>, window_params = [{transform_indices = @transform_0, window_bounds = array<i64: 1, 16, 128>}, {pipeline_mode = #tpu.pipeline_mode<synchronous>, transform_indices = @transform_1, window_bounds = array<i64: 128, 128>}, {pipeline_mode = #tpu.pipeline_mode<synchronous>, transform_indices = @transform_2, window_bounds = array<i64: 128, 64>}, {pipeline_mode = #tpu.pipeline_mode<synchronous>, transform_indices = @transform_3, window_bounds = array<i64: 128, 64>}, {pipeline_mode = #tpu.pipeline_mode<synchronous>, transform_indices = @transform_4, window_bounds = array<i64: 128, 128>}, {pipeline_mode = #tpu.pipeline_mode<synchronous>, transform_indices = @transform_5, window_bounds = array<i64: 16, 32>}, {pipeline_mode = #tpu.pipeline_mode<synchronous>, transform_indices = @transform_6, window_bounds = array<i64: 16, 32>}, {transform_indices = @transform_7, window_bounds = array<i64: 1, 16, 128>}]} {
    %c0_i32 = arith.constant 0 : i32
    %0 = arith.cmpi eq, %arg1, %c0_i32 : i32
    %1 = arith.extui %0 : i1 to i32
    %c0_i32_0 = arith.constant 0 : i32
    %2 = arith.cmpi ne, %1, %c0_i32_0 : i32
    scf.if %2 {
      %c0_25 = arith.constant 0 : index
      %c0_26 = arith.constant 0 : index
      %c0_27 = arith.constant 0 : index
      %56 = vector.load %arg2[%c0_25, %c0_26, %c0_27] : memref<1x16x128xf32, #tpu.memory_space<vmem>>, vector<1x16x128xf32>
      %57 = vector.shape_cast %56 : vector<1x16x128xf32> to vector<16x128xf32>
      %58 = arith.truncf %57 : vector<16x128xf32> to vector<16x128xbf16>
      %c0_28 = arith.constant 0 : index
      %c0_29 = arith.constant 0 : index
      %59 = vector.load %arg4[%c0_28, %c0_29] : memref<128x64xbf16, #tpu.memory_space<vmem>>, vector<128x64xbf16>
      %cst_30 = arith.constant dense<0.000000e+00> : vector<16x64xf32>
      %60 = tpu.matmul %58, %59, %cst_30 {dimension_numbers = #tpu.dot_dimension_numbers<[1], [0], [0], [1], [0, 0, 1, 1], [], []>} : vector<16x128xbf16>, vector<128x64xbf16>, vector<16x64xf32> -> vector<16x64xf32>
      %c0_31 = arith.constant 0 : index
      %c0_32 = arith.constant 0 : index
      %61 = vector.load %arg5[%c0_31, %c0_32] : memref<128x64xbf16, #tpu.memory_space<vmem>>, vector<128x64xbf16>
      %cst_33 = arith.constant dense<0.000000e+00> : vector<16x64xf32>
      %62 = tpu.matmul %58, %61, %cst_33 {dimension_numbers = #tpu.dot_dimension_numbers<[1], [0], [0], [1], [0, 0, 1, 1], [], []>} : vector<16x128xbf16>, vector<128x64xbf16>, vector<16x64xf32> -> vector<16x64xf32>
      %c0_34 = arith.constant 0 : index
      %c0_35 = arith.constant 0 : index
      %63 = vector.load %arg7[%c0_34, %c0_35] : memref<16x32xf32, #tpu.memory_space<vmem>>, vector<16x32xf32>
      %c0_36 = arith.constant 0 : index
      %c0_37 = arith.constant 0 : index
      %64 = vector.load %arg8[%c0_36, %c0_37] : memref<16x32xf32, #tpu.memory_space<vmem>>, vector<16x32xf32>
      %65 = vector.shape_cast %60 : vector<16x64xf32> to vector<16x2x32xf32>
      %66 = vector.shape_cast %63 : vector<16x32xf32> to vector<16x1x32xf32>
      %67 = vector.shape_cast %64 : vector<16x32xf32> to vector<16x1x32xf32>
      %68 = vector.extract_strided_slice %65 {offsets = [0, 0, 16], sizes = [16, 2, 16], strides = [1, 1, 1]} : vector<16x2x32xf32> to vector<16x2x16xf32>
      %cst_38 = arith.constant 0.000000e+00 : f32
      %69 = vector.broadcast %cst_38 : f32 to vector<16x2x16xf32>
      %70 = arith.subf %69, %68 : vector<16x2x16xf32>
      %71 = vector.extract_strided_slice %65 {offsets = [0, 0, 0], sizes = [16, 2, 16], strides = [1, 1, 1]} : vector<16x2x32xf32> to vector<16x2x16xf32>
      %72 = tpu.concatenate %70, %71 in 2 : vector<16x2x16xf32>, vector<16x2x16xf32> -> vector<16x2x32xf32>
      %73 = vector.broadcast %66 : vector<16x1x32xf32> to vector<16x2x32xf32>
      %74 = arith.mulf %65, %73 : vector<16x2x32xf32>
      %75 = vector.broadcast %67 : vector<16x1x32xf32> to vector<16x2x32xf32>
      %76 = arith.mulf %72, %75 : vector<16x2x32xf32>
      %77 = arith.addf %74, %76 : vector<16x2x32xf32>
      %78 = tpu.transpose %77, [1, 0, 2] : vector<16x2x32xf32> -> vector<2x16x32xf32>
      %79 = arith.truncf %78 : vector<2x16x32xf32> to vector<2x16x32xbf16>
      %80 = vector.shape_cast %62 : vector<16x64xf32> to vector<16x2x32xf32>
      %81 = tpu.transpose %80, [1, 0, 2] : vector<16x2x32xf32> -> vector<2x16x32xf32>
      %82 = arith.truncf %81 : vector<2x16x32xf32> to vector<2x16x32xbf16>
      %83 = vector.shape_cast %79 : vector<2x16x32xbf16> to vector<2x1x16x32xbf16>
      %84 = vector.shape_cast %83 : vector<2x1x16x32xbf16> to vector<2x1x16x32xbf16>
      %85 = vector.broadcast %84 : vector<2x1x16x32xbf16> to vector<2x2x16x32xbf16>
      %86 = vector.shape_cast %85 : vector<2x2x16x32xbf16> to vector<4x16x32xbf16>
      %c0_39 = arith.constant 0 : index
      %c0_40 = arith.constant 0 : index
      %c0_41 = arith.constant 0 : index
      %87 = vector.load %arg10[%c0_39, %c0_40, %c0_41] : memref<4x16x32xbf16, #tpu.memory_space<vmem>>, vector<4x16x32xbf16>
      tpu.vector_store %arg10[%c0_39, %c0_40, %c0_41], %86 {strides = array<i32>} : memref<4x16x32xbf16, #tpu.memory_space<vmem>>, vector<4x16x32xbf16>,
      %88 = vector.shape_cast %82 : vector<2x16x32xbf16> to vector<2x1x16x32xbf16>
      %89 = vector.shape_cast %88 : vector<2x1x16x32xbf16> to vector<2x1x16x32xbf16>
      %90 = vector.broadcast %89 : vector<2x1x16x32xbf16> to vector<2x2x16x32xbf16>
      %91 = vector.shape_cast %90 : vector<2x2x16x32xbf16> to vector<4x16x32xbf16>
      %c0_42 = arith.constant 0 : index
      %c0_43 = arith.constant 0 : index
      %c0_44 = arith.constant 0 : index
      %92 = vector.load %arg11[%c0_42, %c0_43, %c0_44] : memref<4x16x32xbf16, #tpu.memory_space<vmem>>, vector<4x16x32xbf16>
      tpu.vector_store %arg11[%c0_42, %c0_43, %c0_44], %91 {strides = array<i32>} : memref<4x16x32xbf16, #tpu.memory_space<vmem>>, vector<4x16x32xbf16>,
    } else {
    }
    %c16_i32 = arith.constant 16 : i32
    %3 = arith.muli %arg1, %c16_i32 : i32
    %4 = tpu.assume_multiple %3, 16 : i32
    %c0 = arith.constant 0 : index
    %5 = arith.index_cast %4 : i32 to index
    %c0_1 = arith.constant 0 : index
    %6 = vector.load %arg2[%c0, %5, %c0_1] : memref<1x16x128xf32, #tpu.memory_space<vmem>>, vector<1x16x128xf32>
    %7 = vector.shape_cast %6 : vector<1x16x128xf32> to vector<16x128xf32>
    %8 = arith.truncf %7 : vector<16x128xf32> to vector<16x128xbf16>
    %c0_2 = arith.constant 0 : index
    %c0_3 = arith.constant 0 : index
    %9 = vector.load %arg3[%c0_2, %c0_3] : memref<128x128xbf16, #tpu.memory_space<vmem>>, vector<128x128xbf16>
    %cst = arith.constant dense<0.000000e+00> : vector<16x128xf32>
    %10 = tpu.matmul %8, %9, %cst {dimension_numbers = #tpu.dot_dimension_numbers<[1], [0], [0], [1], [0, 0, 1, 1], [], []>} : vector<16x128xbf16>, vector<128x128xbf16>, vector<16x128xf32> -> vector<16x128xf32>
    %11 = arith.index_cast %4 : i32 to index
    %c0_4 = arith.constant 0 : index
    %12 = vector.load %arg7[%11, %c0_4] : memref<16x32xf32, #tpu.memory_space<vmem>>, vector<16x32xf32>
    %cst_5 = arith.constant 0.176776692 : f32
    %13 = vector.broadcast %cst_5 : f32 to vector<16x32xf32>
    %14 = arith.mulf %12, %13 : vector<16x32xf32>
    %15 = arith.index_cast %4 : i32 to index
    %c0_6 = arith.constant 0 : index
    %16 = vector.load %arg8[%15, %c0_6] : memref<16x32xf32, #tpu.memory_space<vmem>>, vector<16x32xf32>
    %cst_7 = arith.constant 0.176776692 : f32
    %17 = vector.broadcast %cst_7 : f32 to vector<16x32xf32>
    %18 = arith.mulf %16, %17 : vector<16x32xf32>
    %19 = vector.shape_cast %10 : vector<16x128xf32> to vector<16x4x32xf32>
    %20 = vector.shape_cast %14 : vector<16x32xf32> to vector<16x1x32xf32>
    %21 = vector.shape_cast %18 : vector<16x32xf32> to vector<16x1x32xf32>
    %22 = vector.extract_strided_slice %19 {offsets = [0, 0, 16], sizes = [16, 4, 16], strides = [1, 1, 1]} : vector<16x4x32xf32> to vector<16x4x16xf32>
    %cst_8 = arith.constant 0.000000e+00 : f32
    %23 = vector.broadcast %cst_8 : f32 to vector<16x4x16xf32>
    %24 = arith.subf %23, %22 : vector<16x4x16xf32>
    %25 = vector.extract_strided_slice %19 {offsets = [0, 0, 0], sizes = [16, 4, 16], strides = [1, 1, 1]} : vector<16x4x32xf32> to vector<16x4x16xf32>
    %26 = tpu.concatenate %24, %25 in 2 : vector<16x4x16xf32>, vector<16x4x16xf32> -> vector<16x4x32xf32>
    %27 = vector.broadcast %20 : vector<16x1x32xf32> to vector<16x4x32xf32>
    %28 = arith.mulf %19, %27 : vector<16x4x32xf32>
    %29 = vector.broadcast %21 : vector<16x1x32xf32> to vector<16x4x32xf32>
    %30 = arith.mulf %26, %29 : vector<16x4x32xf32>
    %31 = arith.addf %28, %30 : vector<16x4x32xf32>
    %32 = arith.truncf %31 : vector<16x4x32xf32> to vector<16x4x32xbf16>
    %c0_9 = arith.constant 0 : index
    %c0_10 = arith.constant 0 : index
    %c0_11 = arith.constant 0 : index
    %33 = vector.load %arg10[%c0_9, %c0_10, %c0_11] : memref<4x16x32xbf16, #tpu.memory_space<vmem>>, vector<4x16x32xbf16>
    %c0_12 = arith.constant 0 : index
    %c0_13 = arith.constant 0 : index
    %c0_14 = arith.constant 0 : index
    %34 = vector.load %arg11[%c0_12, %c0_13, %c0_14] : memref<4x16x32xbf16, #tpu.memory_space<vmem>>, vector<4x16x32xbf16>
    "tpu.trace_start"() <{level = 10 : i32, message = "qhd,hkd->hqk"}> : () -> ()
    %cst_15 = arith.constant dense<0.000000e+00> : vector<4x16x16xf32>
    %35 = tpu.matmul %32, %33, %cst_15 {dimension_numbers = #tpu.dot_dimension_numbers<[2], [2], [0], [1], [0, 1, 0, 0, 1, 1], [1], [0]>} : vector<16x4x32xbf16>, vector<4x16x32xbf16>, vector<4x16x16xf32> -> vector<4x16x16xf32>
    "tpu.trace_stop"() : () -> ()
    %cst_16 = arith.constant dense<0xFF800000> : vector<4x16xf32>
    %36 = vector.multi_reduction <maximumf>, %35, %cst_16 [2] : vector<4x16x16xf32> to vector<4x16xf32>
    %37 = vector.shape_cast %36 : vector<4x16xf32> to vector<4x16x1xf32>
    %38 = vector.broadcast %37 : vector<4x16x1xf32> to vector<4x16x16xf32>
    %39 = arith.subf %35, %38 : vector<4x16x16xf32>
    %40 = math.exp %39 : vector<4x16x16xf32>
    %cst_17 = arith.constant dense<0.000000e+00> : vector<4x16xf32>
    %41 = vector.multi_reduction <add>, %40, %cst_17 [2] : vector<4x16x16xf32> to vector<4x16xf32>
    %42 = vector.shape_cast %41 : vector<4x16xf32> to vector<4x16x1xf32>
    %43 = arith.truncf %40 : vector<4x16x16xf32> to vector<4x16x16xbf16>
    "tpu.trace_start"() <{level = 10 : i32, message = "hqk,hkd->hqd"}> : () -> ()
    %cst_18 = arith.constant dense<0.000000e+00> : vector<4x16x32xf32>
    %44 = tpu.matmul %43, %34, %cst_18 {dimension_numbers = #tpu.dot_dimension_numbers<[2], [1], [1], [2], [0, 0, 0, 1, 1, 2], [0], [0]>} : vector<4x16x16xbf16>, vector<4x16x32xbf16>, vector<4x16x32xf32> -> vector<4x16x32xf32>
    "tpu.trace_stop"() : () -> ()
    %45 = tpu.reciprocal %42 {approx = true} : vector<4x16x1xf32> -> vector<4x16x1xf32>
    %46 = vector.broadcast %45 : vector<4x16x1xf32> to vector<4x16x32xf32>
    %47 = arith.mulf %44, %46 : vector<4x16x32xf32>
    %48 = tpu.transpose %47, [1, 0, 2] : vector<4x16x32xf32> -> vector<16x4x32xf32>
    %49 = vector.shape_cast %48 : vector<16x4x32xf32> to vector<16x128xf32>
    %50 = arith.truncf %49 : vector<16x128xf32> to vector<16x128xbf16>
    %c0_19 = arith.constant 0 : index
    %c0_20 = arith.constant 0 : index
    %51 = vector.load %arg6[%c0_19, %c0_20] : memref<128x128xbf16, #tpu.memory_space<vmem>>, vector<128x128xbf16>
    %cst_21 = arith.constant dense<0.000000e+00> : vector<16x128xf32>
    %52 = tpu.matmul %50, %51, %cst_21 {dimension_numbers = #tpu.dot_dimension_numbers<[1], [0], [0], [1], [0, 0, 1, 1], [], []>} : vector<16x128xbf16>, vector<128x128xbf16>, vector<16x128xf32> -> vector<16x128xf32>
    %c0_22 = arith.constant 0 : index
    %c0_23 = arith.constant 0 : index
    %c0_24 = arith.constant 0 : index
    %53 = vector.load %arg9[%c0_22, %c0_23, %c0_24] : memref<1x16x128xf32, #tpu.memory_space<vmem>>, vector<1x16x128xf32>
    %54 = vector.shape_cast %53 : vector<1x16x128xf32> to vector<16x128xf32>
    %55 = vector.shape_cast %52 : vector<16x128xf32> to vector<1x16x128xf32>
    tpu.vector_store %arg9[%c0_22, %c0_23, %c0_24], %55 {strides = array<i32>} : memref<1x16x128xf32, #tpu.memory_space<vmem>>, vector<1x16x128xf32>,
    return
  }
  func.func @transform_0(%arg0: i32, %arg1: i32) -> (i32, i32, i32) {
    %c0_i32 = arith.constant 0 : i32
    %c0_i32_0 = arith.constant 0 : i32
    %c0_i32_1 = arith.constant 0 : i32
    return %arg0, %c0_i32, %c0_i32_0 : i32, i32, i32
  }
  func.func @transform_1(%arg0: i32, %arg1: i32) -> (i32, i32) {
    %c0_i32 = arith.constant 0 : i32
    %c0_i32_0 = arith.constant 0 : i32
    %c0_i32_1 = arith.constant 0 : i32
    return %c0_i32, %c0_i32_0 : i32, i32
  }
  func.func @transform_2(%arg0: i32, %arg1: i32) -> (i32, i32) {
    %c0_i32 = arith.constant 0 : i32
    %c0_i32_0 = arith.constant 0 : i32
    %c0_i32_1 = arith.constant 0 : i32
    return %c0_i32, %c0_i32_0 : i32, i32
  }
  func.func @transform_3(%arg0: i32, %arg1: i32) -> (i32, i32) {
    %c0_i32 = arith.constant 0 : i32
    %c0_i32_0 = arith.constant 0 : i32
    %c0_i32_1 = arith.constant 0 : i32
    return %c0_i32, %c0_i32_0 : i32, i32
  }
  func.func @transform_4(%arg0: i32, %arg1: i32) -> (i32, i32) {
    %c0_i32 = arith.constant 0 : i32
    %c0_i32_0 = arith.constant 0 : i32
    %c0_i32_1 = arith.constant 0 : i32
    return %c0_i32, %c0_i32_0 : i32, i32
  }
  func.func @transform_5(%arg0: i32, %arg1: i32) -> (i32, i32) {
    %c0_i32 = arith.constant 0 : i32
    %c0_i32_0 = arith.constant 0 : i32
    %c0_i32_1 = arith.constant 0 : i32
    return %c0_i32, %c0_i32_0 : i32, i32
  }
  func.func @transform_6(%arg0: i32, %arg1: i32) -> (i32, i32) {
    %c0_i32 = arith.constant 0 : i32
    %c0_i32_0 = arith.constant 0 : i32
    %c0_i32_1 = arith.constant 0 : i32
    return %c0_i32, %c0_i32_0 : i32, i32
  }
  func.func @transform_7(%arg0: i32, %arg1: i32) -> (i32, i32, i32) {
    %c0_i32 = arith.constant 0 : i32
    %c0_i32_0 = arith.constant 0 : i32
    return %arg0, %arg1, %c0_i32 : i32, i32, i32
  }
}

</mosaic_0001>

<bundles_post_ra>
// kernel: tpu_custom_call.1
= control target key start
LH: loop header
LB: loop body
LE: loop exit
PB: predicated region body
PF: predicated region fallthrough
CT: control target
= control target key end

     0   :  { %12 = vsyncpa [#allocation5], 0  ;;  %s5338_s0 = inlined_call_operand.vmem [shape: f32[2,16,128], index: 0, kind: input, shape index: {}]   ;;  %s5339_s1 = inlined_call_operand.vmem [shape: bf16[128,128], index: 1, kind: input, shape index: {}]   ;;  %s5340_s2 = inlined_call_operand.vmem [shape: bf16[128,64], index: 2, kind: input, shape index: {}]   ;;  %s5341_s3 = inlined_call_operand.vmem [shape: bf16[128,64], index: 3, kind: input, shape index: {}]   ;;  %s5342_s4 = inlined_call_operand.vmem [shape: bf16[128,128], index: 4, kind: input, shape index: {}]   ;;  %s5343_s5 = inlined_call_operand.hbm [shape: f32[16,32], index: 5, kind: input, shape index: {}]   ;;  %s5344_s6 = inlined_call_operand.hbm [shape: f32[16,32], index: 6, kind: input, shape index: {}]   ;;  %s5345_s7 = inlined_call_operand.hbm [shape: f32[2,16,128], index: 7, kind: output, shape index: {}]  }
   0x1   :  { %13 = vsyncpa [#allocation8], 0 }
   0x2   :  { %14 = vsyncpa [#allocation6], 0 }
   0x3   :  { %16 = vsyncpa [#allocation6 + $0x1], 0  ;;  %s4316_s24 = smov 0   ;;  %s4318_s25 = smov 0  }
   0x4   :  { %s4320_s26 = smov 0   ;;  %s4322_s27 = smov 0  }
   0x5   :  { %s4324_s28 = smov 0   ;;  %s4326_s29 = smov 0  }
   0x6 LB: > { %s3661_s30 = sadd.s32 4294967295, %s4257_s29   ;;  %s3662_s8 = sadd.s32 4294967294, %s4257_s29   ;;  %s4257_s29 = sphi %s4326_s29, %s22_s29   ;;  %s4253_s28 = sphi %s4324_s28, %s5364_s28   ;;  %s4249_s27 = sphi %s4322_s27, %s5363_s27   ;;  %s4245_s26 = sphi %s4320_s26, %s5362_s26   ;;  %s4241_s25 = sphi %s4318_s25, %s5361_s25   ;;  %s4237_s24 = sphi %s4316_s24, %s5360_s24  }
   0x7   : > { %s34_s9 = sadd.s32 1, %s4253_s28  ;;  %s195_s10 = sadd.s32 1, %s4245_s26 }
   0x8   : > { %p36_p0 = scmp.ge.s32.totalorder %s34_s9, 2  ;;  %p205_p1 = scmp.ne.s32.totalorder %s4245_s26, %s4241_s25 }
   0x9   : > { %p206_p2 = scmp.eq.s32.totalorder %s3661_s30, 1  ;;  %p211_p3 = scmp.ne.s32.totalorder %s4241_s25, %s4237_s24 }
   0xa   : > { %s5366_s9 = smov (%p36_p0, %s34_s9), 0  ;;  %p212_p5 = scmp.eq.s32.totalorder %s3662_s8, 1 }
   0xb   : > { %p4356_p4 = por %p206_p2, %p205_p1  ;;  %s190_s12 = ssub.s32 %s4253_s28, %s5366_s9 }
   0xc   : > { %p3663_p6 = scmp.ge.s32.totalorder %s4257_s29, 1  ;;  %p193_p7 = scmp.eq.s32.totalorder %s190_s12, 0 }
   0xd   : > { %s5350_s11 = scalar_select %p4356_p4, 1, 0 }
   0xe   : > { %p4363_p8 = por %p212_p5, %p211_p3  ;;  %p219_p9 = scmp.lt.s32.totalorder %s4257_s29, 3 }
   0xf   : > { %s4369_s14 = scalar_select %p193_p7, %s4245_s26, %s195_s10  }
  0x10   : > { %s5351_s13 = scalar_select %p4363_p8, 1, 0 }
  0x11   : > { %p4371_p10 = pnand %p3663_p6, %p219_p9  ;;  %p4375_p11 = scmp.eq.s32.totalorder %s3661_s30, 0 }
  0x12   : > { %s4259_s17 = smov [#allocation4]   ;;  %s4260_s20 = smov [#allocation7]  }
  0x13   : > { %p3950_p12 = pneg %p4371_p10  ;;  %s243_s18 = sshll.u32 %s4259_s17, 4  ;;  %s244_s18 = int_to_ptr.vmem [resolvable:$true] %s243_s18 }
  0x14   : > { %s256_s21 = sshll.u32 %s4260_s20, 4  ;;  %s4132_s22 = scalar_lea.vmem %s244_s18, 256  ;;  %s257_s21 = int_to_ptr.vmem [resolvable:$true] %s256_s21 }
  0x15   : > { %p4383_p13 = pnand %p4375_p11, %p3950_p12  ;;  %p4133_p1 = scmp.ne.s32.totalorder %s244_s18, %s4132_s22 }
  0x16   : > { %p4140_p5 = scmp.lt.s32.totalorder %s244_s18, %s244_s18  ;;  %p4141_p6 = scmp.lt.s32.totalorder %s4132_s22, %s4132_s22 }
  0x17   : > { %p4123_p0 = pneg %p4383_p13 }
  0x18   : > { %p4142_p7 = por %p4141_p6, %p4140_p5 }
  0x19   : > { %p4135_p2 = pnand %p4133_p1, %p4123_p0 }
  0x1b   : > { %p4136_p3 = pneg %p4135_p2 }
  0x1d   : > { %p4143_p9 = pnand %p4142_p7, %p4136_p3 }
  0x1f   : > { %4146 = shalt.err (!%p4143_p9)
}
  0x20   : > { %s4261_s23 = smov 128   ;;  %s4262_s30 = smov 8  }
  0x21   : > { %3953 = dma.hbm_to_vmem [thread:$0]  (!%p4383_p13), %s5343_s5, 256, %s244_s18, [#allocation5], %s4261_s23, %s4261_s23, %s4262_s30  }
  0x22   : > { %s4158_s12 = scalar_lea.vmem %s257_s21, 256  ;;  %p4166_p8 = scmp.lt.s32.totalorder %s257_s21, %s257_s21 }
  0x23   : > { %p4159_p12 = scmp.ne.s32.totalorder %s257_s21, %s4158_s12  ;;  %p4167_p4 = scmp.lt.s32.totalorder %s4158_s12, %s4158_s12 }
  0x25   : > { %p4161_p1 = pnand %p4159_p12, %p4123_p0  ;;  %p4168_p5 = por %p4167_p4, %p4166_p8 }
  0x27   : > { %p4162_p2 = pneg %p4161_p1 }
  0x29   : > { %p4169_p3 = pnand %p4168_p5, %p4162_p2 }
  0x2b   : > { %4172 = shalt.err (!%p4169_p3)
}
  0x2c   : > { %3956 = dma.hbm_to_vmem [thread:$0]  (!%p4383_p13), %s5344_s6, 256, %s257_s21, [#allocation8], %s4261_s23, %s4261_s23, %s4262_s30  }
  0x2d   : > { %280 = sbr.rel (%p4371_p10) target bundleno = 1595 (0x63b), region = 48 }
  0x32   : > { %4224 = dma.done.wait (%p4375_p11), [#allocation5], 256  }
  0x33   : > { %4226 = vsyncadd (%p4375_p11), [#allocation5], 4294967040 }
  0x34   : > { %4228 = dma.done.wait (%p4375_p11), [#allocation8], 256  }
  0x35   : > { %4230 = vsyncadd (%p4375_p11), [#allocation8], 4294967040  ;;  %v5347_v0 = vmov 0.0   ;;  %vm4264_vm0 = vmmov 0   ;;  %v4045_v1 = vld [vmem:[%s5340_s2 + $0x38] sm:$0xff]   ;;  %v4046_v2 = vld [vmem:[%s5340_s2 + $0x30] sm:$0xff]   ;;  %v556_v38 = vlaneseq }
  0x36   : > { %3812 = vmatprep.subr.bf16.mxu0 %v5347_v0  ;;  %3828 = vmatprep.mubr.msk.bf16.mxu0 %vm4264_vm0, %v5347_v0  ;;  %v4047_v3 = vld [vmem:[%s5340_s2 + $0x28] sm:$0xff]   ;;  %p316_p4 = scmp.lt.s32.totalorder %s4249_s27, 1  ;;  %v4048_v4 = vld [vmem:[%s5340_s2 + $0x20] sm:$0xff]   ;;  %v4049_v5 = vld [vmem:[%s5340_s2 + $0x18] sm:$0xff]   ;;  %s4265_s17 = smov 96   ;;  %vm1028_vm1 = vcmask 130048  }
  0x37   : > { %3832 = vmatprep.subr.bf16.mxu1 %v5347_v0  ;;  %3848 = vmatprep.mubr.msk.bf16.mxu1 %vm4264_vm0, %v5347_v0  ;;  %v4050_v6 = vld [vmem:[%s5340_s2 + $0x10] sm:$0xff]   ;;  %v4051_v7 = vld [vmem:[%s5340_s2 + $0x8] sm:$0xff]   ;;  %v4052_v8 = vld [vmem:[%s5340_s2] sm:$0xff]   ;;  %s4266_s20 = smov 64   ;;  %v4268_v36 = vmov 1983009808  }
  0x38   : > { %3813 = vmatpush3.bf16.msra.mxu0 %v4045_v1  ;;  %s317_s8 = scalar_select %p316_p4, %s4249_s27, 1  ;;  %v4053_v12 = vld [vmem:[%s5339_s1 + $0x38] sm:$0xff]   ;;  %v4054_v13 = vld [vmem:[%s5339_s1 + $0x30] sm:$0xff]   ;;  %v4055_v14 = vld [vmem:[%s5339_s1 + $0x28] sm:$0xff]   ;;  %v554_v37 = vunpack.c.l.s4 %v4268_v36  ;;  %v4557_v40 = vshrl.u32 %v556_v38, 7  ;;  %vm1611_vm2 = vcmask 257024  }
  0x39   : > { %3814 = vmatprep.subr.bf16.mxu0 %v5347_v0  ;;  %v4056_v15 = vld [vmem:[%s5339_s1 + $0x20] sm:$0xff]   ;;  %v4057_v16 = vld [vmem:[%s5339_s1 + $0x18] sm:$0xff]   ;;  %v4058_v17 = vld [vmem:[%s5339_s1 + $0x10] sm:$0xff]   ;;  %v4269_v41 = vmov 1934713408   ;;  %s4270_s30 = smov 16  }
  0x3a   : > { %s3750_s15 = sshll.u32 %s317_s8, 4  ;;  %v4059_v18 = vld [vmem:[%s5339_s1 + $0x8] sm:$0xff]   ;;  %v4060_v19 = vld [vmem:[%s5339_s1] sm:$0xff]   ;;  %v4061_v28 = vld [vmem:[%s5341_s3 + $0x38] sm:$0xff]   ;;  %v555_v39 = vunpack.c.0.s8 %v554_v37  ;;  %v585_v42 = vunpack.c.l.s4 %v4269_v41  ;;  %s4271_s8 = smov 112   ;;  %vm2636_vm3 = vcmask 261120  }
  0x3b   : > { %s320_s22 = scalar_lea.vmem %s5338_s0, %s3750_s15  ;;  %s4267_s15 = smov 32   ;;  %3833 = vmatpush3.bf16.msra.mxu1 %v4061_v28  ;;  %v4062_v29 = vld [vmem:[%s5341_s3 + $0x30] sm:$0xff]   ;;  %v4063_v30 = vld [vmem:[%s5341_s3 + $0x28] sm:$0xff]   ;;  %v4064_v31 = vld [vmem:[%s5341_s3 + $0x20] sm:$0xff]   ;;  %vm3430_vm4 = vcmask 523264   ;;  %vm3433_vm5 = vcmask 785408  }
  0x3c   : > { %3815 = vmatpush3.bf16.msra.mxu0 %v4046_v2  ;;  %v327_v9 = vld [vmem:[%s320_s22] sm:$0xff]  ;;  %v328_v10 = vld [vmem:[%s320_s22 + $0x8] sm:$0xff]  ;;  %3834 = vmatprep.subr.bf16.mxu1 %v5347_v0  ;;  %v4065_v32 = vld [vmem:[%s5341_s3 + $0x18] sm:$0xff]   ;;  %v4560_v43 = vsub.s32 %v555_v39, %v4557_v40  ;;  %v586_v44 = vunpack.c.0.s8 %v585_v42  ;;  %s3759_s23 = sshll.u32 %s4249_s27, 8  ;;  %p5358_p10 = scmp.ne.s32.totalorder %s5350_s11, 0 }
  0x3d   : > { %3816 = vmatprep.subr.bf16.mxu0 %v5347_v0  ;;  %v4457_v11 = vpack.c.bf16 %v328_v10, %v327_v9  ;;  %v4066_v33 = vld [vmem:[%s5341_s3 + $0x10] sm:$0xff]   ;;  %v4067_v34 = vld [vmem:[%s5341_s3 + $0x8] sm:$0xff]   ;;  %v4068_v35 = vld [vmem:[%s5341_s3] sm:$0xff]   ;;  %s5291_s10 = scalar_lea.hbm %s5345_s7, %s3759_s23  ;;  %s4273_s27 = smov [#allocation9]  }
  0x3e   : > { %v4565_v47 = vsub.s32 %v586_v44, %v4557_v40  ;;  %s4177_s16 = sshll.u32 %s4273_s27, 4  ;;  %s4178_s16 = int_to_ptr.vmem [resolvable:$false] %s4177_s16 }
  0x3f   : > { %3835 = vmatpush3.bf16.msra.mxu1 %v4062_v29  ;;  %s4179_s19 = scalar_lea.vmem %s4178_s16, 512 }
  0x40   : > { %3817 = vmatpush3.bf16.msra.mxu0 %v4047_v3  ;;  %3836 = vmatprep.subr.bf16.mxu1 %v5347_v0  ;;  %v4272_v3 = vmov 1966171168  }
  0x41   : > { %3818 = vmatprep.subr.bf16.mxu0 %v5347_v0 }
  0x43   : > { %3837 = vmatpush3.bf16.msra.mxu1 %v4063_v30 }
  0x44   : > { %3819 = vmatpush3.bf16.msra.mxu0 %v4048_v4  ;;  %3838 = vmatprep.subr.bf16.mxu1 %v5347_v0  ;;  %v688_v4 = vunpack.c.l.s4 %v4272_v3 }
  0x45   : > { %3820 = vmatprep.subr.bf16.mxu0 %v5347_v0 }
  0x47   : > { %3839 = vmatpush3.bf16.msra.mxu1 %v4064_v31 }
  0x48   : > { %3821 = vmatpush3.bf16.msra.mxu0 %v4049_v5  ;;  %3840 = vmatprep.subr.bf16.mxu1 %v5347_v0 }
  0x49   : > { %3822 = vmatprep.subr.bf16.mxu0 %v5347_v0 }
  0x4b   : > { %3841 = vmatpush3.bf16.msra.mxu1 %v4065_v32 }
  0x4c   : > { %3823 = vmatpush3.bf16.msra.mxu0 %v4050_v6  ;;  %3842 = vmatprep.subr.bf16.mxu1 %v5347_v0 }
  0x4d   : > { %3824 = vmatprep.subr.bf16.mxu0 %v5347_v0 }
  0x4f   : > { %3843 = vmatpush3.bf16.msra.mxu1 %v4066_v33 }
  0x50   : > { %3825 = vmatpush3.bf16.msra.mxu0 %v4051_v7  ;;  %3844 = vmatprep.subr.bf16.mxu1 %v5347_v0 }
  0x51   : > { %3826 = vmatprep.subr.bf16.mxu0 %v5347_v0 }
  0x53   : > { %3845 = vmatpush3.bf16.msra.mxu1 %v4067_v34 }
  0x54   : > { %3827 = vmatpush3.bf16.msra.mxu0 %v4052_v8  ;;  %3846 = vmatprep.subr.bf16.mxu1 %v5347_v0  ;;  %v689_v8 = vunpack.c.0.s8 %v688_v4 }
  0x55   : > { %3852 = vmatprep.subr.bf16.mxu0 %v5347_v0 }
  0x57   : > { %3829 = vmatmul.mubr.bf16.vlgmr.msra.gmra.mxu0 %v4457_v11  ;;  %3847 = vmatpush3.bf16.msra.mxu1 %v4068_v35 }
  0x58   : > { %3853 = vmatpush3.bf16.msra.mxu0 %v4053_v12  ;;  %3868 = vmatprep.mubr.msk.bf16.mxu0 %vm4264_vm0, %v5347_v0 }
  0x59   : > { %3854 = vmatprep.subr.bf16.mxu0 %v5347_v0  ;;  %3872 = vmatprep.subr.bf16.mxu1 %v5347_v0 }
  0x5a   : > { %3849 = vmatmul.mubr.bf16.vlgmr.msra.gmra.mxu1 %v4457_v11 }
  0x5b   : > { %3874 = vmatprep.mubr.msk.bf16.mxu1 %vm4264_vm0, %v5347_v0 }
  0x5c   : > { %3855 = vmatpush3.bf16.msra.mxu0 %v4054_v13 }
  0x5d   : > { %3856 = vmatprep.subr.bf16.mxu0 %v5347_v0 }
  0x60   : > { %3857 = vmatpush3.bf16.msra.mxu0 %v4055_v14 }
  0x61   : > { %3858 = vmatprep.subr.bf16.mxu0 %v5347_v0 }
  0x64   : > { %3859 = vmatpush3.bf16.msra.mxu0 %v4056_v15  ;;  %v4633_v15 = vsub.s32 %v689_v8, %v4557_v40 }
  0x65   : > { %3860 = vmatprep.subr.bf16.mxu0 %v5347_v0 }
  0x68   : > { %3861 = vmatpush3.bf16.msra.mxu0 %v4057_v16 }
  0x69   : > { %3862 = vmatprep.subr.bf16.mxu0 %v5347_v0 }
  0x6c   : > { %3863 = vmatpush3.bf16.msra.mxu0 %v4058_v17 }
  0x6d   : > { %3864 = vmatprep.subr.bf16.mxu0 %v5347_v0 }
  0x70   : > { %3865 = vmatpush3.bf16.msra.mxu0 %v4059_v18 }
  0x71   : > { %3866 = vmatprep.subr.bf16.mxu0 %v5347_v0 }
  0x74   : > { %3867 = vmatpush3.bf16.msra.mxu0 %v4060_v19 }
  0x75   : > { %3920 = vmatprep.subr.bf16.mxu0 %v5347_v0 }
  0x77   : > { %3869 = vmatmul.mubr.bf16.vlgmr.msra.gmra.mxu0 %v4457_v11  ;;  %v4624_v11 = vld [vmem:[#allocation4] sm:$0xff] }
  0x78   : > { %3936 = vmatprep.mubr.msk.bf16.mxu0 %vm4264_vm0, %v5347_v0  ;;  %v1755_v14 = vmul.f32 0.17677669, %v4624_v11 }
  0x7a   : > { %v1927_v19 = vrot.slane %v1755_v14, %v4633_v15 }
  0x7c   : > { %v1935_v31 = vcombine.high %v1927_v19, %v1927_v19  ;;  %v1943_v44 = vrot.slane %v1927_v19, %v4633_v15 }
 0x117   : > { %v4498_v20 = vpop.f32.mrf.mxu0 }
 0x118   : > { %546 = vrot.lane.b32.xlu0 %v4498_v20, %s4265_s17  ;;  %v559_v46 = vrot.slane %v4498_v20, %v4560_v43  ;;  %v552_v55 = vcombine.high %v4498_v20, %v5347_v0 }
 0x119   : > { %v3830_v21 = vpop.f32.mrf.mxu0 }
 0x11a   : > { %v566_v58 = vrot.slane %v552_v55, %v4560_v43  ;;  %v1920_v21 = vcombine.high %v1755_v14, %v1755_v14 }
 0x11b   : > { %v4502_v22 = vpop.f32.mrf.mxu0 }
 0x11c   : > { %548 = vrot.lane.b32.xlu0 %v4502_v22, %s4265_s17  ;;  %v625_v12 = vrot.slane %v4502_v22, %v4560_v43  ;;  %v1934_v34 = vrot.slane %v1920_v21, %v4633_v15 }
 0x11d   : > { %v3831_v23 = vpop.f32.mrf.mxu0 }
 0x137   : > { %v4506_v24 = vpop.f32.mrf.mxu0 }
 0x138   : > { %1770 = vrot.lane.b32.xlu0 %v4506_v24, %s4266_s20  ;;  %1764 = vrot.lane.b32.xlu1 %v4506_v24, %s4265_s17 }
 0x139   : > { %v3870_v25 = vpop.f32.mrf.mxu0 }
 0x13b   : > { %v4512_v26 = vpop.f32.mrf.mxu0 }
 0x13c   : > { %1776 = vrot.lane.b32.xlu0 %v4506_v24, %s4267_s15  ;;  %1766 = vrot.lane.b32.xlu1 %v4512_v26, %s4265_s17 }
 0x13d   : > { %v3871_v27 = vpop.f32.mrf.mxu0 }
 0x140   : > { %1772 = vrot.lane.b32.xlu1 %v4512_v26, %s4266_s20 }
 0x144   : > { %1778 = vrot.lane.b32.xlu1 %v4512_v26, %s4267_s15 }
 0x18a   : > { %v547_v45 = vpop.permute.xlu0 %546 }
 0x18b   : > { %v574_v48 = vrot.slane %v547_v45, %v4560_v43  ;;  %v567_v52 = vcombine.high %v547_v45, %v5347_v0  ;;  %v618_v45 = vcombine.high %v4502_v22, %v5347_v0 }
 0x18d   : > { %v582_v49 = vcombine.low %v559_v46, %v574_v48  ;;  %v583_v50 = vcombine.high %v559_v46, %v574_v48  ;;  %v581_v56 = vrot.slane %v567_v52, %v4560_v43 }
 0x18e   : > { %v549_v7 = vpop.permute.xlu0 %548 }
 0x18f   : > { %v4569_v51 = vrot.slane %v582_v49, %v4565_v47  ;;  %v4573_v53 = vrot.slane %v583_v50, %v4565_v47  ;;  %v598_v60 = vcombine.low %v566_v58, %v581_v56  ;;  %v599_v63 = vcombine.high %v566_v58, %v581_v56 }
 0x190   : > { %v640_v9 = vrot.slane %v549_v7, %v4560_v43  ;;  %v633_v35 = vcombine.high %v549_v7, %v5347_v0  ;;  %v1936_v49 = vcombine.high %v1934_v34, %v1934_v34  ;;  %v4669_v50 = vsub.s32 0, %v4557_v40 }
 0x191   : > { %980 = vrot.lane.b32.xlu0 %v4569_v51, %s4270_s30  ;;  %v4579_v54 = vcombine.high %v4569_v51, %v5347_v0  ;;  %v4590_v57 = vcombine.high %v4573_v53, %v5347_v0  ;;  %v884_v59 = vsub.f32 0.0, %v4569_v51  ;;  %v886_v62 = vsub.f32 0.0, %v4573_v53 }
 0x192   : > { %v4603_v2 = vrot.slane %v598_v60, %v4565_v47  ;;  %v4613_v6 = vrot.slane %v599_v63, %v4565_v47  ;;  %v648_v16 = vcombine.low %v625_v12, %v640_v9  ;;  %v649_v23 = vcombine.high %v625_v12, %v640_v9 }
 0x193   : > { %982 = vrot.lane.b32.xlu1 %v4579_v54, %s4270_s30  ;;  %v885_v61 = vsub.f32 0.0, %v4579_v54  ;;  %v887_v1 = vsub.f32 0.0, %v4590_v57  ;;  %v647_v55 = vrot.slane %v633_v35, %v4560_v43  ;;  %v1950_v58 = vrot.slane %v1934_v34, %v4633_v15 }
 0x194   : > { %v4610_v5 = vcombine.high %v4603_v2, %v5347_v0  ;;  %v4622_v10 = vcombine.high %v4613_v6, %v5347_v0  ;;  %v888_v13 = vsub.f32 0.0, %v4603_v2  ;;  %v890_v20 = vsub.f32 0.0, %v4613_v6 }
 0x195   : > { %984 = vrot.lane.b32.xlu0 %v4573_v53, %s4270_s30  ;;  %v4641_v25 = vrot.slane %v648_v16, %v4565_v47  ;;  %v4651_v37 = vrot.slane %v649_v23, %v4565_v47  ;;  %v1965_v60 = vcombine.high %v1943_v44, %v1943_v44  ;;  %v1964_v3 = vrot.slane %v1936_v49, %v4633_v15 }
 0x196   : > { %v889_v17 = vsub.f32 0.0, %v4610_v5  ;;  %v891_v28 = vsub.f32 0.0, %v4622_v10  ;;  %v2282_v7 = vrot.slane %v1943_v44, %v4669_v50 }
 0x197   : > { %986 = vrot.lane.b32.xlu1 %v4590_v57, %s4270_s30  ;;  %v4659_v41 = vcombine.high %v4641_v25, %v5347_v0  ;;  %v4677_v56 = vcombine.high %v4651_v37, %v5347_v0  ;;  %v894_v19 = vsub.f32 0.0, %v4651_v37  ;;  %v1968_v21 = vcombine.high %v1964_v3, %v1964_v3 }
 0x199   : > { %916 = vrot.lane.b32.xlu0 %v884_v59, %s4271_s8  ;;  %v893_v12 = vsub.f32 0.0, %v4659_v41 }
 0x19b   : > { %918 = vrot.lane.b32.xlu1 %v885_v61, %s4271_s8 }
 0x19d   : > { %920 = vrot.lane.b32.xlu0 %v886_v62, %s4271_s8  ;;  %v632_v62 = vrot.slane %v618_v45, %v4560_v43 }
 0x19f   : > { %922 = vrot.lane.b32.xlu1 %v887_v1, %s4271_s8  ;;  %v892_v1 = vsub.f32 0.0, %v4641_v25  ;;  %v664_v9 = vcombine.low %v632_v62, %v647_v55 }
 0x1a1   : > { %988 = vrot.lane.b32.xlu0 %v4603_v2, %s4270_s30 }
 0x1a3   : > { %990 = vrot.lane.b32.xlu1 %v4610_v5, %s4270_s30 }
 0x1a5   : > { %992 = vrot.lane.b32.xlu0 %v4613_v6, %s4270_s30 }
 0x1a7   : > { %994 = vrot.lane.b32.xlu1 %v4622_v10, %s4270_s30 }
 0x1a9   : > { %924 = vrot.lane.b32.xlu0 %v888_v13, %s4271_s8  ;;  %v1966_v13 = vcombine.high %v1950_v58, %v1950_v58 }
 0x1aa   : > { %v1771_v18 = vpop.permute.xlu0 %1770  ;;  %v1765_v29 = vpop.permute.xlu1 %1764 }
 0x1ab   : > { %926 = vrot.lane.b32.xlu1 %v889_v17, %s4271_s8  ;;  %v1782_v27 = vcombine.low %v4506_v24, %v1771_v18  ;;  %v1783_v36 = vcombine.high %v4506_v24, %v1771_v18  ;;  %v1957_v24 = vrot.slane %v1935_v31, %v4633_v15  ;;  %v2290_v17 = vrot.slane %v1965_v60, %v4669_v50 }
 0x1ac   : > { %v4723_v31 = vrot.slane %v664_v9, %v4565_v47 }
 0x1ad   : > { %928 = vrot.lane.b32.xlu0 %v890_v20, %s4271_s8  ;;  %v1790_v38 = vrot.slane %v1782_v27, %v4560_v43  ;;  %v1797_v52 = vrot.slane %v1783_v36, %v4560_v43  ;;  %v1967_v61 = vcombine.high %v1957_v24, %v1957_v24  ;;  %v2286_v8 = vrot.slane %v1957_v24, %v4669_v50 }
 0x1ae   : > { %v1777_v30 = vpop.permute.xlu0 %1776  ;;  %v2302_v36 = vrot.slane %v1964_v3, %v4669_v50  ;;  %v1767_v60 = vpop.permute.xlu1 %1766 }
 0x1af   : > { %v1798_v32 = vcombine.low %v1765_v29, %v1777_v30  ;;  %v1799_v33 = vcombine.high %v1765_v29, %v1777_v30  ;;  %930 = vrot.lane.b32.xlu1 %v891_v28, %s4271_s8  ;;  %v2294_v18 = vrot.slane %v1967_v61, %v4669_v50  ;;  %v2298_v28 = vrot.slane %v1950_v58, %v4669_v50 }
 0x1b0   : > { %v665_v29 = vcombine.high %v632_v62, %v647_v55  ;;  %v895_v30 = vsub.f32 0.0, %v4677_v56 }
 0x1b1   : > { %v1806_v39 = vrot.slane %v1798_v32, %v4560_v43  ;;  %996 = vrot.lane.b32.xlu0 %v4641_v25, %s4270_s30  ;;  %v1813_v42 = vrot.slane %v1799_v33, %v4560_v43  ;;  %v2306_v32 = vrot.slane %v1966_v13, %v4669_v50 }
 0x1b2   : > { %v4746_v44 = vrot.slane %v665_v29, %v4565_v47  ;;  %v1773_v61 = vpop.permute.xlu1 %1772 }
 0x1b3   : > { %v1814_v46 = vcombine.low %v1790_v38, %v1806_v39  ;;  %v1815_v48 = vcombine.high %v1790_v38, %v1806_v39  ;;  %998 = vrot.lane.b32.xlu1 %v4659_v41, %s4270_s30  ;;  %v1830_v59 = vcombine.low %v1797_v52, %v1813_v42  ;;  %v1831_v63 = vcombine.high %v1797_v52, %v1813_v42 }
 0x1b4   : > { %v2310_v39 = vrot.slane %v1968_v21, %v4669_v50  ;;  %v4743_v42 = vcombine.high %v4723_v31, %v5347_v0  ;;  %v4764_v49 = vcombine.high %v4746_v44, %v5347_v0  ;;  %v896_v52 = vsub.f32 0.0, %v4723_v31 }
 0x1b5   : > { %1000 = vrot.lane.b32.xlu0 %v4651_v37, %s4270_s30  ;;  %v4680_v22 = vrot.slane %v1814_v46, %v4565_v47  ;;  %v4684_v40 = vrot.slane %v1815_v48, %v4565_v47  ;;  %v4704_v16 = vrot.slane %v1830_v59, %v4565_v47  ;;  %v4711_v20 = vrot.slane %v1831_v63, %v4565_v47 }
 0x1b6   : > { %v897_v55 = vsub.f32 0.0, %v4743_v42  ;;  %v898_v58 = vsub.f32 0.0, %v4746_v44  ;;  %v899_v59 = vsub.f32 0.0, %v4764_v49  ;;  %v1779_v62 = vpop.permute.xlu1 %1778 }
 0x1b7   : > { %1002 = vrot.lane.b32.xlu1 %v4677_v56, %s4270_s30  ;;  %v4693_v4 = vcombine.high %v4680_v22, %v5347_v0  ;;  %v4701_v14 = vcombine.high %v4684_v40, %v5347_v0  ;;  %v4714_v23 = vmul.f32 %v2282_v7, %v4680_v22  ;;  %v1848_v33 = vcombine.high %v4704_v16, %v5347_v0 }
 0x1b8   : > { %v4729_v34 = vmul.f32 %v2290_v17, %v4684_v40  ;;  %v1849_v38 = vcombine.high %v4711_v20, %v5347_v0  ;;  %v4749_v24 = vmul.f32 %v2298_v28, %v4704_v16  ;;  %v4754_v46 = vmul.f32 %v2306_v32, %v4711_v20 }
 0x1b9   : > { %932 = vrot.lane.b32.xlu0 %v892_v1, %s4271_s8  ;;  %v4717_v27 = vmul.f32 %v2286_v8, %v4693_v4  ;;  %v4732_v35 = vmul.f32 %v2294_v18, %v4701_v14  ;;  %v4751_v45 = vmul.f32 %v2302_v36, %v1848_v33  ;;  %v2118_v63 = vsub.f32 0.0, %v4680_v22 }
 0x1ba   : > { %v4758_v48 = vmul.f32 %v2310_v39, %v1849_v38  ;;  %v1866_v1 = vcombine.low %v1767_v60, %v1779_v62  ;;  %v2119_v3 = vsub.f32 0.0, %v4693_v4  ;;  %v1850_v7 = vcombine.low %v4512_v26, %v1773_v61 }
 0x1bb   : > { %934 = vrot.lane.b32.xlu1 %v893_v12, %s4271_s8  ;;  %v2120_v8 = vsub.f32 0.0, %v4684_v40  ;;  %v2121_v12 = vsub.f32 0.0, %v4701_v14  ;;  %v1867_v17 = vcombine.high %v1767_v60, %v1779_v62  ;;  %v2123_v18 = vsub.f32 0.0, %v1848_v33 }
 0x1bc   : > { %v1874_v9 = vrot.slane %v1866_v1, %v4560_v43  ;;  %v1858_v13 = vrot.slane %v1850_v7, %v4560_v43  ;;  %v2125_v28 = vsub.f32 0.0, %v1849_v38 }
 0x1bd   : > { %936 = vrot.lane.b32.xlu0 %v894_v19, %s4271_s8  ;;  %v1851_v19 = vcombine.high %v4512_v26, %v1773_v61  ;;  %v1881_v21 = vrot.slane %v1867_v17, %v4560_v43 }
 0x1bf   : > { %938 = vrot.lane.b32.xlu1 %v895_v30, %s4271_s8 }
 0x1c1   : > { %1004 = vrot.lane.b32.xlu0 %v4723_v31, %s4270_s30 }
 0x1c3   : > { %1006 = vrot.lane.b32.xlu1 %v4743_v42, %s4270_s30 }
 0x1c5   : > { %1008 = vrot.lane.b32.xlu0 %v4746_v44, %s4270_s30 }
 0x1c7   : > { %1010 = vrot.lane.b32.xlu1 %v4764_v49, %s4270_s30 }
 0x1c9   : > { %940 = vrot.lane.b32.xlu0 %v896_v52, %s4271_s8 }
 0x1cb   : > { %942 = vrot.lane.b32.xlu1 %v897_v55, %s4271_s8  ;;  %v4846_v55 = vld [vmem:[#allocation7] sm:$0xff] }
 0x1cc   : > { %v793_v62 = vrot.slane %v4846_v55, %v4633_v15 }
 0x1cd   : > { %944 = vrot.lane.b32.xlu0 %v898_v58, %s4271_s8 }
 0x1cf   : > { %946 = vrot.lane.b32.xlu1 %v899_v59, %s4271_s8  ;;  %v693_v59 = vrot.slane %v4624_v11, %v4633_v15 }
 0x1d1   : > { %2214 = vrot.lane.b32.xlu0 %v4680_v22, %s4270_s30  ;;  %v2122_v22 = vsub.f32 0.0, %v4704_v16  ;;  %v709_v7 = vrot.slane %v693_v59, %v4633_v15 }
 0x1d3   : > { %2216 = vrot.lane.b32.xlu1 %v4693_v4, %s4270_s30  ;;  %v1882_v4 = vcombine.low %v1858_v13, %v1874_v9 }
 0x1d5   : > { %2218 = vrot.lane.b32.xlu0 %v4684_v40, %s4270_s30  ;;  %v2124_v40 = vsub.f32 0.0, %v4711_v20  ;;  %v4809_v29 = vrot.slane %v1882_v4, %v4565_v47  ;;  %v809_v4 = vrot.slane %v793_v62, %v4633_v15 }
 0x1d7   : > { %2220 = vrot.lane.b32.xlu1 %v4701_v14, %s4270_s30  ;;  %v1883_v14 = vcombine.high %v1858_v13, %v1874_v9  ;;  %v4817_v26 = vcombine.high %v4809_v29, %v5347_v0  ;;  %v801_v13 = vcombine.high %v793_v62, %v793_v62 }
 0x1d9   : > { %2222 = vrot.lane.b32.xlu0 %v4704_v16, %s4270_s30  ;;  %v1865_v16 = vrot.slane %v1851_v19, %v4560_v43  ;;  %v2127_v52 = vsub.f32 0.0, %v4817_v26  ;;  %v731_v19 = vcombine.high %v709_v7, %v709_v7 }
 0x1db   : > { %2224 = vrot.lane.b32.xlu1 %v1848_v33, %s4270_s30  ;;  %v1898_v30 = vcombine.low %v1865_v16, %v1881_v21  ;;  %v1899_v39 = vcombine.high %v1865_v16, %v1881_v21  ;;  %v686_v16 = vcombine.high %v4624_v11, %v4624_v11 }
 0x1dd   : > { %2226 = vrot.lane.b32.xlu0 %v4711_v20, %s4270_s30  ;;  %v4820_v20 = vrot.slane %v1883_v14, %v4565_v47  ;;  %v4831_v33 = vrot.slane %v1898_v30, %v4565_v47  ;;  %v4853_v60 = vrot.slane %v1899_v39, %v4565_v47  ;;  %v823_v14 = vrot.slane %v801_v13, %v4633_v15 }
 0x1de   : > { %v1144_v30 = vrot.slane %v809_v4, %v4669_v50 }
 0x1df   : > { %2228 = vrot.lane.b32.xlu1 %v1849_v38, %s4270_s30  ;;  %v4828_v32 = vcombine.high %v4820_v20, %v5347_v0  ;;  %v4839_v36 = vcombine.high %v4831_v33, %v5347_v0  ;;  %v2126_v38 = vsub.f32 0.0, %v4809_v29  ;;  %v2128_v58 = vsub.f32 0.0, %v4820_v20 }
 0x1e0   : > { %v2130_v1 = vsub.f32 0.0, %v4831_v33  ;;  %v2132_v17 = vsub.f32 0.0, %v4853_v60 }
 0x1e1   : > { %2150 = vrot.lane.b32.xlu0 %v2118_v63, %s4271_s8  ;;  %v2129_v61 = vsub.f32 0.0, %v4828_v32  ;;  %v2131_v9 = vsub.f32 0.0, %v4839_v36 }
 0x1e3   : > { %2152 = vrot.lane.b32.xlu1 %v2119_v3, %s4271_s8  ;;  %v701_v3 = vcombine.high %v693_v59, %v693_v59 }
 0x1e5   : > { %2154 = vrot.lane.b32.xlu0 %v2120_v8, %s4271_s8 }
 0x1e7   : > { %2156 = vrot.lane.b32.xlu1 %v2121_v12, %s4271_s8  ;;  %v4866_v12 = vcombine.high %v4853_v60, %v5347_v0 }
 0x1e9   : > { %2158 = vrot.lane.b32.xlu0 %v2122_v22, %s4271_s8  ;;  %5355 = vst [vmem:[#allocation13_spill] sm:$0xff] %v4866_v12  ;;  %v2133_v21 = vsub.f32 0.0, %v4866_v12 }
 0x1eb   : > { %2160 = vrot.lane.b32.xlu1 %v2123_v18, %s4271_s8  ;;  %v723_v18 = vrot.slane %v701_v3, %v4633_v15  ;;  %v786_v3 = vcombine.high %v4846_v55, %v4846_v55 }
 0x1ed   : > { %2162 = vrot.lane.b32.xlu0 %v2124_v40, %s4271_s8  ;;  %v733_v39 = vcombine.high %v723_v18, %v723_v18 }
 0x1ef   : > { %2164 = vrot.lane.b32.xlu1 %v2125_v28, %s4271_s8  ;;  %v831_v28 = vcombine.high %v809_v4, %v809_v4  ;;  %v1060_v4 = vrot.slane %v733_v39, %v4669_v50 }
 0x1f1   : > { %2230 = vrot.lane.b32.xlu0 %v4809_v29, %s4270_s30  ;;  %v1152_v11 = vrot.slane %v831_v28, %v4669_v50 }
 0x1f3   : > { %2232 = vrot.lane.b32.xlu1 %v4817_v26, %s4270_s30 }
 0x1f5   : > { %2234 = vrot.lane.b32.xlu0 %v4820_v20, %s4270_s30 }
 0x1f7   : > { %2236 = vrot.lane.b32.xlu1 %v4828_v32, %s4270_s30 }
 0x1f9   : > { %2238 = vrot.lane.b32.xlu0 %v4831_v33, %s4270_s30 }
 0x1fb   : > { %2240 = vrot.lane.b32.xlu1 %v4839_v36, %s4270_s30 }
 0x1fd   : > { %2166 = vrot.lane.b32.xlu0 %v2126_v38, %s4271_s8 }
 0x1ff   : > { %2168 = vrot.lane.b32.xlu1 %v2127_v52, %s4271_s8  ;;  %v833_v52 = vcombine.high %v823_v14, %v823_v14 }
 0x201   : > { %2170 = vrot.lane.b32.xlu0 %v2128_v58, %s4271_s8  ;;  %v1048_v58 = vrot.slane %v709_v7, %v4669_v50  ;;  %v700_v7 = vrot.slane %v686_v16, %v4633_v15  ;;  %v800_v16 = vrot.slane %v786_v3, %v4633_v15 }
 0x203   : > { %v981_v63 = vpop.permute.xlu0 %980  ;;  %2172 = vrot.lane.b32.xlu1 %v2129_v61, %s4271_s8  ;;  %v1148_v61 = vrot.slane %v823_v14, %v4669_v50 }
 0x205   : > { %2174 = vrot.lane.b32.xlu0 %v2130_v1, %s4271_s8  ;;  %v983_v8 = vpop.permute.xlu1 %982  ;;  %v1056_v1 = vrot.slane %v731_v19, %v4669_v50  ;;  %v1156_v19 = vrot.slane %v833_v52, %v4669_v50  ;;  %v1128_v52 = vmul.f32 %v1060_v4, %v4590_v57 }
 0x207   : > { %v985_v22 = vpop.permute.xlu0 %984  ;;  %2176 = vrot.lane.b32.xlu1 %v2131_v9, %s4271_s8  ;;  %v1052_v9 = vrot.slane %v723_v18, %v4669_v50  ;;  %v1127_v18 = vmul.f32 %v1056_v1, %v4573_v53 }
 0x209   : > { %2178 = vrot.lane.b32.xlu0 %v2132_v17, %s4271_s8  ;;  %v987_v40 = vpop.permute.xlu1 %986 }
 0x20b   : > { %v917_v38 = vpop.permute.xlu0 %916  ;;  %2180 = vrot.lane.b32.xlu1 %v2133_v21, %s4271_s8  ;;  %v1125_v21 = vmul.f32 %v1048_v58, %v4569_v51 }
 0x20c   : > { %v1029_v59 = vsel %vm1028_vm1, %v917_v38, %v981_v63 }
 0x20d   : > { %2242 = vrot.lane.b32.xlu0 %v4853_v60, %s4270_s30  ;;  %v919_v62 = vpop.permute.xlu1 %918  ;;  %v1221_v63 = vmul.f32 %v1144_v30, %v1029_v59  ;;  %v1126_v30 = vmul.f32 %v1052_v9, %v4579_v54  ;;  %v816_v54 = vrot.slane %v800_v16, %v4633_v15 }
 0x20e   : > { %v1030_v13 = vsel %vm1028_vm1, %v919_v62, %v983_v8  ;;  %v702_v62 = vcombine.high %v700_v7, %v700_v7 }
 0x20f   : > { %v921_v17 = vpop.permute.xlu0 %920  ;;  %2244 = vrot.lane.b32.xlu1 %v4866_v12, %s4270_s30  ;;  %v1222_v28 = vmul.f32 %v1148_v61, %v1030_v13  ;;  %v1237_v0 = vadd.f32 %v1221_v63, %v1125_v21  ;;  %v1160_v4 = vrot.slane %v816_v54, %v4669_v50 }
 0x210   : > { %v1031_v14 = vsel %vm1028_vm1, %v921_v17, %v985_v22  ;;  %v716_v22 = vrot.slane %v700_v7, %v4633_v15 }
 0x211   : > { %v1223_v38 = vmul.f32 %v1152_v11, %v1031_v14  ;;  %v923_v8 = vpop.permute.xlu1 %922  ;;  %v1238_v58 = vadd.f32 %v1222_v28, %v1126_v30  ;;  %v802_v11 = vcombine.high %v800_v16, %v800_v16  ;;  %v4915_v28 = vld [vmem:[#allocation4 + $0x8] sm:$0xff] }
 0x212   : > { %v1032_v59 = vsel %vm1028_vm1, %v923_v8, %v987_v40  ;;  %v730_v40 = vrot.slane %v702_v62, %v4633_v15  ;;  %v732_v9 = vcombine.high %v716_v22, %v716_v22 }
 0x213   : > { %v1239_v39 = vadd.f32 %v1223_v38, %v1127_v18  ;;  %v1224_v12 = vmul.f32 %v1156_v19, %v1032_v59  ;;  %v989_v51 = vpop.permute.xlu0 %988  ;;  %v830_v7 = vrot.slane %v802_v11, %v4633_v15  ;;  %v1064_v18 = vrot.slane %v716_v22, %v4669_v50 }
 0x214   : > { %v734_v21 = vcombine.high %v730_v40, %v730_v40  ;;  %v1072_v30 = vrot.slane %v732_v9, %v4669_v50  ;;  %v1068_v62 = vrot.slane %v730_v40, %v4669_v50 }
 0x215   : > { %v1253_v61 = vcombine.low %v1237_v0, %v1239_v39  ;;  %v1240_v53 = vadd.f32 %v1224_v12, %v1128_v52  ;;  %v991_v1 = vpop.permute.xlu1 %990  ;;  %v832_v0 = vcombine.high %v816_v54, %v816_v54  ;;  %v834_v14 = vcombine.high %v830_v7, %v830_v7  ;;  %v4924_v52 = vld [vmem:[#allocation7 + $0x8] sm:$0xff] }
 0x216   : > { %v1164_v8 = vrot.slane %v830_v7, %v4669_v50  ;;  %v1129_v11 = vmul.f32 %v1064_v18, %v4603_v2  ;;  %v1131_v40 = vmul.f32 %v1072_v30, %v4613_v6 }
 0x217   : > { %v1261_v13 = vcombine.low %v1238_v58, %v1240_v53  ;;  %v993_v3 = vpop.permute.xlu0 %992  ;;  %v4906_v63 = vrot.slane %v1253_v61, %v4560_v43  ;;  %v1168_v59 = vrot.slane %v832_v0, %v4669_v50  ;;  %v742_v58 = vrot.slane %v4915_v28, %v4633_v15 }
 0x218   : > { %v1172_v53 = vrot.slane %v834_v14, %v4669_v50 }
 0x219   : > { %v4909_v57 = vrot.slane %v1261_v13, %v4560_v43  ;;  %v995_v17 = vpop.permute.xlu1 %994  ;;  %v750_v0 = vcombine.high %v742_v58, %v742_v58 }
 0x21b   : > { %v1285_v12 = vcombine.low %v4906_v63, %v4909_v57  ;;  %v925_v19 = vpop.permute.xlu0 %924  ;;  %v842_v63 = vrot.slane %v4924_v52, %v4633_v15  ;;  %v1130_v57 = vmul.f32 %v1068_v62, %v4610_v5  ;;  %v772_v30 = vrot.slane %v750_v0, %v4633_v15 }
 0x21c   : > { %v1033_v38 = vsel %vm1028_vm1, %v925_v19, %v989_v51  ;;  %v1076_v51 = vrot.slane %v734_v21, %v4669_v50 }
 0x21d   : > { %v927_v16 = vpop.permute.xlu1 %926  ;;  %v1225_v61 = vmul.f32 %v1160_v4, %v1033_v38  ;;  %v1292_v0 = vrot.slane %v1285_v12, %v4565_v47 }
 0x21e   : > { %v1034_v39 = vsel %vm1028_vm1, %v927_v16, %v991_v1  ;;  %v1132_v21 = vmul.f32 %v1076_v51, %v4622_v10  ;;  %v850_v16 = vcombine.high %v842_v63, %v842_v63 }
 0x21f   : > { %v929_v22 = vpop.permute.xlu0 %928  ;;  %v1226_v54 = vmul.f32 %v1164_v8, %v1034_v39  ;;  %v1241_v4 = vadd.f32 %v1225_v61, %v1129_v11  ;;  %v735_v39 = vcombine.high %v4915_v28, %v4915_v28  ;;  %v782_v11 = vcombine.high %v772_v30, %v772_v30 }
 0x220   : > { %v1035_v13 = vsel %vm1028_vm1, %v929_v22, %v993_v3  ;;  %v758_v3 = vrot.slane %v742_v58, %v4633_v15  ;;  %v872_v22 = vrot.slane %v850_v16, %v4633_v15 }
 0x221   : > { %v1227_v9 = vmul.f32 %v1168_v59, %v1035_v13  ;;  %v931_v1 = vpop.permute.xlu1 %930  ;;  %v1242_v18 = vadd.f32 %v1226_v54, %v1130_v57  ;;  %v749_v57 = vrot.slane %v735_v39, %v4633_v15 }
 0x222   : > { %v1036_v7 = vsel %vm1028_vm1, %v931_v1, %v995_v17  ;;  %v858_v17 = vrot.slane %v842_v63, %v4633_v15  ;;  %v780_v62 = vcombine.high %v758_v3, %v758_v3 }
 0x223   : > { %v1243_v19 = vadd.f32 %v1227_v9, %v1131_v40  ;;  %v1228_v2 = vmul.f32 %v1172_v53, %v1036_v7  ;;  %v997_v14 = vpop.permute.xlu0 %996  ;;  %v1080_v53 = vrot.slane %v758_v3, %v4669_v50  ;;  %v882_v9 = vcombine.high %v872_v22, %v872_v22 }
 0x224   : > { %v880_v51 = vcombine.high %v858_v17, %v858_v17  ;;  %v1176_v54 = vrot.slane %v858_v17, %v4669_v50  ;;  %v1088_v63 = vrot.slane %v780_v62, %v4669_v50  ;;  %v835_v7 = vcombine.high %v4924_v52, %v4924_v52 }
 0x225   : > { %v1269_v6 = vcombine.low %v1241_v4, %v1243_v19  ;;  %v1244_v38 = vadd.f32 %v1228_v2, %v1132_v21  ;;  %v999_v8 = vpop.permute.xlu1 %998  ;;  %v1180_v19 = vrot.slane %v872_v22, %v4669_v50  ;;  %v1133_v3 = vmul.f32 %v1080_v53, %v4641_v25 }
 0x226   : > { %v1184_v2 = vrot.slane %v880_v51, %v4669_v50  ;;  %v1188_v12 = vrot.slane %v882_v9, %v4669_v50  ;;  %v1135_v62 = vmul.f32 %v1088_v63, %v4651_v37  ;;  %v765_v9 = vrot.slane %v749_v57, %v4633_v15 }
 0x227   : > { %v1277_v59 = vcombine.low %v1242_v18, %v1244_v38  ;;  %v1001_v5 = vpop.permute.xlu0 %1000  ;;  %v1276_v10 = vrot.slane %v1269_v6, %v4560_v43  ;;  %v1092_v6 = vrot.slane %v782_v11, %v4669_v50  ;;  %v751_v11 = vcombine.high %v749_v57, %v749_v57 }
 0x229   : > { %v1284_v61 = vrot.slane %v1277_v59, %v4560_v43  ;;  %v1003_v58 = vpop.permute.xlu1 %1002 }
 0x22b   : > { %v1293_v13 = vcombine.low %v1276_v10, %v1284_v61  ;;  %v933_v40 = vpop.permute.xlu0 %932  ;;  %v849_v10 = vrot.slane %v835_v7, %v4633_v15 }
 0x22c   : > { %v1037_v1 = vsel %vm1028_vm1, %v933_v40, %v997_v14  ;;  %v1084_v14 = vrot.slane %v772_v30, %v4669_v50 }
 0x22d   : > { %v1300_v4 = vrot.slane %v1293_v13, %v4565_v47  ;;  %v935_v21 = vpop.permute.xlu1 %934  ;;  %v1229_v59 = vmul.f32 %v1176_v54, %v1037_v1  ;;  %v1136_v13 = vmul.f32 %v1092_v6, %v4677_v56  ;;  %v851_v7 = vcombine.high %v849_v10, %v849_v10 }
 0x22e   : > { %v1038_v18 = vsel %vm1028_vm1, %v935_v21, %v999_v8  ;;  %v1134_v51 = vmul.f32 %v1084_v14, %v4659_v41  ;;  %v779_v21 = vrot.slane %v751_v11, %v4633_v15 }
 0x22f   : > { %v1301_v38 = vcombine.low %v1292_v0, %v1300_v4  ;;  %v1302_v16 = vcombine.high %v1292_v0, %v1300_v4  ;;  %v937_v17 = vpop.permute.xlu0 %936  ;;  %v1230_v30 = vmul.f32 %v1180_v19, %v1038_v18  ;;  %v1245_v37 = vadd.f32 %v1229_v59, %v1133_v3  ;;  %v4975_v3 = vpop.f32.mrf.mxu1 }
 0x230   : > { %v1039_v39 = vsel %vm1028_vm1, %v937_v17, %v1001_v5  ;;  %v865_v19 = vrot.slane %v849_v10, %v4633_v15  ;;  %v879_v57 = vrot.slane %v851_v7, %v4633_v15  ;;  %1357 = vrot.lane.b32.xlu0 %v4975_v3, %s4265_s17 }
 0x231   : > { %v3751_v25 = vpack.c.bf16 %v1301_v38, %v1301_v38  ;;  %v3753_v61 = vpack.c.bf16 %v1302_v16, %v1302_v16  ;;  %v1231_v22 = vmul.f32 %v1184_v2, %v1039_v39  ;;  %v939_v8 = vpop.permute.xlu1 %938  ;;  %v1246_v41 = vadd.f32 %v1230_v30, %v1134_v51  ;;  %v3850_v38 = vpop.f32.mrf.mxu1 }
 0x232   : > { %v1040_v53 = vsel %vm1028_vm1, %v939_v8, %v1003_v58  ;;  %v781_v2 = vcombine.high %v765_v9, %v765_v9  ;;  %v881_v6 = vcombine.high %v865_v19, %v865_v19  ;;  %v1192_v59 = vrot.slane %v865_v19, %v4669_v50 }
 0x233   : > { %1612 = vst.msk [vmem:[#allocation2] sm:$0xf] %vm1611_vm2, %v3751_v25  ;;  %1614 = vst.msk [vmem:[#allocation2 + $0x8] sm:$0xf] %vm1611_vm2, %v3751_v25  ;;  %v1247_v5 = vadd.f32 %v1231_v22, %v1135_v62  ;;  %v1232_v54 = vmul.f32 %v1188_v12, %v1040_v53  ;;  %v1005_v40 = vpop.permute.xlu0 %1004  ;;  %v783_v12 = vcombine.high %v779_v21, %v779_v21  ;;  %v4984_v10 = vpop.f32.mrf.mxu1 }
 0x234   : > { %1616 = vst.msk [vmem:[#allocation2 + $0x10] sm:$0xf] %vm1611_vm2, %v3753_v61  ;;  %1618 = vst.msk [vmem:[#allocation2 + $0x18] sm:$0xf] %vm1611_vm2, %v3753_v61  ;;  %v883_v62 = vcombine.high %v879_v57, %v879_v57  ;;  %v1096_v25 = vrot.slane %v765_v9, %v4669_v50  ;;  %v1196_v61 = vrot.slane %v879_v57, %v4669_v50  ;;  %1359 = vrot.lane.b32.xlu1 %v4984_v10, %s4265_s17 }
 0x235   : > { %v1303_v1 = vcombine.low %v1245_v37, %v1247_v5  ;;  %v1248_v58 = vadd.f32 %v1232_v54, %v1136_v13  ;;  %v1007_v63 = vpop.permute.xlu1 %1006  ;;  %v1104_v22 = vrot.slane %v781_v2, %v4669_v50  ;;  %v1200_v8 = vrot.slane %v881_v6, %v4669_v50  ;;  %v3851_v11 = vpop.f32.mrf.mxu1 }
 0x236   : > { %v1100_v51 = vrot.slane %v779_v21, %v4669_v50  ;;  %v1108_v13 = vrot.slane %v783_v12, %v4669_v50  ;;  %v1204_v54 = vrot.slane %v883_v62, %v4669_v50  ;;  %v1137_v9 = vmul.f32 %v1096_v25, %v4723_v31 }
 0x237   : > { %v1311_v0 = vcombine.low %v1246_v41, %v1248_v58  ;;  %v1009_v4 = vpop.permute.xlu0 %1008  ;;  %v1310_v56 = vrot.slane %v1303_v1, %v4560_v43  ;;  %v1139_v1 = vmul.f32 %v1104_v22, %v4746_v44  ;;  %v1760_v44 = vmul.f32 0.17677669, %v4846_v55 }
 0x238   : > { %v1140_v2 = vmul.f32 %v1108_v13, %v4764_v49 }
 0x239   : > { %v1318_v14 = vrot.slane %v1311_v0, %v4560_v43  ;;  %v1011_v18 = vpop.permute.xlu1 %1010  ;;  %v1138_v0 = vmul.f32 %v1100_v51, %v4743_v42  ;;  %v2027_v49 = vrot.slane %v1760_v44, %v4633_v15 }
 0x23b   : > { %v1335_v16 = vcombine.low %v1310_v56, %v1318_v14  ;;  %v941_v17 = vpop.permute.xlu0 %940 }
 0x23c   : > { %v1041_v39 = vsel %vm1028_vm1, %v941_v17, %v1005_v40 }
 0x23d   : > { %v943_v30 = vpop.permute.xlu1 %942  ;;  %v1233_v37 = vmul.f32 %v1192_v59, %v1041_v39  ;;  %v2020_v39 = vcombine.high %v1760_v44, %v1760_v44  ;;  %v1342_v25 = vrot.slane %v1335_v16, %v4565_v47  ;;  %v2043_v16 = vrot.slane %v2027_v49, %v4633_v15 }
 0x23e   : > { %v1042_v53 = vsel %vm1028_vm1, %v943_v30, %v1007_v63 }
 0x23f   : > { %v945_v5 = vpop.permute.xlu0 %944  ;;  %v1234_v41 = vmul.f32 %v1196_v61, %v1042_v53  ;;  %v1249_v19 = vadd.f32 %v1233_v37, %v1137_v9  ;;  %v2034_v55 = vrot.slane %v2020_v39, %v4633_v15  ;;  %v2035_v53 = vcombine.high %v2027_v49, %v2027_v49 }
 0x240   : > { %v1043_v40 = vsel %vm1028_vm1, %v945_v5, %v1009_v4 }
 0x241   : > { %v1235_v58 = vmul.f32 %v1200_v8, %v1043_v40  ;;  %v947_v7 = vpop.permute.xlu1 %946  ;;  %v1250_v57 = vadd.f32 %v1234_v41, %v1138_v0  ;;  %v2057_v40 = vrot.slane %v2035_v53, %v4633_v15  ;;  %v2050_v41 = vrot.slane %v2034_v55, %v4633_v15 }
 0x242   : > { %v1044_v63 = vsel %vm1028_vm1, %v947_v7, %v1011_v18 }
 0x243   : > { %v1251_v21 = vadd.f32 %v1235_v58, %v1139_v1  ;;  %v1236_v56 = vmul.f32 %v1204_v54, %v1044_v63  ;;  %v2215_v14 = vpop.permute.xlu0 %2214  ;;  %v2036_v54 = vcombine.high %v2034_v55, %v2034_v55  ;;  %v2378_v1 = vrot.slane %v2043_v16, %v4669_v50 }
 0x244   : > { %v2065_v58 = vcombine.high %v2043_v16, %v2043_v16 }
 0x245   : > { %v1319_v6 = vcombine.low %v1249_v19, %v1251_v21  ;;  %v1252_v4 = vadd.f32 %v1236_v56, %v1140_v2  ;;  %v2217_v38 = vpop.permute.xlu1 %2216  ;;  %v2064_v0 = vrot.slane %v2036_v54, %v4633_v15  ;;  %v2382_v19 = vrot.slane %v2057_v40, %v4669_v50 }
 0x246   : > { %v2067_v21 = vcombine.high %v2057_v40, %v2057_v40 }
 0x247   : > { %v1327_v31 = vcombine.low %v1250_v57, %v1252_v4  ;;  %v2219_v59 = vpop.permute.xlu0 %2218  ;;  %v1326_v17 = vrot.slane %v1319_v6, %v4560_v43  ;;  %v2394_v57 = vrot.slane %v2050_v41, %v4669_v50  ;;  %v2066_v6 = vcombine.high %v2050_v41, %v2050_v41 }
 0x249   : > { %v1334_v42 = vrot.slane %v1327_v31, %v4560_v43  ;;  %v2221_v12 = vpop.permute.xlu1 %2220  ;;  %v2068_v31 = vcombine.high %v2064_v0, %v2064_v0 }
 0x24b   : > { %v1343_v18 = vcombine.low %v1326_v17, %v1334_v42  ;;  %v2223_v62 = vpop.permute.xlu0 %2222  ;;  %v2386_v17 = vrot.slane %v2065_v58, %v4669_v50 }
 0x24d   : > { %v1350_v61 = vrot.slane %v1343_v18, %v4565_v47  ;;  %v2225_v30 = vpop.permute.xlu1 %2224  ;;  %v2398_v18 = vrot.slane %v2064_v0, %v4669_v50 }
 0x24f   : > { %v1351_v22 = vcombine.low %v1342_v25, %v1350_v61  ;;  %v1352_v8 = vcombine.high %v1342_v25, %v1350_v61  ;;  %v2227_v51 = vpop.permute.xlu0 %2226  ;;  %v2390_v25 = vrot.slane %v2067_v21, %v4669_v50  ;;  %v1756_v21 = vmul.f32 0.17677669, %v4915_v28 }
 0x251   : > { %v3752_v11 = vpack.c.bf16 %v1351_v22, %v1351_v22  ;;  %v3754_v37 = vpack.c.bf16 %v1352_v8, %v1352_v8  ;;  %v2229_v5 = vpop.permute.xlu1 %2228  ;;  %v2402_v8 = vrot.slane %v2066_v6, %v4669_v50 }
 0x253   : > { %1613 = vst.msk [vmem:[#allocation2 + $0x4] sm:$0xf] %vm1611_vm2, %v3752_v11  ;;  %1615 = vst.msk [vmem:[#allocation2 + $0xc] sm:$0xf] %vm1611_vm2, %v3752_v11  ;;  %v2151_v13 = vpop.permute.xlu0 %2150  ;;  %v2406_v11 = vrot.slane %v2068_v31, %v4669_v50 }
 0x254   : > { %1617 = vst.msk [vmem:[#allocation2 + $0x14] sm:$0xf] %vm1611_vm2, %v3754_v37  ;;  %1619 = vst.msk [vmem:[#allocation2 + $0x1c] sm:$0xf] %vm1611_vm2, %v3754_v37  ;;  %v2263_v63 = vsel %vm1028_vm1, %v2151_v13, %v2215_v14  ;;  %v5356_v37 = vmov 0.0  }
 0x255   : > { %v2153_v9 = vpop.permute.xlu1 %2152  ;;  %v2455_v44 = vmul.f32 %v2378_v1, %v2263_v63 }
 0x256   : > { %v2264_v2 = vsel %vm1028_vm1, %v2153_v9, %v2217_v38 }
 0x257   : > { %v2155_v7 = vpop.permute.xlu0 %2154  ;;  %v2456_v39 = vmul.f32 %v2382_v19, %v2264_v2 }
 0x258   : > { %v2265_v14 = vsel %vm1028_vm1, %v2155_v7, %v2219_v59  ;;  %v2471_v59 = vadd.f32 %v2455_v44, %v4714_v23 }
 0x259   : > { %v2157_v56 = vpop.permute.xlu1 %2156  ;;  %v2472_v40 = vadd.f32 %v2456_v39, %v4717_v27 }
 0x25a   : > { %v4073_v4 = vld [vmem:[#allocation2] sm:$0xff]   ;;  %v2266_v55 = vsel %vm1028_vm1, %v2157_v56, %v2221_v12 }
 0x25b   : > { %v2159_v42 = vpop.permute.xlu0 %2158  ;;  %v2641_v38 = vsel %vm2636_vm3, %v4073_v4, 0  ;;  %v2458_v41 = vmul.f32 %v2390_v25, %v2266_v55  ;;  %v1969_v4 = vcombine.high %v1756_v21, %v1756_v21 }
 0x25c   : > { %v2267_v49 = vsel %vm1028_vm1, %v2159_v42, %v2223_v62  ;;  %3873 = vmatpush3.bf16.xpose.msra.mxu1 %v2641_v38  ;;  %v2457_v62 = vmul.f32 %v2386_v17, %v2265_v14  ;;  %v1976_v42 = vrot.slane %v1756_v21, %v4633_v15 }
 0x25d   : > { %v2459_v61 = vmul.f32 %v2394_v57, %v2267_v49  ;;  %v2161_v22 = vpop.permute.xlu1 %2160  ;;  %3878 = vmatprep.subr.bf16.mxu1 %v5356_v37  ;;  %v2474_v27 = vadd.f32 %v2458_v41, %v4732_v35  ;;  %v1983_v39 = vrot.slane %v1969_v4, %v4633_v15 }
 0x25e   : > { %v2268_v53 = vsel %vm1028_vm1, %v2161_v22, %v2225_v30  ;;  %v2473_v0 = vadd.f32 %v2457_v62, %v4729_v34  ;;  %v1992_v55 = vrot.slane %v1976_v42, %v4633_v15 }
 0x25f   : > { %v2475_v16 = vadd.f32 %v2459_v61, %v4749_v24  ;;  %v2460_v13 = vmul.f32 %v2398_v18, %v2268_v53  ;;  %v2163_v54 = vpop.permute.xlu0 %2162  ;;  %v1984_v61 = vcombine.high %v1976_v42, %v1976_v42 }
 0x260   : > { %v2269_v9 = vsel %vm1028_vm1, %v2163_v54, %v2227_v51  ;;  %v1999_v54 = vrot.slane %v1983_v39, %v4633_v15 }
 0x261   : > { %v3709_v1 = vpack.c.bf16 %v2475_v16, %v2471_v59  ;;  %v2476_v12 = vadd.f32 %v2460_v13, %v4751_v45  ;;  %v2461_v30 = vmul.f32 %v2402_v8, %v2269_v9  ;;  %v2165_v58 = vpop.permute.xlu1 %2164  ;;  %v1761_v45 = vmul.f32 0.17677669, %v4924_v52 }
 0x262   : > { %v2270_v7 = vsel %vm1028_vm1, %v2165_v58, %v2229_v5  ;;  %v1985_v8 = vcombine.high %v1983_v39, %v1983_v39  ;;  %v2006_v16 = vrot.slane %v1984_v61, %v4633_v15  ;;  %v2314_v9 = vrot.slane %v1992_v55, %v4669_v50 }
 0x263   : > { %v3713_v23 = vpack.c.bf16 %v2476_v12, %v2472_v40  ;;  %v2477_v63 = vadd.f32 %v2461_v30, %v4754_v46  ;;  %v2462_v24 = vmul.f32 %v2406_v11, %v2270_v7  ;;  %v2231_v19 = vpop.permute.xlu0 %2230  ;;  %v5046_v57 = vrot.slane %v3709_v1, %v4560_v43 }
 0x264   : > { %v2069_v6 = vcombine.high %v1761_v45, %v1761_v45  ;;  %v2076_v31 = vrot.slane %v1761_v45, %v4633_v15  ;;  %v2013_v1 = vrot.slane %v1985_v8, %v4633_v15  ;;  %v2014_v30 = vcombine.high %v1992_v55, %v1992_v55 }
 0x265   : > { %v3710_v51 = vpack.c.bf16 %v2477_v63, %v2473_v0  ;;  %v2478_v2 = vadd.f32 %v2462_v24, %v4758_v48  ;;  %v2233_v56 = vpop.permute.xlu1 %2232  ;;  %v5054_v28 = vrot.slane %v3713_v23, %v4560_v43  ;;  %v2330_v7 = vrot.slane %v1999_v54, %v4669_v50 }
 0x266   : > { %v2083_v18 = vrot.slane %v2069_v6, %v4633_v15  ;;  %v2084_v49 = vcombine.high %v2076_v31, %v2076_v31  ;;  %v2092_v38 = vrot.slane %v2076_v31, %v4633_v15  ;;  %v2318_v23 = vrot.slane %v2006_v16, %v4669_v50 }
 0x267   : > { %v5049_v34 = vrot.slane %v3710_v51, %v4560_v43  ;;  %v3714_v5 = vpack.c.bf16 %v2478_v2, %v2474_v27  ;;  %v5051_v46 = vpop.permute.xlu0 %2234  ;;  %v2334_v21 = vrot.slane %v2013_v1, %v4669_v50  ;;  %v2016_v51 = vcombine.high %v2006_v16, %v2006_v16 }
 0x268   : > { %v2085_v22 = vcombine.high %v2083_v18, %v2083_v18  ;;  %v2106_v53 = vrot.slane %v2084_v49, %v4633_v15  ;;  %v2099_v59 = vrot.slane %v2083_v18, %v4633_v15  ;;  %v2410_v62 = vrot.slane %v2092_v38, %v4669_v50 }
 0x269   : > { %v2551_v35 = vcombine.low %v5046_v57, %v5049_v34  ;;  %v5059_v48 = vrot.slane %v3714_v5, %v4560_v43  ;;  %v5061_v52 = vpop.permute.xlu1 %2236  ;;  %v2114_v24 = vcombine.high %v2092_v38, %v2092_v38  ;;  %v2015_v2 = vcombine.high %v1999_v54, %v1999_v54 }
 0x26a   : > { %v2113_v40 = vrot.slane %v2085_v22, %v4633_v15  ;;  %v2414_v12 = vrot.slane %v2106_v53, %v4669_v50  ;;  %v2426_v0 = vrot.slane %v2099_v59, %v4669_v50  ;;  %v2367_v45 = vmul.f32 %v2314_v9, %v4809_v29 }
 0x26b   : > { %v2601_v44 = vcombine.low %v5054_v28, %v5059_v48  ;;  %v2239_v17 = vpop.permute.xlu0 %2238  ;;  %v2116_v5 = vcombine.high %v2106_v53, %v2106_v53  ;;  %v2017_v4 = vcombine.high %v2013_v1, %v2013_v1  ;;  %v2371_v42 = vmul.f32 %v2330_v7, %v4831_v33  ;;  %v4075_v48 = vld [vmem:[#allocation2 + $0x10] sm:$0xff]  }
 0x26c   : > { %v2430_v15 = vrot.slane %v2113_v40, %v4669_v50  ;;  %v2115_v39 = vcombine.high %v2099_v59, %v2099_v59  ;;  %v2368_v49 = vmul.f32 %v2318_v23, %v4817_v26  ;;  %v2418_v38 = vrot.slane %v2114_v24, %v4669_v50 }
 0x26d   : > { %v2241_v14 = vpop.permute.xlu1 %2240  ;;  %v2322_v53 = vrot.slane %v2014_v30, %v4669_v50  ;;  %v2338_v26 = vrot.slane %v2015_v2, %v4669_v50  ;;  %v2326_v54 = vrot.slane %v2016_v51, %v4669_v50 }
 0x26f   : > { %v2167_v25 = vpop.permute.xlu0 %2166  ;;  %v2369_v30 = vmul.f32 %v2322_v53, %v4820_v20  ;;  %v2370_v24 = vmul.f32 %v2326_v54, %v4828_v32  ;;  %v4076_v53 = vld [vmem:[#allocation2 + $0x18] sm:$0xff]  }
 0x270   : > { %v2271_v41 = vsel %vm1028_vm1, %v2167_v25, %v2231_v19  ;;  %v2372_v25 = vmul.f32 %v2334_v21, %v4839_v36 }
 0x271   : > { %v2169_v11 = vpop.permute.xlu1 %2168  ;;  %v2463_v27 = vmul.f32 %v2410_v62, %v2271_v41 }
 0x272   : > { %v2272_v63 = vsel %vm1028_vm1, %v2169_v11, %v2233_v56  ;;  %v2422_v11 = vrot.slane %v2116_v5, %v4669_v50 }
 0x273   : > { %v2171_v13 = vpop.permute.xlu0 %2170  ;;  %v2464_v31 = vmul.f32 %v2414_v12, %v2272_v63  ;;  %v2479_v22 = vadd.f32 %v2463_v27, %v2367_v45  ;;  %v5357_v27 = vld [vmem:[#allocation13_spill] sm:$0xff] }
 0x274   : > { %v2273_v33 = vsel %vm1028_vm1, %v2171_v13, %v5051_v46  ;;  %v2342_v46 = vrot.slane %v2017_v4, %v4669_v50  ;;  %v2558_v4 = vrot.slane %v2551_v35, %v4565_v47 }
 0x275   : > { %v2173_v58 = vpop.permute.xlu1 %2172  ;;  %v2480_v59 = vadd.f32 %v2464_v31, %v2368_v49  ;;  %v2465_v9 = vmul.f32 %v2418_v38, %v2273_v33  ;;  %v2797_v33 = vsel %vm2636_vm3, %v4076_v53, 0 }
 0x276   : > { %v2374_v51 = vmul.f32 %v2342_v46, %v5357_v27 }
 0x277   : > { %v2175_v19 = vpop.permute.xlu0 %2174 }
 0x278   : > { %v2275_v6 = vsel %vm1028_vm1, %v2175_v19, %v2239_v17  ;;  %v2117_v17 = vcombine.high %v2113_v40, %v2113_v40  ;;  %v2274_v40 = vsel %vm1028_vm1, %v2173_v58, %v5061_v52  ;;  %v2481_v58 = vadd.f32 %v2465_v9, %v2369_v30 }
 0x279   : > { %v2467_v18 = vmul.f32 %v2426_v0, %v2275_v6  ;;  %v2177_v56 = vpop.permute.xlu1 %2176  ;;  %v2466_v7 = vmul.f32 %v2422_v11, %v2274_v40  ;;  %v2373_v0 = vmul.f32 %v2338_v26, %v4853_v60  ;;  %v1363_v11 = vcombine.high %v4975_v3, %v5356_v37 }
 0x27a   : > { %v2276_v61 = vsel %vm1028_vm1, %v2177_v56, %v2241_v14  ;;  %v2434_v14 = vrot.slane %v2115_v39, %v4669_v50  ;;  %v2438_v13 = vrot.slane %v2117_v17, %v4669_v50  ;;  %v1370_v26 = vrot.slane %v4975_v3, %v4560_v43 }
 0x27b   : > { %v2483_v29 = vadd.f32 %v2467_v18, %v2371_v42  ;;  %v2468_v8 = vmul.f32 %v2430_v15, %v2276_v61  ;;  %v2179_v55 = vpop.permute.xlu0 %2178  ;;  %v2482_v15 = vadd.f32 %v2466_v7, %v2370_v24  ;;  %v2608_v18 = vrot.slane %v2601_v44, %v4565_v47 }
 0x27c   : > { %v2745_v44 = vsel %vm2636_vm3, %v4075_v48, 0  ;;  %v1436_v3 = vrot.slane %v4984_v10, %v4560_v43 }
 0x27d   : > { %v3711_v62 = vpack.c.bf16 %v2483_v29, %v2479_v22  ;;  %v2484_v16 = vadd.f32 %v2468_v8, %v2372_v25  ;;  %v2181_v36 = vpop.permute.xlu1 %2180  ;;  %v4074_v25 = vld [vmem:[#allocation2 + $0x8] sm:$0xff]  }
 0x27f   : > { %v3715_v41 = vpack.c.bf16 %v2484_v16, %v2480_v59  ;;  %v2243_v1 = vpop.permute.xlu0 %2242  ;;  %v2542_v45 = vrot.slane %v3711_v62, %v4560_v43  ;;  %v1377_v62 = vrot.slane %v1363_v11, %v4560_v43 }
 0x280   : > { %v2277_v12 = vsel %vm1028_vm1, %v2179_v55, %v2243_v1  ;;  %v2693_v55 = vsel %vm2636_vm3, %v4074_v25, 0 }
 0x281   : > { %v2469_v23 = vmul.f32 %v2434_v14, %v2277_v12  ;;  %v2245_v63 = vpop.permute.xlu1 %2244  ;;  %v2592_v60 = vrot.slane %v3715_v41, %v4560_v43  ;;  %v1429_v14 = vcombine.high %v4984_v10, %v5356_v37 }
 0x282   : > { %v2278_v52 = vsel %vm1028_vm1, %v2181_v36, %v2245_v63 }
 0x283   : > { %v2485_v21 = vadd.f32 %v2469_v23, %v2373_v0  ;;  %v2470_v19 = vmul.f32 %v2438_v13, %v2278_v52  ;;  %v1443_v30 = vrot.slane %v1429_v14, %v4560_v43 }
 0x285   : > { %v3712_v50 = vpack.c.bf16 %v2485_v21, %v2481_v58  ;;  %v2486_v2 = vadd.f32 %v2470_v19, %v2374_v51 }
 0x287   : > { %v2550_v20 = vrot.slane %v3712_v50, %v4560_v43  ;;  %v3716_v5 = vpack.c.bf16 %v2486_v2, %v2482_v15 }
 0x289   : > { %v2559_v6 = vcombine.low %v2542_v45, %v2550_v20  ;;  %v2600_v32 = vrot.slane %v3716_v5, %v4560_v43 }
 0x28b   : > { %v2566_v31 = vrot.slane %v2559_v6, %v4565_v47  ;;  %v2609_v42 = vcombine.low %v2592_v60, %v2600_v32 }
 0x28d   : > { %v2616_v56 = vrot.slane %v2609_v42, %v4565_v47  ;;  %v2567_v39 = vcombine.low %v2558_v4, %v2566_v31  ;;  %v2568_v49 = vcombine.high %v2558_v4, %v2566_v31 }
 0x28f   : > { %v2617_v38 = vcombine.low %v2608_v18, %v2616_v56  ;;  %v2618_v61 = vcombine.high %v2608_v18, %v2616_v56  ;;  %v2622_v22 = vshrl.u32 %v2567_v39, 16  ;;  %v2628_v29 = vshrl.u32 %v2568_v49, 16 }
 0x291   : > { %v2621_v8 = vpack.i.b16 %v2617_v38, %v2567_v39  ;;  %v2623_v57 = vshrl.u32 %v2617_v38, 16  ;;  %v2627_v34 = vpack.i.b16 %v2618_v61, %v2568_v49  ;;  %v2629_v35 = vshrl.u32 %v2618_v61, 16 }
 0x293   : > { %3875 = vmatmul.mubr.msk.bf16.vlgmr.msra.gmra.mxu1 %vm2636_vm3, %v2621_v8  ;;  %v2624_v17 = vpack.i.b16 %v2623_v57, %v2622_v22  ;;  %v2630_v28 = vpack.i.b16 %v2629_v35, %v2628_v29 }
 0x294   : > { %3879 = vmatpush3.bf16.xpose.msra.mxu1 %v2693_v55  ;;  %3880 = vmatprep.mubr.msk.bf16.mxu1 %vm4264_vm0, %v5356_v37 }
 0x295   : > { %3884 = vmatprep.subr.bf16.mxu1 %v5356_v37 }
 0x29b   : > { %3881 = vmatmul.mubr.msk.bf16.vlgmr.msra.gmra.mxu1 %vm2636_vm3, %v2624_v17 }
 0x29c   : > { %3885 = vmatpush3.bf16.xpose.msra.mxu1 %v2745_v44  ;;  %3886 = vmatprep.mubr.msk.bf16.mxu1 %vm4264_vm0, %v5356_v37 }
 0x29d   : > { %3890 = vmatprep.subr.bf16.mxu1 %v5356_v37 }
 0x2a2   : > { %v1358_v59 = vpop.permute.xlu0 %1357 }
 0x2a3   : > { %3887 = vmatmul.mubr.msk.bf16.vlgmr.msra.gmra.mxu1 %vm2636_vm3, %v2627_v34  ;;  %v1378_v16 = vcombine.high %v1358_v59, %v5356_v37  ;;  %v1385_v36 = vrot.slane %v1358_v59, %v4560_v43 }
 0x2a4   : > { %3891 = vmatpush3.bf16.xpose.msra.mxu1 %v2797_v33  ;;  %3892 = vmatprep.mubr.msk.bf16.mxu1 %vm4264_vm0, %v5356_v37 }
 0x2a5   : > { %3896 = vmatprep.subr.bf16.mxu1 %v5356_v37  ;;  %v1392_v54 = vrot.slane %v1378_v16, %v4560_v43  ;;  %v1393_v40 = vcombine.low %v1370_v26, %v1385_v36  ;;  %v1394_v9 = vcombine.high %v1370_v26, %v1385_v36 }
 0x2a6   : > { %v1360_v41 = vpop.permute.xlu1 %1359 }
 0x2a7   : > { %v1401_v1 = vrot.slane %v1393_v40, %v4565_v47  ;;  %v1408_v46 = vrot.slane %v1394_v9, %v4565_v47  ;;  %v1409_v13 = vcombine.low %v1377_v62, %v1392_v54  ;;  %v1410_v12 = vcombine.high %v1377_v62, %v1392_v54 }
 0x2a8   : > { %v1444_v7 = vcombine.high %v1360_v41, %v5356_v37  ;;  %v1451_v0 = vrot.slane %v1360_v41, %v4560_v43 }
 0x2a9   : > { %v1417_v23 = vrot.slane %v1409_v13, %v4565_v47  ;;  %v1424_v63 = vrot.slane %v1410_v12, %v4565_v47  ;;  %v1495_v24 = vcombine.low %v1401_v1, %v1408_v46  ;;  %v3689_v52 = vcombine.high %v1401_v1, %v1408_v46 }
 0x2aa   : > { %v1458_v10 = vrot.slane %v1444_v7, %v4560_v43  ;;  %v1459_v58 = vcombine.low %v1436_v3, %v1451_v0  ;;  %v1460_v21 = vcombine.high %v1436_v3, %v1451_v0 }
 0x2ab   : > { %3893 = vmatmul.mubr.msk.bf16.vlgmr.msra.gmra.mxu1 %vm2636_vm3, %v2630_v28  ;;  %v1502_v27 = vrot.slane %v1495_v24, %v4560_v43  ;;  %v1510_v51 = vrot.slane %v3689_v52, %v4560_v43  ;;  %v1511_v19 = vcombine.low %v1417_v23, %v1424_v63  ;;  %v3690_v15 = vcombine.high %v1417_v23, %v1424_v63 }
 0x2ac   : > { %3898 = vmatprep.mubr.msk.bf16.mxu1 %vm4264_vm0, %v5356_v37  ;;  %v1467_v50 = vrot.slane %v1459_v58, %v4565_v47  ;;  %v1474_v2 = vrot.slane %v1460_v21, %v4565_v47  ;;  %v1475_v45 = vcombine.low %v1443_v30, %v1458_v10  ;;  %v1476_v20 = vcombine.high %v1443_v30, %v1458_v10 }
 0x2ad   : > { %v1518_v5 = vrot.slane %v1511_v19, %v4560_v43  ;;  %v1526_v60 = vrot.slane %v3690_v15, %v4560_v43  ;;  %v1527_v6 = vcombine.low %v1502_v27, %v1510_v51 }
 0x2ae   : > { %v1483_v32 = vrot.slane %v1475_v45, %v4565_v47  ;;  %v1490_v4 = vrot.slane %v1476_v20, %v4565_v47  ;;  %v1545_v31 = vcombine.low %v1467_v50, %v1474_v2  ;;  %v3691_v42 = vcombine.high %v1467_v50, %v1474_v2 }
 0x2af   : > { %v1534_v18 = vrot.slane %v1527_v6, %v4565_v47  ;;  %v1535_v56 = vcombine.low %v1518_v5, %v1526_v60 }
 0x2b0   : > { %v1552_v39 = vrot.slane %v1545_v31, %v4560_v43  ;;  %v1560_v49 = vrot.slane %v3691_v42, %v4560_v43  ;;  %v1561_v38 = vcombine.low %v1483_v32, %v1490_v4  ;;  %v3692_v25 = vcombine.high %v1483_v32, %v1490_v4 }
 0x2b1   : > { %v1542_v61 = vrot.slane %v1535_v56, %v4565_v47 }
 0x2b2   : > { %v1568_v22 = vrot.slane %v1561_v38, %v4560_v43  ;;  %v1576_v29 = vrot.slane %v3692_v25, %v4560_v43  ;;  %v1577_v8 = vcombine.low %v1552_v39, %v1560_v49 }
 0x2b3   : > { %v1543_v57 = vcombine.low %v1534_v18, %v1542_v61  ;;  %v1544_v34 = vcombine.high %v1534_v18, %v1542_v61 }
 0x2b4   : > { %v1584_v35 = vrot.slane %v1577_v8, %v4565_v47  ;;  %v1585_v55 = vcombine.low %v1568_v22, %v1576_v29 }
 0x2b5   : > { %v3755_v17 = vpack.c.bf16 %v1543_v57, %v1543_v57  ;;  %v3757_v28 = vpack.c.bf16 %v1544_v34, %v1544_v34 }
 0x2b6   : > { %v1592_v48 = vrot.slane %v1585_v55, %v4565_v47 }
 0x2b7   : > { %1634 = vst.msk [vmem:[#allocation3] sm:$0xf] %vm1611_vm2, %v3755_v17  ;;  %1636 = vst.msk [vmem:[#allocation3 + $0x8] sm:$0xf] %vm1611_vm2, %v3755_v17 }
 0x2b8   : > { %1638 = vst.msk [vmem:[#allocation3 + $0x10] sm:$0xf] %vm1611_vm2, %v3757_v28  ;;  %1640 = vst.msk [vmem:[#allocation3 + $0x18] sm:$0xf] %vm1611_vm2, %v3757_v28  ;;  %v1593_v44 = vcombine.low %v1584_v35, %v1592_v48  ;;  %v1594_v53 = vcombine.high %v1584_v35, %v1592_v48 }
 0x2ba   : > { %v3756_v33 = vpack.c.bf16 %v1593_v44, %v1593_v44  ;;  %v3758_v11 = vpack.c.bf16 %v1594_v53, %v1594_v53 }
 0x2bc   : > { %1635 = vst.msk [vmem:[#allocation3 + $0x4] sm:$0xf] %vm1611_vm2, %v3756_v33  ;;  %1637 = vst.msk [vmem:[#allocation3 + $0xc] sm:$0xf] %vm1611_vm2, %v3756_v33 }
 0x2bd   : > { %1639 = vst.msk [vmem:[#allocation3 + $0x14] sm:$0xf] %vm1611_vm2, %v3758_v11  ;;  %1641 = vst.msk [vmem:[#allocation3 + $0x1c] sm:$0xf] %vm1611_vm2, %v3758_v11 }
 0x2c3   : > { %v4077_v26 = vld [vmem:[#allocation3] sm:$0xff]   ;;  %v4078_v8 = vld [vmem:[#allocation3 + $0x8] sm:$0xff]  }
 0x2c4   : > { %3897 = vmatpush3.bf16.msra.mxu1 %v4077_v26  ;;  %v4079_v11 = vld [vmem:[#allocation3 + $0x10] sm:$0xff]  }
 0x2c5   : > { %3902 = vmatprep.subr.bf16.mxu1 %v5356_v37 }
 0x353   : > { %v2677_v59 = vpop.f32.mrf.mxu1 }
 0x354   : > { %v2840_v62 = vsel %vm1028_vm1, %v2677_v59, -inf }
 0x355   : > { %2841 = vmax.xlane.f32.xlu0 %v2840_v62  ;;  %v3876_v16 = vpop.f32.mrf.mxu1 }
 0x357   : > { %v2680_v36 = vpop.f32.mrf.mxu1 }
 0x358   : > { %v2843_v14 = vsel %vm1028_vm1, %v2680_v36, -inf }
 0x359   : > { %2844 = vmax.xlane.f32.xlu1 %v2843_v14  ;;  %v3877_v54 = vpop.f32.mrf.mxu1  ;;  %v4080_v14 = vld [vmem:[#allocation3 + $0x18] sm:$0xff]  }
 0x35b   : > { %v2729_v40 = vpop.f32.mrf.mxu1 }
 0x35c   : > { %v2846_v9 = vsel %vm1028_vm1, %v2729_v40, -inf }
 0x35d   : > { %2847 = vmax.xlane.f32.xlu0 %v2846_v9  ;;  %v3882_v3 = vpop.f32.mrf.mxu1 }
 0x35f   : > { %v2732_v41 = vpop.f32.mrf.mxu1 }
 0x360   : > { %v2849_v1 = vsel %vm1028_vm1, %v2732_v41, -inf }
 0x361   : > { %2850 = vmax.xlane.f32.xlu0 %v2849_v1  ;;  %v3883_v46 = vpop.f32.mrf.mxu1  ;;  %v4081_v1 = vld [vmem:[%s5342_s4 + $0x38] sm:$0xff]  }
 0x362   : > { %3921 = vmatpush3.bf16.msra.mxu0 %v4081_v1  ;;  %v4082_v46 = vld [vmem:[%s5342_s4 + $0x30] sm:$0xff]  }
 0x363   : > { %v2781_v13 = vpop.f32.mrf.mxu1  ;;  %3922 = vmatprep.subr.bf16.mxu0 %v5356_v37 }
 0x364   : > { %v2852_v12 = vsel %vm1028_vm1, %v2781_v13, -inf }
 0x365   : > { %2853 = vmax.xlane.f32.xlu1 %v2852_v12  ;;  %v3888_v30 = vpop.f32.mrf.mxu1  ;;  %v4084_v12 = vld [vmem:[%s5342_s4 + $0x20] sm:$0xff]  }
 0x366   : > { %3923 = vmatpush3.bf16.msra.mxu0 %v4082_v46  ;;  %v4085_v30 = vld [vmem:[%s5342_s4 + $0x18] sm:$0xff]  }
 0x367   : > { %v2784_v7 = vpop.f32.mrf.mxu1  ;;  %3924 = vmatprep.subr.bf16.mxu0 %v5356_v37 }
 0x368   : > { %v2855_v0 = vsel %vm1028_vm1, %v2784_v7, -inf }
 0x369   : > { %2856 = vmax.xlane.f32.xlu0 %v2855_v0  ;;  %v3889_v23 = vpop.f32.mrf.mxu1 }
 0x36b   : > { %v2833_v63 = vpop.f32.mrf.mxu1 }
 0x36c   : > { %v2858_v24 = vsel %vm1028_vm1, %v2833_v63, -inf }
 0x36d   : > { %2859 = vmax.xlane.f32.xlu1 %v2858_v24  ;;  %v3894_v52 = vpop.f32.mrf.mxu1 }
 0x36f   : > { %v2836_v10 = vpop.f32.mrf.mxu1 }
 0x370   : > { %v2861_v58 = vsel %vm1028_vm1, %v2836_v10, -inf }
 0x371   : > { %2862 = vmax.xlane.f32.xlu0 %v2861_v58  ;;  %v3895_v21 = vpop.f32.mrf.mxu1 }
 0x3de   : > { %v2842_v27 = vpop.xlane.xlu0 %2841 }
 0x3df   : > { %v2864_v51 = vsub.f32 %v2677_v59, %v2842_v27 }
 0x3e1   : > { %v2872_v19 = vmul.f32 1.442695, %v2864_v51 }
 0x3e2   : > { %v2845_v15 = vpop.xlane.xlu1 %2844 }
 0x3e3   : > { %4089 = vpow2.f32 %v2872_v19  ;;  %v2865_v50 = vsub.f32 %v2680_v36, %v2845_v15 }
 0x3e5   : > { %v2874_v2 = vmul.f32 1.442695, %v2865_v50 }
 0x3e6   : > { %v2848_v45 = vpop.xlane.xlu0 %2847 }
 0x3e7   : > { %4091 = vpow2.f32 %v2874_v2  ;;  %v2866_v20 = vsub.f32 %v2729_v40, %v2848_v45 }
 0x3e9   : > { %v2876_v5 = vmul.f32 1.442695, %v2866_v20 }
 0x3ea   : > { %v2851_v60 = vpop.xlane.xlu0 %2850 }
 0x3eb   : > { %4093 = vpow2.f32 %v2876_v5  ;;  %v2867_v6 = vsub.f32 %v2732_v41, %v2851_v60 }
 0x3ed   : > { %v2878_v32 = vmul.f32 1.442695, %v2867_v6 }
 0x3ee   : > { %v2854_v4 = vpop.xlane.xlu1 %2853 }
 0x3ef   : > { %4095 = vpow2.f32 %v2878_v32  ;;  %v2868_v31 = vsub.f32 %v2781_v13, %v2854_v4  ;;  %v4083_v13 = vld [vmem:[%s5342_s4 + $0x28] sm:$0xff]  }
 0x3f0   : > { %v4090_v42 = vpop.eup %4089  ;;  %3925 = vmatpush3.bf16.msra.mxu0 %v4083_v13 }
 0x3f1   : > { %v2880_v18 = vmul.f32 1.442695, %v2868_v31  ;;  %v2888_v56 = vsel %vm1028_vm1, %v4090_v42, 0.0  ;;  %3926 = vmatprep.subr.bf16.mxu0 %v5356_v37 }
 0x3f2   : > { %v2857_v39 = vpop.xlane.xlu0 %2856  ;;  %2889 = vadd.xlane.f32.xlu1 %v2888_v56 }
 0x3f3   : > { %4097 = vpow2.f32 %v2880_v18  ;;  %v2869_v49 = vsub.f32 %v2784_v7, %v2857_v39  ;;  %v4086_v7 = vld [vmem:[%s5342_s4 + $0x10] sm:$0xff]  }
 0x3f4   : > { %v4092_v38 = vpop.eup %4091  ;;  %3927 = vmatpush3.bf16.msra.mxu0 %v4084_v12 }
 0x3f5   : > { %v2882_v25 = vmul.f32 1.442695, %v2869_v49  ;;  %v2891_v61 = vsel %vm1028_vm1, %v4092_v38, 0.0  ;;  %v2912_v22 = vpack.c.bf16 %v4092_v38, %v4090_v42  ;;  %3928 = vmatprep.subr.bf16.mxu0 %v5356_v37 }
 0x3f6   : > { %2892 = vadd.xlane.f32.xlu0 %v2891_v61  ;;  %v2860_v29 = vpop.xlane.xlu1 %2859 }
 0x3f7   : > { %4099 = vpow2.f32 %v2882_v25  ;;  %v2870_v57 = vsub.f32 %v2833_v63, %v2860_v29  ;;  %3899 = vmatmul.mubr.msk.bf16.vlgmr.msra.gmra.mxu1 %vm1028_vm1, %v2912_v22 }
 0x3f8   : > { %v4094_v34 = vpop.eup %4093  ;;  %3903 = vmatpush3.bf16.msra.mxu1 %v4078_v8  ;;  %3904 = vmatprep.mubr.msk.bf16.mxu1 %vm4264_vm0, %v5356_v37 }
 0x3f9   : > { %v2884_v35 = vmul.f32 1.442695, %v2870_v57  ;;  %v2894_v55 = vsel %vm1028_vm1, %v4094_v34, 0.0  ;;  %3908 = vmatprep.subr.bf16.mxu1 %v5356_v37  ;;  %3929 = vmatpush3.bf16.msra.mxu0 %v4085_v30 }
 0x3fa   : > { %2895 = vadd.xlane.f32.xlu1 %v2894_v55  ;;  %v2863_v17 = vpop.xlane.xlu0 %2862  ;;  %3930 = vmatprep.subr.bf16.mxu0 %v5356_v37 }
 0x3fb   : > { %4101 = vpow2.f32 %v2884_v35  ;;  %v2871_v28 = vsub.f32 %v2836_v10, %v2863_v17 }
 0x3fc   : > { %v4096_v48 = vpop.eup %4095 }
 0x3fd   : > { %v2886_v44 = vmul.f32 1.442695, %v2871_v28  ;;  %v2897_v53 = vsel %vm1028_vm1, %v4096_v48, 0.0  ;;  %v2913_v33 = vpack.c.bf16 %v4096_v48, %v4094_v34  ;;  %3931 = vmatpush3.bf16.msra.mxu0 %v4086_v7 }
 0x3fe   : > { %2898 = vadd.xlane.f32.xlu0 %v2897_v53  ;;  %3932 = vmatprep.subr.bf16.mxu0 %v5356_v37 }
 0x3ff   : > { %4103 = vpow2.f32 %v2886_v44  ;;  %3905 = vmatmul.mubr.msk.bf16.vlgmr.msra.gmra.mxu1 %vm1028_vm1, %v2913_v33 }
 0x400   : > { %v4098_v26 = vpop.eup %4097  ;;  %3909 = vmatpush3.bf16.msra.mxu1 %v4079_v11  ;;  %3910 = vmatprep.mubr.msk.bf16.mxu1 %vm4264_vm0, %v5356_v37 }
 0x401   : > { %v2900_v59 = vsel %vm1028_vm1, %v4098_v26, 0.0  ;;  %3914 = vmatprep.subr.bf16.mxu1 %v5356_v37 }
 0x402   : > { %2901 = vadd.xlane.f32.xlu1 %v2900_v59 }
 0x404   : > { %v4100_v62 = vpop.eup %4099 }
 0x405   : > { %v2903_v16 = vsel %vm1028_vm1, %v4100_v62, 0.0  ;;  %v2914_v36 = vpack.c.bf16 %v4100_v62, %v4098_v26 }
 0x406   : > { %2904 = vadd.xlane.f32.xlu0 %v2903_v16 }
 0x407   : > { %3911 = vmatmul.mubr.msk.bf16.vlgmr.msra.gmra.mxu1 %vm1028_vm1, %v2914_v36 }
 0x408   : > { %v4102_v54 = vpop.eup %4101  ;;  %3915 = vmatpush3.bf16.msra.mxu1 %v4080_v14  ;;  %3916 = vmatprep.mubr.msk.bf16.mxu1 %vm4264_vm0, %v5356_v37 }
 0x409   : > { %v2906_v40 = vsel %vm1028_vm1, %v4102_v54, 0.0 }
 0x40a   : > { %2907 = vadd.xlane.f32.xlu1 %v2906_v40 }
 0x40c   : > { %v4104_v9 = vpop.eup %4103 }
 0x40d   : > { %v2909_v3 = vsel %vm1028_vm1, %v4104_v9, 0.0  ;;  %v2915_v41 = vpack.c.bf16 %v4104_v9, %v4102_v54 }
 0x40e   : > { %2910 = vadd.xlane.f32.xlu0 %v2909_v3 }
 0x40f   : > { %3917 = vmatmul.mubr.msk.bf16.vlgmr.msra.gmra.mxu1 %vm1028_vm1, %v2915_v41 }
 0x47b   : > { %v2890_v0 = vpop.xlane.xlu1 %2889 }
 0x47f   : > { %v2893_v23 = vpop.xlane.xlu0 %2892 }
 0x483   : > { %v2896_v63 = vpop.xlane.xlu1 %2895 }
 0x487   : > { %v2899_v10 = vpop.xlane.xlu0 %2898 }
 0x48b   : > { %v2902_v58 = vpop.xlane.xlu1 %2901 }
 0x48c   : > { %4105 = vrcp.f32 %v2902_v58 }
 0x48d   : > { %4107 = vrcp.f32 %v2890_v0 }
 0x48e   : > { %4109 = vrcp.f32 %v2896_v63 }
 0x48f   : > { %v2905_v51 = vpop.xlane.xlu0 %2904 }
 0x493   : > { %v2908_v19 = vpop.xlane.xlu1 %2907 }
 0x494   : > { %4111 = vrcp.f32 %v2908_v19 }
 0x495   : > { %4113 = vrcp.f32 %v2905_v51 }
 0x496   : > { %4115 = vrcp.f32 %v2893_v23 }
 0x497   : > { %v2911_v2 = vpop.xlane.xlu0 %2910 }
 0x498   : > { %4117 = vrcp.f32 %v2911_v2 }
 0x499   : > { %4119 = vrcp.f32 %v2899_v10  ;;  %v4106_v6 = vpop.eup %4105 }
 0x49a   : > { %v4108_v31 = vpop.eup %4107 }
 0x49b   : > { %v4110_v56 = vpop.eup %4109 }
 0x4a1   : > { %v4112_v39 = vpop.eup %4111 }
 0x4a2   : > { %v4114_v25 = vpop.eup %4113 }
 0x4a3   : > { %v4116_v34 = vpop.eup %4115 }
 0x4a5   : > { %v4118_v17 = vpop.eup %4117 }
 0x4a6   : > { %v4120_v53 = vpop.eup %4119 }
 0x4b7   : > { %v2959_v24 = vpop.f32.mrf.mxu1 }
 0x4b8   : > { %v3124_v42 = vmul.f32 %v4108_v31, %v2959_v24 }
 0x4b9   : > { %v3900_v52 = vpop.f32.mrf.mxu1 }
 0x4bb   : > { %v2962_v21 = vpop.f32.mrf.mxu1 }
 0x4bc   : > { %v3125_v28 = vmul.f32 %v4116_v34, %v2962_v21 }
 0x4bd   : > { %v3901_v27 = vpop.f32.mrf.mxu1 }
 0x4bf   : > { %v3009_v15 = vpop.f32.mrf.mxu1 }
 0x4c0   : > { %v3126_v61 = vmul.f32 %v4110_v56, %v3009_v15 }
 0x4c1   : > { %v3906_v50 = vpop.f32.mrf.mxu1 }
 0x4c3   : > { %v3012_v45 = vpop.f32.mrf.mxu1 }
 0x4c4   : > { %v3127_v62 = vmul.f32 %v4120_v53, %v3012_v45 }
 0x4c5   : > { %v3907_v20 = vpop.f32.mrf.mxu1 }
 0x4c7   : > { %v3059_v5 = vpop.f32.mrf.mxu1 }
 0x4c8   : > { %v3128_v32 = vmul.f32 %v4106_v6, %v3059_v5 }
 0x4c9   : > { %v3912_v60 = vpop.f32.mrf.mxu1 }
 0x4ca   : > { %v3132_v49 = vcombine.low %v3124_v42, %v3128_v32  ;;  %v3133_v22 = vcombine.high %v3124_v42, %v3128_v32 }
 0x4cb   : > { %v3062_v4 = vpop.f32.mrf.mxu1 }
 0x4cc   : > { %v3129_v8 = vmul.f32 %v4114_v25, %v3062_v4  ;;  %v3140_v48 = vrot.slane %v3132_v49, %v4560_v43  ;;  %v3147_v33 = vrot.slane %v3133_v22, %v4560_v43 }
 0x4cd   : > { %v3913_v18 = vpop.f32.mrf.mxu1 }
 0x4ce   : > { %v3200_v16 = vcombine.low %v3125_v28, %v3129_v8  ;;  %v3201_v36 = vcombine.high %v3125_v28, %v3129_v8 }
 0x4cf   : > { %v3109_v38 = vpop.f32.mrf.mxu1 }
 0x4d0   : > { %v3130_v29 = vmul.f32 %v4112_v39, %v3109_v38  ;;  %v3208_v7 = vrot.slane %v3200_v16, %v4560_v43  ;;  %v3215_v0 = vrot.slane %v3201_v36, %v4560_v43 }
 0x4d1   : > { %v3918_v57 = vpop.f32.mrf.mxu1 }
 0x4d2   : > { %v3148_v35 = vcombine.low %v3126_v61, %v3130_v29  ;;  %v3149_v55 = vcombine.high %v3126_v61, %v3130_v29  ;;  %v4087_v61 = vld [vmem:[%s5342_s4 + $0x8] sm:$0xff]  }
 0x4d3   : > { %v3112_v44 = vpop.f32.mrf.mxu1  ;;  %3933 = vmatpush3.bf16.msra.mxu0 %v4087_v61 }
 0x4d4   : > { %v3156_v11 = vrot.slane %v3148_v35, %v4560_v43  ;;  %v3163_v26 = vrot.slane %v3149_v55, %v4560_v43  ;;  %v3131_v59 = vmul.f32 %v4118_v17, %v3112_v44  ;;  %3934 = vmatprep.subr.bf16.mxu0 %v5356_v37 }
 0x4d5   : > { %v3919_v14 = vpop.f32.mrf.mxu1 }
 0x4d6   : > { %v3164_v54 = vcombine.low %v3140_v48, %v3156_v11  ;;  %v3165_v40 = vcombine.high %v3140_v48, %v3156_v11  ;;  %v3180_v9 = vcombine.low %v3147_v33, %v3163_v26  ;;  %v3181_v3 = vcombine.high %v3147_v33, %v3163_v26  ;;  %v4088_v26 = vld [vmem:[%s5342_s4] sm:$0xff]  }
 0x4d7   : > { %v3216_v41 = vcombine.low %v3127_v62, %v3131_v59  ;;  %v3217_v1 = vcombine.high %v3127_v62, %v3131_v59  ;;  %3935 = vmatpush3.bf16.msra.mxu0 %v4088_v26 }
 0x4d8   : > { %v3172_v46 = vrot.slane %v3164_v54, %v4565_v47  ;;  %v3179_v13 = vrot.slane %v3165_v40, %v4565_v47  ;;  %v3188_v12 = vrot.slane %v3180_v9, %v4565_v47  ;;  %v3195_v30 = vrot.slane %v3181_v3, %v4565_v47 }
 0x4d9   : > { %v3224_v23 = vrot.slane %v3216_v41, %v4560_v43  ;;  %v3231_v63 = vrot.slane %v3217_v1, %v4560_v43 }
 0x4da   : > { %v3268_v24 = vcombine.low %v3172_v46, %v3179_v13  ;;  %v3733_v52 = vcombine.high %v3172_v46, %v3179_v13  ;;  %v3284_v10 = vcombine.low %v3188_v12, %v3195_v30  ;;  %v3734_v58 = vcombine.high %v3188_v12, %v3195_v30 }
 0x4db   : > { %v3232_v21 = vcombine.low %v3208_v7, %v3224_v23  ;;  %v3233_v27 = vcombine.high %v3208_v7, %v3224_v23  ;;  %v3248_v51 = vcombine.low %v3215_v0, %v3231_v63  ;;  %v3249_v19 = vcombine.high %v3215_v0, %v3231_v63 }
 0x4dc   : > { %v3275_v15 = vrot.slane %v3268_v24, %v4560_v43  ;;  %v3283_v50 = vrot.slane %v3733_v52, %v4560_v43  ;;  %v3291_v2 = vrot.slane %v3284_v10, %v4560_v43  ;;  %v3299_v45 = vrot.slane %v3734_v58, %v4560_v43 }
 0x4dd   : > { %v3240_v20 = vrot.slane %v3232_v21, %v4565_v47  ;;  %v3247_v5 = vrot.slane %v3233_v27, %v4565_v47  ;;  %v3256_v60 = vrot.slane %v3248_v51, %v4565_v47  ;;  %v3263_v6 = vrot.slane %v3249_v19, %v4565_v47 }
 0x4de   : > { %v3301_v32 = vcombine.high %v3275_v15, %v3283_v50  ;;  %v3317_v4 = vcombine.high %v3291_v2, %v3299_v45  ;;  %v3300_v31 = vcombine.low %v3275_v15, %v3283_v50  ;;  %v3316_v42 = vcombine.low %v3291_v2, %v3299_v45 }
 0x4df   : > { %v3336_v18 = vcombine.low %v3240_v20, %v3247_v5  ;;  %v3735_v56 = vcombine.high %v3240_v20, %v3247_v5  ;;  %v3352_v39 = vcombine.low %v3256_v60, %v3263_v6  ;;  %v3736_v49 = vcombine.high %v3256_v60, %v3263_v6 }
 0x4e0   : > { %v3308_v38 = vrot.slane %v3300_v31, %v4565_v47  ;;  %v3324_v25 = vrot.slane %v3316_v42, %v4565_v47  ;;  %v3315_v34 = vrot.slane %v3301_v32, %v4565_v47  ;;  %v3331_v35 = vrot.slane %v3317_v4, %v4565_v47 }
 0x4e1   : > { %v3343_v22 = vrot.slane %v3336_v18, %v4560_v43  ;;  %v3351_v29 = vrot.slane %v3735_v56, %v4560_v43  ;;  %v3359_v8 = vrot.slane %v3352_v39, %v4560_v43  ;;  %v3367_v57 = vrot.slane %v3736_v49, %v4560_v43 }
 0x4e2   : > { %v3332_v55 = vcombine.low %v3308_v38, %v3324_v25  ;;  %v3334_v59 = vcombine.low %v3315_v34, %v3331_v35  ;;  %v3333_v16 = vcombine.high %v3308_v38, %v3324_v25  ;;  %v3335_v9 = vcombine.high %v3315_v34, %v3331_v35 }
 0x4e3   : > { %v3369_v17 = vcombine.high %v3343_v22, %v3351_v29  ;;  %v3385_v28 = vcombine.high %v3359_v8, %v3367_v57  ;;  %v3368_v48 = vcombine.low %v3343_v22, %v3351_v29  ;;  %v3384_v44 = vcombine.low %v3359_v8, %v3367_v57 }
 0x4e5   : > { %v3383_v53 = vrot.slane %v3369_v17, %v4565_v47  ;;  %v3399_v33 = vrot.slane %v3385_v28, %v4565_v47  ;;  %v3376_v11 = vrot.slane %v3368_v48, %v4565_v47  ;;  %v3392_v43 = vrot.slane %v3384_v44, %v4565_v47 }
 0x4e7   : > { %v3402_v62 = vcombine.low %v3383_v53, %v3399_v33  ;;  %v3400_v36 = vcombine.low %v3376_v11, %v3392_v43  ;;  %v3401_v14 = vcombine.high %v3376_v11, %v3392_v43  ;;  %v3403_v40 = vcombine.high %v3383_v53, %v3399_v33 }
 0x4e9   : > { %v4035_v54 = vpack.i.bf16 %v3402_v62, %v3334_v59  ;;  %v4030_v37 = vpack.i.bf16 %v3401_v14, %v3333_v16  ;;  %v4040_v3 = vpack.i.bf16 %v3403_v40, %v3335_v9 }
 0x4eb   : > { %4036 = vrot.lane.b32.xlu0 %v4035_v54, %s4266_s20  ;;  %4031 = vrot.lane.b32.xlu1 %v4030_v37, %s4267_s15 }
 0x4ef   : > { %4041 = vrot.lane.b32.xlu1 %v4040_v3, %s4265_s17  ;;  %s313_s17 = sand.u32 1, %s4241_s25  }
 0x4f0   : > { %s3670_s20 = sshll.u32 %s313_s17, 4  ;;  %s5293_s12 = scalar_lea.sflag [#allocation6], %s313_s17 }
 0x4f1   : > { %s315_s15 = scalar_lea.vmem [#allocation9], %s3670_s20 }
 0x4f2   : > { %s3560_s22 = sshll.u32 %s315_s15, 4  ;;  %s5286_s22 = int_to_ptr.vmem [resolvable:$true] %s3560_s22 }
 0x4f3   : > { %s4173_s18 = scalar_lea.vmem %s5286_s22, 256  ;;  %p4180_p0 = scmp.lt.s32.totalorder %s5286_s22, %s4178_s16 }
 0x4f4   : > { %p4174_p8 = scmp.ne.s32.totalorder %s5286_s22, %s4173_s18  ;;  %p4181_p6 = scmp.lt.s32.totalorder %s4179_s19, %s4173_s18 }
 0x4f6   : > { %p4175_p11 = pnand %p4174_p8, %p5358_p10  ;;  %p4182_p7 = por %p4181_p6, %p4180_p0 }
 0x4f8   : > { %p4176_p13 = pneg %p4175_p11 }
 0x4fa   : > { %p4183_p9 = pnand %p4182_p7, %p4176_p13 }
 0x55d   : > { %v4037_v47 = vpop.permute.xlu0 %4036  ;;  %v4032_v41 = vpop.permute.xlu1 %4031 }
 0x55e   : > { %v4034_v1 = vunpack.i.h.bf16 %v4032_v41  ;;  %v4033_v46 = vunpack.i.l.bf16 %v4032_v41  ;;  %v4039_v13 = vunpack.i.h.bf16 %v4037_v47  ;;  %v4038_v12 = vunpack.i.l.bf16 %v4037_v47 }
 0x560   : > { %v3429_v30 = vsel %vm2636_vm3, %v3400_v36, %v4034_v1  ;;  %v3428_v7 = vsel %vm2636_vm3, %v3332_v55, %v4033_v46 }
 0x561   : > { %v4042_v0 = vpop.permute.xlu1 %4041  ;;  %v3431_v24 = vsel %vm3430_vm4, %v3428_v7, %v4038_v12  ;;  %v3432_v52 = vsel %vm3430_vm4, %v3429_v30, %v4039_v13 }
 0x562   : > { %v4044_v23 = vunpack.i.h.bf16 %v4042_v0  ;;  %v4043_v63 = vunpack.i.l.bf16 %v4042_v0 }
 0x564   : > { %v3434_v10 = vsel %vm3433_vm5, %v3431_v24, %v4043_v63  ;;  %v3435_v58 = vsel %vm3433_vm5, %v3432_v52, %v4044_v23 }
 0x565   : > { %v3436_v21 = vpack.c.bf16 %v3435_v58, %v3434_v10 }
 0x567   : > { %3937 = vmatmul.mubr.bf16.vlgmr.msra.gmra.mxu0 %v3436_v21 }
 0x627   : > { %v3535_v27 = vpop.f32.mrf.mxu0 }
 0x628   : > { %3542 = vst [vmem:[%s315_s15] sm:$0xff] %v3535_v27 }
 0x629   : > { %v3938_v51 = vpop.f32.mrf.mxu0 }
 0x62b   : > { %v3538_v19 = vpop.f32.mrf.mxu0 }
 0x62c   : > { %3543 = vst [vmem:[%s315_s15 + $0x8] sm:$0xff] %v3538_v19 }
 0x62d   : > { %v3939_v15 = vpop.f32.mrf.mxu0 }
 0x62e   : > { %4186 = shalt.err (!%p4183_p9)
}
 0x62f   : > { %s4187_s21 = scalar_lea.hbm %s5291_s10, 256  ;;  %s4191_s15 = scalar_lea.hbm %s5345_s7, 512 }
 0x630   : > { %p4188_p12 = scmp.ne.s32.totalorder %s5291_s10, %s4187_s21  ;;  %p4192_p5 = scmp.lt.s32.totalorder %s5291_s10, %s5345_s7 }
 0x631   : > { %p4193_p3 = scmp.lt.s32.totalorder %s4191_s15, %s4187_s21 }
 0x632   : > { %p4189_p1 = pnand %p4188_p12, %p5358_p10 }
 0x633   : > { %p4194_p4 = por %p4193_p3, %p4192_p5 }
 0x634   : > { %p4190_p2 = pneg %p4189_p1 }
 0x636   : > { %p4195_p8 = pnand %p4194_p4, %p4190_p2 }
 0x638   : > { %4198 = shalt.err (!%p4195_p8)
}
 0x639   : > { %s4274_s8 = smov 128   ;;  %s4275_s18 = smov 8  }
 0x63a   : > { %3948 = dma.vmem_to_hbm [thread:$0]  (%p5358_p10), %s5286_s22, 256, %s5291_s10, %s5293_s12, %s4274_s8, %s4274_s8, %s4275_s18  }
 0x63b PF: > { %p3965_p11 = scmp.ge.s32.totalorder %s4257_s29, 2  ;;  %s3575_s27 = sand.u32 1, %s4237_s24  }
 0x63c   : > { %p5359_p13 = scmp.ne.s32.totalorder %s5351_s13, 0  ;;  %s3576_s16 = scalar_lea.sflag [#allocation6], %s3575_s27 }
 0x63e   : > { %p3958_p0 = pnand %p3965_p11, %p5359_p13 }
 0x640   : > { %p3959_p6 = pneg %p3958_p0 }
 0x642   : > { %4232 = dma.done.wait (%p3959_p6), %s3576_s16, 256  }
 0x643   : > { %4234 = vsyncadd (%p3959_p6), %s3576_s16, 4294967040  ;;  %s22_s29 = sadd.s32 1, %s4257_s29   ;;  %s5360_s24 = smov %s4241_s25 }
 0x644   : > { %p19_p7 = scmp.ge.s32.totalorder %s22_s29, 4   ;;  %s5361_s25 = smov %s4245_s26 }
 0x645   : > { %s5362_s26 = smov %s4369_s14  ;;  %s5363_s27 = smov %s4253_s28 }
 0x646   : > { %s5364_s28 = smov %s5366_s9  ;;  %21 = sbr.rel (!%p19_p7) target bundleno = 6 (0x6), region = 99 }
 0x64b   :  { %3581 = vsyncpa [#allocation5], 1 }
 0x64c   :  { %3583 = vsyncpa [#allocation5 + $0x1], 1 }
 0x64d   :  { %3584 = vsyncpa [#allocation8], 1 }
 0x64e   :  { %3585 = vsyncpa [#allocation6], 1 }
 0x64f   :  { %3587 = vsyncpa [#allocation6 + $0x1], 1 }

// kernel: tpu_custom_call.1
= control target key start
LH: loop header
LB: loop body
LE: loop exit
PB: predicated region body
PF: predicated region fallthrough
CT: control target
= control target key end

     0   :  { %12 = vsyncpa [#allocation5], 0  ;;  %s5338_s0 = inlined_call_operand.vmem [shape: f32[2,16,128], index: 0, kind: input, shape index: {}]   ;;  %s5339_s1 = inlined_call_operand.vmem [shape: bf16[128,128], index: 1, kind: input, shape index: {}]   ;;  %s5340_s2 = inlined_call_operand.vmem [shape: bf16[128,64], index: 2, kind: input, shape index: {}]   ;;  %s5341_s3 = inlined_call_operand.vmem [shape: bf16[128,64], index: 3, kind: input, shape index: {}]   ;;  %s5342_s4 = inlined_call_operand.vmem [shape: bf16[128,128], index: 4, kind: input, shape index: {}]   ;;  %s5343_s5 = inlined_call_operand.hbm [shape: f32[16,32], index: 5, kind: input, shape index: {}]   ;;  %s5344_s6 = inlined_call_operand.hbm [shape: f32[16,32], index: 6, kind: input, shape index: {}]   ;;  %s5345_s7 = inlined_call_operand.hbm [shape: f32[2,16,128], index: 7, kind: output, shape index: {}]  }
   0x1   :  { %13 = vsyncpa [#allocation8], 0 }
   0x2   :  { %14 = vsyncpa [#allocation6], 0 }
   0x3   :  { %16 = vsyncpa [#allocation6 + $0x1], 0  ;;  %s4316_s24 = smov 0   ;;  %s4318_s25 = smov 0  }
   0x4   :  { %s4320_s26 = smov 0   ;;  %s4322_s27 = smov 0  }
   0x5   :  { %s4324_s28 = smov 0   ;;  %s4326_s29 = smov 0  }
   0x6 LB: > { %s3661_s30 = sadd.s32 4294967295, %s4257_s29   ;;  %s3662_s8 = sadd.s32 4294967294, %s4257_s29   ;;  %s4257_s29 = sphi %s4326_s29, %s22_s29   ;;  %s4253_s28 = sphi %s4324_s28, %s5364_s28   ;;  %s4249_s27 = sphi %s4322_s27, %s5363_s27   ;;  %s4245_s26 = sphi %s4320_s26, %s5362_s26   ;;  %s4241_s25 = sphi %s4318_s25, %s5361_s25   ;;  %s4237_s24 = sphi %s4316_s24, %s5360_s24  }
   0x7   : > { %s34_s9 = sadd.s32 1, %s4253_s28  ;;  %s195_s10 = sadd.s32 1, %s4245_s26 }
   0x8   : > { %p36_p0 = scmp.ge.s32.totalorder %s34_s9, 2  ;;  %p205_p1 = scmp.ne.s32.totalorder %s4245_s26, %s4241_s25 }
   0x9   : > { %p206_p2 = scmp.eq.s32.totalorder %s3661_s30, 1  ;;  %p211_p3 = scmp.ne.s32.totalorder %s4241_s25, %s4237_s24 }
   0xa   : > { %s5366_s9 = smov (%p36_p0, %s34_s9), 0  ;;  %p212_p5 = scmp.eq.s32.totalorder %s3662_s8, 1 }
   0xb   : > { %p4356_p4 = por %p206_p2, %p205_p1  ;;  %s190_s12 = ssub.s32 %s4253_s28, %s5366_s9 }
   0xc   : > { %p3663_p6 = scmp.ge.s32.totalorder %s4257_s29, 1  ;;  %p193_p7 = scmp.eq.s32.totalorder %s190_s12, 0 }
   0xd   : > { %s5350_s11 = scalar_select %p4356_p4, 1, 0 }
   0xe   : > { %p4363_p8 = por %p212_p5, %p211_p3  ;;  %p219_p9 = scmp.lt.s32.totalorder %s4257_s29, 3 }
   0xf   : > { %s4369_s14 = scalar_select %p193_p7, %s4245_s26, %s195_s10  }
  0x10   : > { %s5351_s13 = scalar_select %p4363_p8, 1, 0 }
  0x11   : > { %p4371_p10 = pnand %p3663_p6, %p219_p9  ;;  %p4375_p11 = scmp.eq.s32.totalorder %s3661_s30, 0 }
  0x12   : > { %s4259_s17 = smov [#allocation4]   ;;  %s4260_s20 = smov [#allocation7]  }
  0x13   : > { %p3950_p12 = pneg %p4371_p10  ;;  %s243_s18 = sshll.u32 %s4259_s17, 4  ;;  %s244_s18 = int_to_ptr.vmem [resolvable:$true] %s243_s18 }
  0x14   : > { %s256_s21 = sshll.u32 %s4260_s20, 4  ;;  %s4132_s22 = scalar_lea.vmem %s244_s18, 256  ;;  %s257_s21 = int_to_ptr.vmem [resolvable:$true] %s256_s21 }
  0x15   : > { %p4383_p13 = pnand %p4375_p11, %p3950_p12  ;;  %p4133_p1 = scmp.ne.s32.totalorder %s244_s18, %s4132_s22 }
  0x16   : > { %p4140_p5 = scmp.lt.s32.totalorder %s244_s18, %s244_s18  ;;  %p4141_p6 = scmp.lt.s32.totalorder %s4132_s22, %s4132_s22 }
  0x17   : > { %p4123_p0 = pneg %p4383_p13 }
  0x18   : > { %p4142_p7 = por %p4141_p6, %p4140_p5 }
  0x19   : > { %p4135_p2 = pnand %p4133_p1, %p4123_p0 }
  0x1b   : > { %p4136_p3 = pneg %p4135_p2 }
  0x1d   : > { %p4143_p9 = pnand %p4142_p7, %p4136_p3 }
  0x1f   : > { %4146 = shalt.err (!%p4143_p9)
}
  0x20   : > { %s4261_s23 = smov 128   ;;  %s4262_s30 = smov 8  }
  0x21   : > { %3953 = dma.hbm_to_vmem [thread:$0]  (!%p4383_p13), %s5343_s5, 256, %s244_s18, [#allocation5], %s4261_s23, %s4261_s23, %s4262_s30  }
  0x22   : > { %s4158_s12 = scalar_lea.vmem %s257_s21, 256  ;;  %p4166_p8 = scmp.lt.s32.totalorder %s257_s21, %s257_s21 }
  0x23   : > { %p4159_p12 = scmp.ne.s32.totalorder %s257_s21, %s4158_s12  ;;  %p4167_p4 = scmp.lt.s32.totalorder %s4158_s12, %s4158_s12 }
  0x25   : > { %p4161_p1 = pnand %p4159_p12, %p4123_p0  ;;  %p4168_p5 = por %p4167_p4, %p4166_p8 }
  0x27   : > { %p4162_p2 = pneg %p4161_p1 }
  0x29   : > { %p4169_p3 = pnand %p4168_p5, %p4162_p2 }
  0x2b   : > { %4172 = shalt.err (!%p4169_p3)
}
  0x2c   : > { %3956 = dma.hbm_to_vmem [thread:$0]  (!%p4383_p13), %s5344_s6, 256, %s257_s21, [#allocation8], %s4261_s23, %s4261_s23, %s4262_s30  }
  0x2d   : > { %280 = sbr.rel (%p4371_p10) target bundleno = 1595 (0x63b), region = 48 }
  0x32   : > { %4224 = dma.done.wait (%p4375_p11), [#allocation5], 256  }
  0x33   : > { %4226 = vsyncadd (%p4375_p11), [#allocation5], 4294967040 }
  0x34   : > { %4228 = dma.done.wait (%p4375_p11), [#allocation8], 256  }
  0x35   : > { %4230 = vsyncadd (%p4375_p11), [#allocation8], 4294967040  ;;  %v5347_v0 = vmov 0.0   ;;  %vm4264_vm0 = vmmov 0   ;;  %v4045_v1 = vld [vmem:[%s5340_s2 + $0x38] sm:$0xff]   ;;  %v4046_v2 = vld [vmem:[%s5340_s2 + $0x30] sm:$0xff]   ;;  %v556_v38 = vlaneseq }
  0x36   : > { %3812 = vmatprep.subr.bf16.mxu0 %v5347_v0  ;;  %3828 = vmatprep.mubr.msk.bf16.mxu0 %vm4264_vm0, %v5347_v0  ;;  %v4047_v3 = vld [vmem:[%s5340_s2 + $0x28] sm:$0xff]   ;;  %p316_p4 = scmp.lt.s32.totalorder %s4249_s27, 1  ;;  %v4048_v4 = vld [vmem:[%s5340_s2 + $0x20] sm:$0xff]   ;;  %v4049_v5 = vld [vmem:[%s5340_s2 + $0x18] sm:$0xff]   ;;  %s4265_s17 = smov 96   ;;  %vm1028_vm1 = vcmask 130048  }
  0x37   : > { %3832 = vmatprep.subr.bf16.mxu1 %v5347_v0  ;;  %3848 = vmatprep.mubr.msk.bf16.mxu1 %vm4264_vm0, %v5347_v0  ;;  %v4050_v6 = vld [vmem:[%s5340_s2 + $0x10] sm:$0xff]   ;;  %v4051_v7 = vld [vmem:[%s5340_s2 + $0x8] sm:$0xff]   ;;  %v4052_v8 = vld [vmem:[%s5340_s2] sm:$0xff]   ;;  %s4266_s20 = smov 64   ;;  %v4268_v36 = vmov 1983009808  }
  0x38   : > { %3813 = vmatpush3.bf16.msra.mxu0 %v4045_v1  ;;  %s317_s8 = scalar_select %p316_p4, %s4249_s27, 1  ;;  %v4053_v12 = vld [vmem:[%s5339_s1 + $0x38] sm:$0xff]   ;;  %v4054_v13 = vld [vmem:[%s5339_s1 + $0x30] sm:$0xff]   ;;  %v4055_v14 = vld [vmem:[%s5339_s1 + $0x28] sm:$0xff]   ;;  %v554_v37 = vunpack.c.l.s4 %v4268_v36  ;;  %v4557_v40 = vshrl.u32 %v556_v38, 7  ;;  %vm1611_vm2 = vcmask 257024  }
  0x39   : > { %3814 = vmatprep.subr.bf16.mxu0 %v5347_v0  ;;  %v4056_v15 = vld [vmem:[%s5339_s1 + $0x20] sm:$0xff]   ;;  %v4057_v16 = vld [vmem:[%s5339_s1 + $0x18] sm:$0xff]   ;;  %v4058_v17 = vld [vmem:[%s5339_s1 + $0x10] sm:$0xff]   ;;  %v4269_v41 = vmov 1934713408   ;;  %s4270_s30 = smov 16  }
  0x3a   : > { %s3750_s15 = sshll.u32 %s317_s8, 4  ;;  %v4059_v18 = vld [vmem:[%s5339_s1 + $0x8] sm:$0xff]   ;;  %v4060_v19 = vld [vmem:[%s5339_s1] sm:$0xff]   ;;  %v4061_v28 = vld [vmem:[%s5341_s3 + $0x38] sm:$0xff]   ;;  %v555_v39 = vunpack.c.0.s8 %v554_v37  ;;  %v585_v42 = vunpack.c.l.s4 %v4269_v41  ;;  %s4271_s8 = smov 112   ;;  %vm2636_vm3 = vcmask 261120  }
  0x3b   : > { %s320_s22 = scalar_lea.vmem %s5338_s0, %s3750_s15  ;;  %s4267_s15 = smov 32   ;;  %3833 = vmatpush3.bf16.msra.mxu1 %v4061_v28  ;;  %v4062_v29 = vld [vmem:[%s5341_s3 + $0x30] sm:$0xff]   ;;  %v4063_v30 = vld [vmem:[%s5341_s3 + $0x28] sm:$0xff]   ;;  %v4064_v31 = vld [vmem:[%s5341_s3 + $0x20] sm:$0xff]   ;;  %vm3430_vm4 = vcmask 523264   ;;  %vm3433_vm5 = vcmask 785408  }
  0x3c   : > { %3815 = vmatpush3.bf16.msra.mxu0 %v4046_v2  ;;  %v327_v9 = vld [vmem:[%s320_s22] sm:$0xff]  ;;  %v328_v10 = vld [vmem:[%s320_s22 + $0x8] sm:$0xff]  ;;  %3834 = vmatprep.subr.bf16.mxu1 %v5347_v0  ;;  %v4065_v32 = vld [vmem:[%s5341_s3 + $0x18] sm:$0xff]   ;;  %v4560_v43 = vsub.s32 %v555_v39, %v4557_v40  ;;  %v586_v44 = vunpack.c.0.s8 %v585_v42  ;;  %s3759_s23 = sshll.u32 %s4249_s27, 8  ;;  %p5358_p10 = scmp.ne.s32.totalorder %s5350_s11, 0 }
  0x3d   : > { %3816 = vmatprep.subr.bf16.mxu0 %v5347_v0  ;;  %v4457_v11 = vpack.c.bf16 %v328_v10, %v327_v9  ;;  %v4066_v33 = vld [vmem:[%s5341_s3 + $0x10] sm:$0xff]   ;;  %v4067_v34 = vld [vmem:[%s5341_s3 + $0x8] sm:$0xff]   ;;  %v4068_v35 = vld [vmem:[%s5341_s3] sm:$0xff]   ;;  %s5291_s10 = scalar_lea.hbm %s5345_s7, %s3759_s23  ;;  %s4273_s27 = smov [#allocation9]  }
  0x3e   : > { %v4565_v47 = vsub.s32 %v586_v44, %v4557_v40  ;;  %s4177_s16 = sshll.u32 %s4273_s27, 4  ;;  %s4178_s16 = int_to_ptr.vmem [resolvable:$false] %s4177_s16 }
  0x3f   : > { %3835 = vmatpush3.bf16.msra.mxu1 %v4062_v29  ;;  %s4179_s19 = scalar_lea.vmem %s4178_s16, 512 }
  0x40   : > { %3817 = vmatpush3.bf16.msra.mxu0 %v4047_v3  ;;  %3836 = vmatprep.subr.bf16.mxu1 %v5347_v0  ;;  %v4272_v3 = vmov 1966171168  }
  0x41   : > { %3818 = vmatprep.subr.bf16.mxu0 %v5347_v0 }
  0x43   : > { %3837 = vmatpush3.bf16.msra.mxu1 %v4063_v30 }
  0x44   : > { %3819 = vmatpush3.bf16.msra.mxu0 %v4048_v4  ;;  %3838 = vmatprep.subr.bf16.mxu1 %v5347_v0  ;;  %v688_v4 = vunpack.c.l.s4 %v4272_v3 }
  0x45   : > { %3820 = vmatprep.subr.bf16.mxu0 %v5347_v0 }
  0x47   : > { %3839 = vmatpush3.bf16.msra.mxu1 %v4064_v31 }
  0x48   : > { %3821 = vmatpush3.bf16.msra.mxu0 %v4049_v5  ;;  %3840 = vmatprep.subr.bf16.mxu1 %v5347_v0 }
  0x49   : > { %3822 = vmatprep.subr.bf16.mxu0 %v5347_v0 }
  0x4b   : > { %3841 = vmatpush3.bf16.msra.mxu1 %v4065_v32 }
  0x4c   : > { %3823 = vmatpush3.bf16.msra.mxu0 %v4050_v6  ;;  %3842 = vmatprep.subr.bf16.mxu1 %v5347_v0 }
  0x4d   : > { %3824 = vmatprep.subr.bf16.mxu0 %v5347_v0 }
  0x4f   : > { %3843 = vmatpush3.bf16.msra.mxu1 %v4066_v33 }
  0x50   : > { %3825 = vmatpush3.bf16.msra.mxu0 %v4051_v7  ;;  %3844 = vmatprep.subr.bf16.mxu1 %v5347_v0 }
  0x51   : > { %3826 = vmatprep.subr.bf16.mxu0 %v5347_v0 }
  0x53   : > { %3845 = vmatpush3.bf16.msra.mxu1 %v4067_v34 }
  0x54   : > { %3827 = vmatpush3.bf16.msra.mxu0 %v4052_v8  ;;  %3846 = vmatprep.subr.bf16.mxu1 %v5347_v0  ;;  %v689_v8 = vunpack.c.0.s8 %v688_v4 }
  0x55   : > { %3852 = vmatprep.subr.bf16.mxu0 %v5347_v0 }
  0x57   : > { %3829 = vmatmul.mubr.bf16.vlgmr.msra.gmra.mxu0 %v4457_v11  ;;  %3847 = vmatpush3.bf16.msra.mxu1 %v4068_v35 }
  0x58   : > { %3853 = vmatpush3.bf16.msra.mxu0 %v4053_v12  ;;  %3868 = vmatprep.mubr.msk.bf16.mxu0 %vm4264_vm0, %v5347_v0 }
  0x59   : > { %3854 = vmatprep.subr.bf16.mxu0 %v5347_v0  ;;  %3872 = vmatprep.subr.bf16.mxu1 %v5347_v0 }
  0x5a   : > { %3849 = vmatmul.mubr.bf16.vlgmr.msra.gmra.mxu1 %v4457_v11 }
  0x5b   : > { %3874 = vmatprep.mubr.msk.bf16.mxu1 %vm4264_vm0, %v5347_v0 }
  0x5c   : > { %3855 = vmatpush3.bf16.msra.mxu0 %v4054_v13 }
  0x5d   : > { %3856 = vmatprep.subr.bf16.mxu0 %v5347_v0 }
  0x60   : > { %3857 = vmatpush3.bf16.msra.mxu0 %v4055_v14 }
  0x61   : > { %3858 = vmatprep.subr.bf16.mxu0 %v5347_v0 }
  0x64   : > { %3859 = vmatpush3.bf16.msra.mxu0 %v4056_v15  ;;  %v4633_v15 = vsub.s32 %v689_v8, %v4557_v40 }
  0x65   : > { %3860 = vmatprep.subr.bf16.mxu0 %v5347_v0 }
  0x68   : > { %3861 = vmatpush3.bf16.msra.mxu0 %v4057_v16 }
  0x69   : > { %3862 = vmatprep.subr.bf16.mxu0 %v5347_v0 }
  0x6c   : > { %3863 = vmatpush3.bf16.msra.mxu0 %v4058_v17 }
  0x6d   : > { %3864 = vmatprep.subr.bf16.mxu0 %v5347_v0 }
  0x70   : > { %3865 = vmatpush3.bf16.msra.mxu0 %v4059_v18 }
  0x71   : > { %3866 = vmatprep.subr.bf16.mxu0 %v5347_v0 }
  0x74   : > { %3867 = vmatpush3.bf16.msra.mxu0 %v4060_v19 }
  0x75   : > { %3920 = vmatprep.subr.bf16.mxu0 %v5347_v0 }
  0x77   : > { %3869 = vmatmul.mubr.bf16.vlgmr.msra.gmra.mxu0 %v4457_v11  ;;  %v4624_v11 = vld [vmem:[#allocation4] sm:$0xff] }
  0x78   : > { %3936 = vmatprep.mubr.msk.bf16.mxu0 %vm4264_vm0, %v5347_v0  ;;  %v1755_v14 = vmul.f32 0.17677669, %v4624_v11 }
  0x7a   : > { %v1927_v19 = vrot.slane %v1755_v14, %v4633_v15 }
  0x7c   : > { %v1935_v31 = vcombine.high %v1927_v19, %v1927_v19  ;;  %v1943_v44 = vrot.slane %v1927_v19, %v4633_v15 }
 0x117   : > { %v4498_v20 = vpop.f32.mrf.mxu0 }
 0x118   : > { %546 = vrot.lane.b32.xlu0 %v4498_v20, %s4265_s17  ;;  %v559_v46 = vrot.slane %v4498_v20, %v4560_v43  ;;  %v552_v55 = vcombine.high %v4498_v20, %v5347_v0 }
 0x119   : > { %v3830_v21 = vpop.f32.mrf.mxu0 }
 0x11a   : > { %v566_v58 = vrot.slane %v552_v55, %v4560_v43  ;;  %v1920_v21 = vcombine.high %v1755_v14, %v1755_v14 }
 0x11b   : > { %v4502_v22 = vpop.f32.mrf.mxu0 }
 0x11c   : > { %548 = vrot.lane.b32.xlu0 %v4502_v22, %s4265_s17  ;;  %v625_v12 = vrot.slane %v4502_v22, %v4560_v43  ;;  %v1934_v34 = vrot.slane %v1920_v21, %v4633_v15 }
 0x11d   : > { %v3831_v23 = vpop.f32.mrf.mxu0 }
 0x137   : > { %v4506_v24 = vpop.f32.mrf.mxu0 }
 0x138   : > { %1770 = vrot.lane.b32.xlu0 %v4506_v24, %s4266_s20  ;;  %1764 = vrot.lane.b32.xlu1 %v4506_v24, %s4265_s17 }
 0x139   : > { %v3870_v25 = vpop.f32.mrf.mxu0 }
 0x13b   : > { %v4512_v26 = vpop.f32.mrf.mxu0 }
 0x13c   : > { %1776 = vrot.lane.b32.xlu0 %v4506_v24, %s4267_s15  ;;  %1766 = vrot.lane.b32.xlu1 %v4512_v26, %s4265_s17 }
 0x13d   : > { %v3871_v27 = vpop.f32.mrf.mxu0 }
 0x140   : > { %1772 = vrot.lane.b32.xlu1 %v4512_v26, %s4266_s20 }
 0x144   : > { %1778 = vrot.lane.b32.xlu1 %v4512_v26, %s4267_s15 }
 0x18a   : > { %v547_v45 = vpop.permute.xlu0 %546 }
 0x18b   : > { %v574_v48 = vrot.slane %v547_v45, %v4560_v43  ;;  %v567_v52 = vcombine.high %v547_v45, %v5347_v0  ;;  %v618_v45 = vcombine.high %v4502_v22, %v5347_v0 }
 0x18d   : > { %v582_v49 = vcombine.low %v559_v46, %v574_v48  ;;  %v583_v50 = vcombine.high %v559_v46, %v574_v48  ;;  %v581_v56 = vrot.slane %v567_v52, %v4560_v43 }
 0x18e   : > { %v549_v7 = vpop.permute.xlu0 %548 }
 0x18f   : > { %v4569_v51 = vrot.slane %v582_v49, %v4565_v47  ;;  %v4573_v53 = vrot.slane %v583_v50, %v4565_v47  ;;  %v598_v60 = vcombine.low %v566_v58, %v581_v56  ;;  %v599_v63 = vcombine.high %v566_v58, %v581_v56 }
 0x190   : > { %v640_v9 = vrot.slane %v549_v7, %v4560_v43  ;;  %v633_v35 = vcombine.high %v549_v7, %v5347_v0  ;;  %v1936_v49 = vcombine.high %v1934_v34, %v1934_v34  ;;  %v4669_v50 = vsub.s32 0, %v4557_v40 }
 0x191   : > { %980 = vrot.lane.b32.xlu0 %v4569_v51, %s4270_s30  ;;  %v4579_v54 = vcombine.high %v4569_v51, %v5347_v0  ;;  %v4590_v57 = vcombine.high %v4573_v53, %v5347_v0  ;;  %v884_v59 = vsub.f32 0.0, %v4569_v51  ;;  %v886_v62 = vsub.f32 0.0, %v4573_v53 }
 0x192   : > { %v4603_v2 = vrot.slane %v598_v60, %v4565_v47  ;;  %v4613_v6 = vrot.slane %v599_v63, %v4565_v47  ;;  %v648_v16 = vcombine.low %v625_v12, %v640_v9  ;;  %v649_v23 = vcombine.high %v625_v12, %v640_v9 }
 0x193   : > { %982 = vrot.lane.b32.xlu1 %v4579_v54, %s4270_s30  ;;  %v885_v61 = vsub.f32 0.0, %v4579_v54  ;;  %v887_v1 = vsub.f32 0.0, %v4590_v57  ;;  %v647_v55 = vrot.slane %v633_v35, %v4560_v43  ;;  %v1950_v58 = vrot.slane %v1934_v34, %v4633_v15 }
 0x194   : > { %v4610_v5 = vcombine.high %v4603_v2, %v5347_v0  ;;  %v4622_v10 = vcombine.high %v4613_v6, %v5347_v0  ;;  %v888_v13 = vsub.f32 0.0, %v4603_v2  ;;  %v890_v20 = vsub.f32 0.0, %v4613_v6 }
 0x195   : > { %984 = vrot.lane.b32.xlu0 %v4573_v53, %s4270_s30  ;;  %v4641_v25 = vrot.slane %v648_v16, %v4565_v47  ;;  %v4651_v37 = vrot.slane %v649_v23, %v4565_v47  ;;  %v1965_v60 = vcombine.high %v1943_v44, %v1943_v44  ;;  %v1964_v3 = vrot.slane %v1936_v49, %v4633_v15 }
 0x196   : > { %v889_v17 = vsub.f32 0.0, %v4610_v5  ;;  %v891_v28 = vsub.f32 0.0, %v4622_v10  ;;  %v2282_v7 = vrot.slane %v1943_v44, %v4669_v50 }
 0x197   : > { %986 = vrot.lane.b32.xlu1 %v4590_v57, %s4270_s30  ;;  %v4659_v41 = vcombine.high %v4641_v25, %v5347_v0  ;;  %v4677_v56 = vcombine.high %v4651_v37, %v5347_v0  ;;  %v894_v19 = vsub.f32 0.0, %v4651_v37  ;;  %v1968_v21 = vcombine.high %v1964_v3, %v1964_v3 }
 0x199   : > { %916 = vrot.lane.b32.xlu0 %v884_v59, %s4271_s8  ;;  %v893_v12 = vsub.f32 0.0, %v4659_v41 }
 0x19b   : > { %918 = vrot.lane.b32.xlu1 %v885_v61, %s4271_s8 }
 0x19d   : > { %920 = vrot.lane.b32.xlu0 %v886_v62, %s4271_s8  ;;  %v632_v62 = vrot.slane %v618_v45, %v4560_v43 }
 0x19f   : > { %922 = vrot.lane.b32.xlu1 %v887_v1, %s4271_s8  ;;  %v892_v1 = vsub.f32 0.0, %v4641_v25  ;;  %v664_v9 = vcombine.low %v632_v62, %v647_v55 }
 0x1a1   : > { %988 = vrot.lane.b32.xlu0 %v4603_v2, %s4270_s30 }
 0x1a3   : > { %990 = vrot.lane.b32.xlu1 %v4610_v5, %s4270_s30 }
 0x1a5   : > { %992 = vrot.lane.b32.xlu0 %v4613_v6, %s4270_s30 }
 0x1a7   : > { %994 = vrot.lane.b32.xlu1 %v4622_v10, %s4270_s30 }
 0x1a9   : > { %924 = vrot.lane.b32.xlu0 %v888_v13, %s4271_s8  ;;  %v1966_v13 = vcombine.high %v1950_v58, %v1950_v58 }
 0x1aa   : > { %v1771_v18 = vpop.permute.xlu0 %1770  ;;  %v1765_v29 = vpop.permute.xlu1 %1764 }
 0x1ab   : > { %926 = vrot.lane.b32.xlu1 %v889_v17, %s4271_s8  ;;  %v1782_v27 = vcombine.low %v4506_v24, %v1771_v18  ;;  %v1783_v36 = vcombine.high %v4506_v24, %v1771_v18  ;;  %v1957_v24 = vrot.slane %v1935_v31, %v4633_v15  ;;  %v2290_v17 = vrot.slane %v1965_v60, %v4669_v50 }
 0x1ac   : > { %v4723_v31 = vrot.slane %v664_v9, %v4565_v47 }
 0x1ad   : > { %928 = vrot.lane.b32.xlu0 %v890_v20, %s4271_s8  ;;  %v1790_v38 = vrot.slane %v1782_v27, %v4560_v43  ;;  %v1797_v52 = vrot.slane %v1783_v36, %v4560_v43  ;;  %v1967_v61 = vcombine.high %v1957_v24, %v1957_v24  ;;  %v2286_v8 = vrot.slane %v1957_v24, %v4669_v50 }
 0x1ae   : > { %v1777_v30 = vpop.permute.xlu0 %1776  ;;  %v2302_v36 = vrot.slane %v1964_v3, %v4669_v50  ;;  %v1767_v60 = vpop.permute.xlu1 %1766 }
 0x1af   : > { %v1798_v32 = vcombine.low %v1765_v29, %v1777_v30  ;;  %v1799_v33 = vcombine.high %v1765_v29, %v1777_v30  ;;  %930 = vrot.lane.b32.xlu1 %v891_v28, %s4271_s8  ;;  %v2294_v18 = vrot.slane %v1967_v61, %v4669_v50  ;;  %v2298_v28 = vrot.slane %v1950_v58, %v4669_v50 }
 0x1b0   : > { %v665_v29 = vcombine.high %v632_v62, %v647_v55  ;;  %v895_v30 = vsub.f32 0.0, %v4677_v56 }
 0x1b1   : > { %v1806_v39 = vrot.slane %v1798_v32, %v4560_v43  ;;  %996 = vrot.lane.b32.xlu0 %v4641_v25, %s4270_s30  ;;  %v1813_v42 = vrot.slane %v1799_v33, %v4560_v43  ;;  %v2306_v32 = vrot.slane %v1966_v13, %v4669_v50 }
 0x1b2   : > { %v4746_v44 = vrot.slane %v665_v29, %v4565_v47  ;;  %v1773_v61 = vpop.permute.xlu1 %1772 }
 0x1b3   : > { %v1814_v46 = vcombine.low %v1790_v38, %v1806_v39  ;;  %v1815_v48 = vcombine.high %v1790_v38, %v1806_v39  ;;  %998 = vrot.lane.b32.xlu1 %v4659_v41, %s4270_s30  ;;  %v1830_v59 = vcombine.low %v1797_v52, %v1813_v42  ;;  %v1831_v63 = vcombine.high %v1797_v52, %v1813_v42 }
 0x1b4   : > { %v2310_v39 = vrot.slane %v1968_v21, %v4669_v50  ;;  %v4743_v42 = vcombine.high %v4723_v31, %v5347_v0  ;;  %v4764_v49 = vcombine.high %v4746_v44, %v5347_v0  ;;  %v896_v52 = vsub.f32 0.0, %v4723_v31 }
 0x1b5   : > { %1000 = vrot.lane.b32.xlu0 %v4651_v37, %s4270_s30  ;;  %v4680_v22 = vrot.slane %v1814_v46, %v4565_v47  ;;  %v4684_v40 = vrot.slane %v1815_v48, %v4565_v47  ;;  %v4704_v16 = vrot.slane %v1830_v59, %v4565_v47  ;;  %v4711_v20 = vrot.slane %v1831_v63, %v4565_v47 }
 0x1b6   : > { %v897_v55 = vsub.f32 0.0, %v4743_v42  ;;  %v898_v58 = vsub.f32 0.0, %v4746_v44  ;;  %v899_v59 = vsub.f32 0.0, %v4764_v49  ;;  %v1779_v62 = vpop.permute.xlu1 %1778 }
 0x1b7   : > { %1002 = vrot.lane.b32.xlu1 %v4677_v56, %s4270_s30  ;;  %v4693_v4 = vcombine.high %v4680_v22, %v5347_v0  ;;  %v4701_v14 = vcombine.high %v4684_v40, %v5347_v0  ;;  %v4714_v23 = vmul.f32 %v2282_v7, %v4680_v22  ;;  %v1848_v33 = vcombine.high %v4704_v16, %v5347_v0 }
 0x1b8   : > { %v4729_v34 = vmul.f32 %v2290_v17, %v4684_v40  ;;  %v1849_v38 = vcombine.high %v4711_v20, %v5347_v0  ;;  %v4749_v24 = vmul.f32 %v2298_v28, %v4704_v16  ;;  %v4754_v46 = vmul.f32 %v2306_v32, %v4711_v20 }
 0x1b9   : > { %932 = vrot.lane.b32.xlu0 %v892_v1, %s4271_s8  ;;  %v4717_v27 = vmul.f32 %v2286_v8, %v4693_v4  ;;  %v4732_v35 = vmul.f32 %v2294_v18, %v4701_v14  ;;  %v4751_v45 = vmul.f32 %v2302_v36, %v1848_v33  ;;  %v2118_v63 = vsub.f32 0.0, %v4680_v22 }
 0x1ba   : > { %v4758_v48 = vmul.f32 %v2310_v39, %v1849_v38  ;;  %v1866_v1 = vcombine.low %v1767_v60, %v1779_v62  ;;  %v2119_v3 = vsub.f32 0.0, %v4693_v4  ;;  %v1850_v7 = vcombine.low %v4512_v26, %v1773_v61 }
 0x1bb   : > { %934 = vrot.lane.b32.xlu1 %v893_v12, %s4271_s8  ;;  %v2120_v8 = vsub.f32 0.0, %v4684_v40  ;;  %v2121_v12 = vsub.f32 0.0, %v4701_v14  ;;  %v1867_v17 = vcombine.high %v1767_v60, %v1779_v62  ;;  %v2123_v18 = vsub.f32 0.0, %v1848_v33 }
 0x1bc   : > { %v1874_v9 = vrot.slane %v1866_v1, %v4560_v43  ;;  %v1858_v13 = vrot.slane %v1850_v7, %v4560_v43  ;;  %v2125_v28 = vsub.f32 0.0, %v1849_v38 }
 0x1bd   : > { %936 = vrot.lane.b32.xlu0 %v894_v19, %s4271_s8  ;;  %v1851_v19 = vcombine.high %v4512_v26, %v1773_v61  ;;  %v1881_v21 = vrot.slane %v1867_v17, %v4560_v43 }
 0x1bf   : > { %938 = vrot.lane.b32.xlu1 %v895_v30, %s4271_s8 }
 0x1c1   : > { %1004 = vrot.lane.b32.xlu0 %v4723_v31, %s4270_s30 }
 0x1c3   : > { %1006 = vrot.lane.b32.xlu1 %v4743_v42, %s4270_s30 }
 0x1c5   : > { %1008 = vrot.lane.b32.xlu0 %v4746_v44, %s4270_s30 }
 0x1c7   : > { %1010 = vrot.lane.b32.xlu1 %v4764_v49, %s4270_s30 }
 0x1c9   : > { %940 = vrot.lane.b32.xlu0 %v896_v52, %s4271_s8 }
 0x1cb   : > { %942 = vrot.lane.b32.xlu1 %v897_v55, %s4271_s8  ;;  %v4846_v55 = vld [vmem:[#allocation7] sm:$0xff] }
 0x1cc   : > { %v793_v62 = vrot.slane %v4846_v55, %v4633_v15 }
 0x1cd   : > { %944 = vrot.lane.b32.xlu0 %v898_v58, %s4271_s8 }
 0x1cf   : > { %946 = vrot.lane.b32.xlu1 %v899_v59, %s4271_s8  ;;  %v693_v59 = vrot.slane %v4624_v11, %v4633_v15 }
 0x1d1   : > { %2214 = vrot.lane.b32.xlu0 %v4680_v22, %s4270_s30  ;;  %v2122_v22 = vsub.f32 0.0, %v4704_v16  ;;  %v709_v7 = vrot.slane %v693_v59, %v4633_v15 }
 0x1d3   : > { %2216 = vrot.lane.b32.xlu1 %v4693_v4, %s4270_s30  ;;  %v1882_v4 = vcombine.low %v1858_v13, %v1874_v9 }
 0x1d5   : > { %2218 = vrot.lane.b32.xlu0 %v4684_v40, %s4270_s30  ;;  %v2124_v40 = vsub.f32 0.0, %v4711_v20  ;;  %v4809_v29 = vrot.slane %v1882_v4, %v4565_v47  ;;  %v809_v4 = vrot.slane %v793_v62, %v4633_v15 }
 0x1d7   : > { %2220 = vrot.lane.b32.xlu1 %v4701_v14, %s4270_s30  ;;  %v1883_v14 = vcombine.high %v1858_v13, %v1874_v9  ;;  %v4817_v26 = vcombine.high %v4809_v29, %v5347_v0  ;;  %v801_v13 = vcombine.high %v793_v62, %v793_v62 }
 0x1d9   : > { %2222 = vrot.lane.b32.xlu0 %v4704_v16, %s4270_s30  ;;  %v1865_v16 = vrot.slane %v1851_v19, %v4560_v43  ;;  %v2127_v52 = vsub.f32 0.0, %v4817_v26  ;;  %v731_v19 = vcombine.high %v709_v7, %v709_v7 }
 0x1db   : > { %2224 = vrot.lane.b32.xlu1 %v1848_v33, %s4270_s30  ;;  %v1898_v30 = vcombine.low %v1865_v16, %v1881_v21  ;;  %v1899_v39 = vcombine.high %v1865_v16, %v1881_v21  ;;  %v686_v16 = vcombine.high %v4624_v11, %v4624_v11 }
 0x1dd   : > { %2226 = vrot.lane.b32.xlu0 %v4711_v20, %s4270_s30  ;;  %v4820_v20 = vrot.slane %v1883_v14, %v4565_v47  ;;  %v4831_v33 = vrot.slane %v1898_v30, %v4565_v47  ;;  %v4853_v60 = vrot.slane %v1899_v39, %v4565_v47  ;;  %v823_v14 = vrot.slane %v801_v13, %v4633_v15 }
 0x1de   : > { %v1144_v30 = vrot.slane %v809_v4, %v4669_v50 }
 0x1df   : > { %2228 = vrot.lane.b32.xlu1 %v1849_v38, %s4270_s30  ;;  %v4828_v32 = vcombine.high %v4820_v20, %v5347_v0  ;;  %v4839_v36 = vcombine.high %v4831_v33, %v5347_v0  ;;  %v2126_v38 = vsub.f32 0.0, %v4809_v29  ;;  %v2128_v58 = vsub.f32 0.0, %v4820_v20 }
 0x1e0   : > { %v2130_v1 = vsub.f32 0.0, %v4831_v33  ;;  %v2132_v17 = vsub.f32 0.0, %v4853_v60 }
 0x1e1   : > { %2150 = vrot.lane.b32.xlu0 %v2118_v63, %s4271_s8  ;;  %v2129_v61 = vsub.f32 0.0, %v4828_v32  ;;  %v2131_v9 = vsub.f32 0.0, %v4839_v36 }
 0x1e3   : > { %2152 = vrot.lane.b32.xlu1 %v2119_v3, %s4271_s8  ;;  %v701_v3 = vcombine.high %v693_v59, %v693_v59 }
 0x1e5   : > { %2154 = vrot.lane.b32.xlu0 %v2120_v8, %s4271_s8 }
 0x1e7   : > { %2156 = vrot.lane.b32.xlu1 %v2121_v12, %s4271_s8  ;;  %v4866_v12 = vcombine.high %v4853_v60, %v5347_v0 }
 0x1e9   : > { %2158 = vrot.lane.b32.xlu0 %v2122_v22, %s4271_s8  ;;  %5355 = vst [vmem:[#allocation13_spill] sm:$0xff] %v4866_v12  ;;  %v2133_v21 = vsub.f32 0.0, %v4866_v12 }
 0x1eb   : > { %2160 = vrot.lane.b32.xlu1 %v2123_v18, %s4271_s8  ;;  %v723_v18 = vrot.slane %v701_v3, %v4633_v15  ;;  %v786_v3 = vcombine.high %v4846_v55, %v4846_v55 }
 0x1ed   : > { %2162 = vrot.lane.b32.xlu0 %v2124_v40, %s4271_s8  ;;  %v733_v39 = vcombine.high %v723_v18, %v723_v18 }
 0x1ef   : > { %2164 = vrot.lane.b32.xlu1 %v2125_v28, %s4271_s8  ;;  %v831_v28 = vcombine.high %v809_v4, %v809_v4  ;;  %v1060_v4 = vrot.slane %v733_v39, %v4669_v50 }
 0x1f1   : > { %2230 = vrot.lane.b32.xlu0 %v4809_v29, %s4270_s30  ;;  %v1152_v11 = vrot.slane %v831_v28, %v4669_v50 }
 0x1f3   : > { %2232 = vrot.lane.b32.xlu1 %v4817_v26, %s4270_s30 }
 0x1f5   : > { %2234 = vrot.lane.b32.xlu0 %v4820_v20, %s4270_s30 }
 0x1f7   : > { %2236 = vrot.lane.b32.xlu1 %v4828_v32, %s4270_s30 }
 0x1f9   : > { %2238 = vrot.lane.b32.xlu0 %v4831_v33, %s4270_s30 }
 0x1fb   : > { %2240 = vrot.lane.b32.xlu1 %v4839_v36, %s4270_s30 }
 0x1fd   : > { %2166 = vrot.lane.b32.xlu0 %v2126_v38, %s4271_s8 }
 0x1ff   : > { %2168 = vrot.lane.b32.xlu1 %v2127_v52, %s4271_s8  ;;  %v833_v52 = vcombine.high %v823_v14, %v823_v14 }
 0x201   : > { %2170 = vrot.lane.b32.xlu0 %v2128_v58, %s4271_s8  ;;  %v1048_v58 = vrot.slane %v709_v7, %v4669_v50  ;;  %v700_v7 = vrot.slane %v686_v16, %v4633_v15  ;;  %v800_v16 = vrot.slane %v786_v3, %v4633_v15 }
 0x203   : > { %v981_v63 = vpop.permute.xlu0 %980  ;;  %2172 = vrot.lane.b32.xlu1 %v2129_v61, %s4271_s8  ;;  %v1148_v61 = vrot.slane %v823_v14, %v4669_v50 }
 0x205   : > { %2174 = vrot.lane.b32.xlu0 %v2130_v1, %s4271_s8  ;;  %v983_v8 = vpop.permute.xlu1 %982  ;;  %v1056_v1 = vrot.slane %v731_v19, %v4669_v50  ;;  %v1156_v19 = vrot.slane %v833_v52, %v4669_v50  ;;  %v1128_v52 = vmul.f32 %v1060_v4, %v4590_v57 }
 0x207   : > { %v985_v22 = vpop.permute.xlu0 %984  ;;  %2176 = vrot.lane.b32.xlu1 %v2131_v9, %s4271_s8  ;;  %v1052_v9 = vrot.slane %v723_v18, %v4669_v50  ;;  %v1127_v18 = vmul.f32 %v1056_v1, %v4573_v53 }
 0x209   : > { %2178 = vrot.lane.b32.xlu0 %v2132_v17, %s4271_s8  ;;  %v987_v40 = vpop.permute.xlu1 %986 }
 0x20b   : > { %v917_v38 = vpop.permute.xlu0 %916  ;;  %2180 = vrot.lane.b32.xlu1 %v2133_v21, %s4271_s8  ;;  %v1125_v21 = vmul.f32 %v1048_v58, %v4569_v51 }
 0x20c   : > { %v1029_v59 = vsel %vm1028_vm1, %v917_v38, %v981_v63 }
 0x20d   : > { %2242 = vrot.lane.b32.xlu0 %v4853_v60, %s4270_s30  ;;  %v919_v62 = vpop.permute.xlu1 %918  ;;  %v1221_v63 = vmul.f32 %v1144_v30, %v1029_v59  ;;  %v1126_v30 = vmul.f32 %v1052_v9, %v4579_v54  ;;  %v816_v54 = vrot.slane %v800_v16, %v4633_v15 }
 0x20e   : > { %v1030_v13 = vsel %vm1028_vm1, %v919_v62, %v983_v8  ;;  %v702_v62 = vcombine.high %v700_v7, %v700_v7 }
 0x20f   : > { %v921_v17 = vpop.permute.xlu0 %920  ;;  %2244 = vrot.lane.b32.xlu1 %v4866_v12, %s4270_s30  ;;  %v1222_v28 = vmul.f32 %v1148_v61, %v1030_v13  ;;  %v1237_v0 = vadd.f32 %v1221_v63, %v1125_v21  ;;  %v1160_v4 = vrot.slane %v816_v54, %v4669_v50 }
 0x210   : > { %v1031_v14 = vsel %vm1028_vm1, %v921_v17, %v985_v22  ;;  %v716_v22 = vrot.slane %v700_v7, %v4633_v15 }
 0x211   : > { %v1223_v38 = vmul.f32 %v1152_v11, %v1031_v14  ;;  %v923_v8 = vpop.permute.xlu1 %922  ;;  %v1238_v58 = vadd.f32 %v1222_v28, %v1126_v30  ;;  %v802_v11 = vcombine.high %v800_v16, %v800_v16  ;;  %v4915_v28 = vld [vmem:[#allocation4 + $0x8] sm:$0xff] }
 0x212   : > { %v1032_v59 = vsel %vm1028_vm1, %v923_v8, %v987_v40  ;;  %v730_v40 = vrot.slane %v702_v62, %v4633_v15  ;;  %v732_v9 = vcombine.high %v716_v22, %v716_v22 }
 0x213   : > { %v1239_v39 = vadd.f32 %v1223_v38, %v1127_v18  ;;  %v1224_v12 = vmul.f32 %v1156_v19, %v1032_v59  ;;  %v989_v51 = vpop.permute.xlu0 %988  ;;  %v830_v7 = vrot.slane %v802_v11, %v4633_v15  ;;  %v1064_v18 = vrot.slane %v716_v22, %v4669_v50 }
 0x214   : > { %v734_v21 = vcombine.high %v730_v40, %v730_v40  ;;  %v1072_v30 = vrot.slane %v732_v9, %v4669_v50  ;;  %v1068_v62 = vrot.slane %v730_v40, %v4669_v50 }
 0x215   : > { %v1253_v61 = vcombine.low %v1237_v0, %v1239_v39  ;;  %v1240_v53 = vadd.f32 %v1224_v12, %v1128_v52  ;;  %v991_v1 = vpop.permute.xlu1 %990  ;;  %v832_v0 = vcombine.high %v816_v54, %v816_v54  ;;  %v834_v14 = vcombine.high %v830_v7, %v830_v7  ;;  %v4924_v52 = vld [vmem:[#allocation7 + $0x8] sm:$0xff] }
 0x216   : > { %v1164_v8 = vrot.slane %v830_v7, %v4669_v50  ;;  %v1129_v11 = vmul.f32 %v1064_v18, %v4603_v2  ;;  %v1131_v40 = vmul.f32 %v1072_v30, %v4613_v6 }
 0x217   : > { %v1261_v13 = vcombine.low %v1238_v58, %v1240_v53  ;;  %v993_v3 = vpop.permute.xlu0 %992  ;;  %v4906_v63 = vrot.slane %v1253_v61, %v4560_v43  ;;  %v1168_v59 = vrot.slane %v832_v0, %v4669_v50  ;;  %v742_v58 = vrot.slane %v4915_v28, %v4633_v15 }
 0x218   : > { %v1172_v53 = vrot.slane %v834_v14, %v4669_v50 }
 0x219   : > { %v4909_v57 = vrot.slane %v1261_v13, %v4560_v43  ;;  %v995_v17 = vpop.permute.xlu1 %994  ;;  %v750_v0 = vcombine.high %v742_v58, %v742_v58 }
 0x21b   : > { %v1285_v12 = vcombine.low %v4906_v63, %v4909_v57  ;;  %v925_v19 = vpop.permute.xlu0 %924  ;;  %v842_v63 = vrot.slane %v4924_v52, %v4633_v15  ;;  %v1130_v57 = vmul.f32 %v1068_v62, %v4610_v5  ;;  %v772_v30 = vrot.slane %v750_v0, %v4633_v15 }
 0x21c   : > { %v1033_v38 = vsel %vm1028_vm1, %v925_v19, %v989_v51  ;;  %v1076_v51 = vrot.slane %v734_v21, %v4669_v50 }
 0x21d   : > { %v927_v16 = vpop.permute.xlu1 %926  ;;  %v1225_v61 = vmul.f32 %v1160_v4, %v1033_v38  ;;  %v1292_v0 = vrot.slane %v1285_v12, %v4565_v47 }
 0x21e   : > { %v1034_v39 = vsel %vm1028_vm1, %v927_v16, %v991_v1  ;;  %v1132_v21 = vmul.f32 %v1076_v51, %v4622_v10  ;;  %v850_v16 = vcombine.high %v842_v63, %v842_v63 }
 0x21f   : > { %v929_v22 = vpop.permute.xlu0 %928  ;;  %v1226_v54 = vmul.f32 %v1164_v8, %v1034_v39  ;;  %v1241_v4 = vadd.f32 %v1225_v61, %v1129_v11  ;;  %v735_v39 = vcombine.high %v4915_v28, %v4915_v28  ;;  %v782_v11 = vcombine.high %v772_v30, %v772_v30 }
 0x220   : > { %v1035_v13 = vsel %vm1028_vm1, %v929_v22, %v993_v3  ;;  %v758_v3 = vrot.slane %v742_v58, %v4633_v15  ;;  %v872_v22 = vrot.slane %v850_v16, %v4633_v15 }
 0x221   : > { %v1227_v9 = vmul.f32 %v1168_v59, %v1035_v13  ;;  %v931_v1 = vpop.permute.xlu1 %930  ;;  %v1242_v18 = vadd.f32 %v1226_v54, %v1130_v57  ;;  %v749_v57 = vrot.slane %v735_v39, %v4633_v15 }
 0x222   : > { %v1036_v7 = vsel %vm1028_vm1, %v931_v1, %v995_v17  ;;  %v858_v17 = vrot.slane %v842_v63, %v4633_v15  ;;  %v780_v62 = vcombine.high %v758_v3, %v758_v3 }
 0x223   : > { %v1243_v19 = vadd.f32 %v1227_v9, %v1131_v40  ;;  %v1228_v2 = vmul.f32 %v1172_v53, %v1036_v7  ;;  %v997_v14 = vpop.permute.xlu0 %996  ;;  %v1080_v53 = vrot.slane %v758_v3, %v4669_v50  ;;  %v882_v9 = vcombine.high %v872_v22, %v872_v22 }
 0x224   : > { %v880_v51 = vcombine.high %v858_v17, %v858_v17  ;;  %v1176_v54 = vrot.slane %v858_v17, %v4669_v50  ;;  %v1088_v63 = vrot.slane %v780_v62, %v4669_v50  ;;  %v835_v7 = vcombine.high %v4924_v52, %v4924_v52 }
 0x225   : > { %v1269_v6 = vcombine.low %v1241_v4, %v1243_v19  ;;  %v1244_v38 = vadd.f32 %v1228_v2, %v1132_v21  ;;  %v999_v8 = vpop.permute.xlu1 %998  ;;  %v1180_v19 = vrot.slane %v872_v22, %v4669_v50  ;;  %v1133_v3 = vmul.f32 %v1080_v53, %v4641_v25 }
 0x226   : > { %v1184_v2 = vrot.slane %v880_v51, %v4669_v50  ;;  %v1188_v12 = vrot.slane %v882_v9, %v4669_v50  ;;  %v1135_v62 = vmul.f32 %v1088_v63, %v4651_v37  ;;  %v765_v9 = vrot.slane %v749_v57, %v4633_v15 }
 0x227   : > { %v1277_v59 = vcombine.low %v1242_v18, %v1244_v38  ;;  %v1001_v5 = vpop.permute.xlu0 %1000  ;;  %v1276_v10 = vrot.slane %v1269_v6, %v4560_v43  ;;  %v1092_v6 = vrot.slane %v782_v11, %v4669_v50  ;;  %v751_v11 = vcombine.high %v749_v57, %v749_v57 }
 0x229   : > { %v1284_v61 = vrot.slane %v1277_v59, %v4560_v43  ;;  %v1003_v58 = vpop.permute.xlu1 %1002 }
 0x22b   : > { %v1293_v13 = vcombine.low %v1276_v10, %v1284_v61  ;;  %v933_v40 = vpop.permute.xlu0 %932  ;;  %v849_v10 = vrot.slane %v835_v7, %v4633_v15 }
 0x22c   : > { %v1037_v1 = vsel %vm1028_vm1, %v933_v40, %v997_v14  ;;  %v1084_v14 = vrot.slane %v772_v30, %v4669_v50 }
 0x22d   : > { %v1300_v4 = vrot.slane %v1293_v13, %v4565_v47  ;;  %v935_v21 = vpop.permute.xlu1 %934  ;;  %v1229_v59 = vmul.f32 %v1176_v54, %v1037_v1  ;;  %v1136_v13 = vmul.f32 %v1092_v6, %v4677_v56  ;;  %v851_v7 = vcombine.high %v849_v10, %v849_v10 }
 0x22e   : > { %v1038_v18 = vsel %vm1028_vm1, %v935_v21, %v999_v8  ;;  %v1134_v51 = vmul.f32 %v1084_v14, %v4659_v41  ;;  %v779_v21 = vrot.slane %v751_v11, %v4633_v15 }
 0x22f   : > { %v1301_v38 = vcombine.low %v1292_v0, %v1300_v4  ;;  %v1302_v16 = vcombine.high %v1292_v0, %v1300_v4  ;;  %v937_v17 = vpop.permute.xlu0 %936  ;;  %v1230_v30 = vmul.f32 %v1180_v19, %v1038_v18  ;;  %v1245_v37 = vadd.f32 %v1229_v59, %v1133_v3  ;;  %v4975_v3 = vpop.f32.mrf.mxu1 }
 0x230   : > { %v1039_v39 = vsel %vm1028_vm1, %v937_v17, %v1001_v5  ;;  %v865_v19 = vrot.slane %v849_v10, %v4633_v15  ;;  %v879_v57 = vrot.slane %v851_v7, %v4633_v15  ;;  %1357 = vrot.lane.b32.xlu0 %v4975_v3, %s4265_s17 }
 0x231   : > { %v3751_v25 = vpack.c.bf16 %v1301_v38, %v1301_v38  ;;  %v3753_v61 = vpack.c.bf16 %v1302_v16, %v1302_v16  ;;  %v1231_v22 = vmul.f32 %v1184_v2, %v1039_v39  ;;  %v939_v8 = vpop.permute.xlu1 %938  ;;  %v1246_v41 = vadd.f32 %v1230_v30, %v1134_v51  ;;  %v3850_v38 = vpop.f32.mrf.mxu1 }
 0x232   : > { %v1040_v53 = vsel %vm1028_vm1, %v939_v8, %v1003_v58  ;;  %v781_v2 = vcombine.high %v765_v9, %v765_v9  ;;  %v881_v6 = vcombine.high %v865_v19, %v865_v19  ;;  %v1192_v59 = vrot.slane %v865_v19, %v4669_v50 }
 0x233   : > { %1612 = vst.msk [vmem:[#allocation2] sm:$0xf] %vm1611_vm2, %v3751_v25  ;;  %1614 = vst.msk [vmem:[#allocation2 + $0x8] sm:$0xf] %vm1611_vm2, %v3751_v25  ;;  %v1247_v5 = vadd.f32 %v1231_v22, %v1135_v62  ;;  %v1232_v54 = vmul.f32 %v1188_v12, %v1040_v53  ;;  %v1005_v40 = vpop.permute.xlu0 %1004  ;;  %v783_v12 = vcombine.high %v779_v21, %v779_v21  ;;  %v4984_v10 = vpop.f32.mrf.mxu1 }
 0x234   : > { %1616 = vst.msk [vmem:[#allocation2 + $0x10] sm:$0xf] %vm1611_vm2, %v3753_v61  ;;  %1618 = vst.msk [vmem:[#allocation2 + $0x18] sm:$0xf] %vm1611_vm2, %v3753_v61  ;;  %v883_v62 = vcombine.high %v879_v57, %v879_v57  ;;  %v1096_v25 = vrot.slane %v765_v9, %v4669_v50  ;;  %v1196_v61 = vrot.slane %v879_v57, %v4669_v50  ;;  %1359 = vrot.lane.b32.xlu1 %v4984_v10, %s4265_s17 }
 0x235   : > { %v1303_v1 = vcombine.low %v1245_v37, %v1247_v5  ;;  %v1248_v58 = vadd.f32 %v1232_v54, %v1136_v13  ;;  %v1007_v63 = vpop.permute.xlu1 %1006  ;;  %v1104_v22 = vrot.slane %v781_v2, %v4669_v50  ;;  %v1200_v8 = vrot.slane %v881_v6, %v4669_v50  ;;  %v3851_v11 = vpop.f32.mrf.mxu1 }
 0x236   : > { %v1100_v51 = vrot.slane %v779_v21, %v4669_v50  ;;  %v1108_v13 = vrot.slane %v783_v12, %v4669_v50  ;;  %v1204_v54 = vrot.slane %v883_v62, %v4669_v50  ;;  %v1137_v9 = vmul.f32 %v1096_v25, %v4723_v31 }
 0x237   : > { %v1311_v0 = vcombine.low %v1246_v41, %v1248_v58  ;;  %v1009_v4 = vpop.permute.xlu0 %1008  ;;  %v1310_v56 = vrot.slane %v1303_v1, %v4560_v43  ;;  %v1139_v1 = vmul.f32 %v1104_v22, %v4746_v44  ;;  %v1760_v44 = vmul.f32 0.17677669, %v4846_v55 }
 0x238   : > { %v1140_v2 = vmul.f32 %v1108_v13, %v4764_v49 }
 0x239   : > { %v1318_v14 = vrot.slane %v1311_v0, %v4560_v43  ;;  %v1011_v18 = vpop.permute.xlu1 %1010  ;;  %v1138_v0 = vmul.f32 %v1100_v51, %v4743_v42  ;;  %v2027_v49 = vrot.slane %v1760_v44, %v4633_v15 }
 0x23b   : > { %v1335_v16 = vcombine.low %v1310_v56, %v1318_v14  ;;  %v941_v17 = vpop.permute.xlu0 %940 }
 0x23c   : > { %v1041_v39 = vsel %vm1028_vm1, %v941_v17, %v1005_v40 }
 0x23d   : > { %v943_v30 = vpop.permute.xlu1 %942  ;;  %v1233_v37 = vmul.f32 %v1192_v59, %v1041_v39  ;;  %v2020_v39 = vcombine.high %v1760_v44, %v1760_v44  ;;  %v1342_v25 = vrot.slane %v1335_v16, %v4565_v47  ;;  %v2043_v16 = vrot.slane %v2027_v49, %v4633_v15 }
 0x23e   : > { %v1042_v53 = vsel %vm1028_vm1, %v943_v30, %v1007_v63 }
 0x23f   : > { %v945_v5 = vpop.permute.xlu0 %944  ;;  %v1234_v41 = vmul.f32 %v1196_v61, %v1042_v53  ;;  %v1249_v19 = vadd.f32 %v1233_v37, %v1137_v9  ;;  %v2034_v55 = vrot.slane %v2020_v39, %v4633_v15  ;;  %v2035_v53 = vcombine.high %v2027_v49, %v2027_v49 }
 0x240   : > { %v1043_v40 = vsel %vm1028_vm1, %v945_v5, %v1009_v4 }
 0x241   : > { %v1235_v58 = vmul.f32 %v1200_v8, %v1043_v40  ;;  %v947_v7 = vpop.permute.xlu1 %946  ;;  %v1250_v57 = vadd.f32 %v1234_v41, %v1138_v0  ;;  %v2057_v40 = vrot.slane %v2035_v53, %v4633_v15  ;;  %v2050_v41 = vrot.slane %v2034_v55, %v4633_v15 }
 0x242   : > { %v1044_v63 = vsel %vm1028_vm1, %v947_v7, %v1011_v18 }
 0x243   : > { %v1251_v21 = vadd.f32 %v1235_v58, %v1139_v1  ;;  %v1236_v56 = vmul.f32 %v1204_v54, %v1044_v63  ;;  %v2215_v14 = vpop.permute.xlu0 %2214  ;;  %v2036_v54 = vcombine.high %v2034_v55, %v2034_v55  ;;  %v2378_v1 = vrot.slane %v2043_v16, %v4669_v50 }
 0x244   : > { %v2065_v58 = vcombine.high %v2043_v16, %v2043_v16 }
 0x245   : > { %v1319_v6 = vcombine.low %v1249_v19, %v1251_v21  ;;  %v1252_v4 = vadd.f32 %v1236_v56, %v1140_v2  ;;  %v2217_v38 = vpop.permute.xlu1 %2216  ;;  %v2064_v0 = vrot.slane %v2036_v54, %v4633_v15  ;;  %v2382_v19 = vrot.slane %v2057_v40, %v4669_v50 }
 0x246   : > { %v2067_v21 = vcombine.high %v2057_v40, %v2057_v40 }
 0x247   : > { %v1327_v31 = vcombine.low %v1250_v57, %v1252_v4  ;;  %v2219_v59 = vpop.permute.xlu0 %2218  ;;  %v1326_v17 = vrot.slane %v1319_v6, %v4560_v43  ;;  %v2394_v57 = vrot.slane %v2050_v41, %v4669_v50  ;;  %v2066_v6 = vcombine.high %v2050_v41, %v2050_v41 }
 0x249   : > { %v1334_v42 = vrot.slane %v1327_v31, %v4560_v43  ;;  %v2221_v12 = vpop.permute.xlu1 %2220  ;;  %v2068_v31 = vcombine.high %v2064_v0, %v2064_v0 }
 0x24b   : > { %v1343_v18 = vcombine.low %v1326_v17, %v1334_v42  ;;  %v2223_v62 = vpop.permute.xlu0 %2222  ;;  %v2386_v17 = vrot.slane %v2065_v58, %v4669_v50 }
 0x24d   : > { %v1350_v61 = vrot.slane %v1343_v18, %v4565_v47  ;;  %v2225_v30 = vpop.permute.xlu1 %2224  ;;  %v2398_v18 = vrot.slane %v2064_v0, %v4669_v50 }
 0x24f   : > { %v1351_v22 = vcombine.low %v1342_v25, %v1350_v61  ;;  %v1352_v8 = vcombine.high %v1342_v25, %v1350_v61  ;;  %v2227_v51 = vpop.permute.xlu0 %2226  ;;  %v2390_v25 = vrot.slane %v2067_v21, %v4669_v50  ;;  %v1756_v21 = vmul.f32 0.17677669, %v4915_v28 }
 0x251   : > { %v3752_v11 = vpack.c.bf16 %v1351_v22, %v1351_v22  ;;  %v3754_v37 = vpack.c.bf16 %v1352_v8, %v1352_v8  ;;  %v2229_v5 = vpop.permute.xlu1 %2228  ;;  %v2402_v8 = vrot.slane %v2066_v6, %v4669_v50 }
 0x253   : > { %1613 = vst.msk [vmem:[#allocation2 + $0x4] sm:$0xf] %vm1611_vm2, %v3752_v11  ;;  %1615 = vst.msk [vmem:[#allocation2 + $0xc] sm:$0xf] %vm1611_vm2, %v3752_v11  ;;  %v2151_v13 = vpop.permute.xlu0 %2150  ;;  %v2406_v11 = vrot.slane %v2068_v31, %v4669_v50 }
 0x254   : > { %1617 = vst.msk [vmem:[#allocation2 + $0x14] sm:$0xf] %vm1611_vm2, %v3754_v37  ;;  %1619 = vst.msk [vmem:[#allocation2 + $0x1c] sm:$0xf] %vm1611_vm2, %v3754_v37  ;;  %v2263_v63 = vsel %vm1028_vm1, %v2151_v13, %v2215_v14  ;;  %v5356_v37 = vmov 0.0  }
 0x255   : > { %v2153_v9 = vpop.permute.xlu1 %2152  ;;  %v2455_v44 = vmul.f32 %v2378_v1, %v2263_v63 }
 0x256   : > { %v2264_v2 = vsel %vm1028_vm1, %v2153_v9, %v2217_v38 }
 0x257   : > { %v2155_v7 = vpop.permute.xlu0 %2154  ;;  %v2456_v39 = vmul.f32 %v2382_v19, %v2264_v2 }
 0x258   : > { %v2265_v14 = vsel %vm1028_vm1, %v2155_v7, %v2219_v59  ;;  %v2471_v59 = vadd.f32 %v2455_v44, %v4714_v23 }
 0x259   : > { %v2157_v56 = vpop.permute.xlu1 %2156  ;;  %v2472_v40 = vadd.f32 %v2456_v39, %v4717_v27 }
 0x25a   : > { %v4073_v4 = vld [vmem:[#allocation2] sm:$0xff]   ;;  %v2266_v55 = vsel %vm1028_vm1, %v2157_v56, %v2221_v12 }
 0x25b   : > { %v2159_v42 = vpop.permute.xlu0 %2158  ;;  %v2641_v38 = vsel %vm2636_vm3, %v4073_v4, 0  ;;  %v2458_v41 = vmul.f32 %v2390_v25, %v2266_v55  ;;  %v1969_v4 = vcombine.high %v1756_v21, %v1756_v21 }
 0x25c   : > { %v2267_v49 = vsel %vm1028_vm1, %v2159_v42, %v2223_v62  ;;  %3873 = vmatpush3.bf16.xpose.msra.mxu1 %v2641_v38  ;;  %v2457_v62 = vmul.f32 %v2386_v17, %v2265_v14  ;;  %v1976_v42 = vrot.slane %v1756_v21, %v4633_v15 }
 0x25d   : > { %v2459_v61 = vmul.f32 %v2394_v57, %v2267_v49  ;;  %v2161_v22 = vpop.permute.xlu1 %2160  ;;  %3878 = vmatprep.subr.bf16.mxu1 %v5356_v37  ;;  %v2474_v27 = vadd.f32 %v2458_v41, %v4732_v35  ;;  %v1983_v39 = vrot.slane %v1969_v4, %v4633_v15 }
 0x25e   : > { %v2268_v53 = vsel %vm1028_vm1, %v2161_v22, %v2225_v30  ;;  %v2473_v0 = vadd.f32 %v2457_v62, %v4729_v34  ;;  %v1992_v55 = vrot.slane %v1976_v42, %v4633_v15 }
 0x25f   : > { %v2475_v16 = vadd.f32 %v2459_v61, %v4749_v24  ;;  %v2460_v13 = vmul.f32 %v2398_v18, %v2268_v53  ;;  %v2163_v54 = vpop.permute.xlu0 %2162  ;;  %v1984_v61 = vcombine.high %v1976_v42, %v1976_v42 }
 0x260   : > { %v2269_v9 = vsel %vm1028_vm1, %v2163_v54, %v2227_v51  ;;  %v1999_v54 = vrot.slane %v1983_v39, %v4633_v15 }
 0x261   : > { %v3709_v1 = vpack.c.bf16 %v2475_v16, %v2471_v59  ;;  %v2476_v12 = vadd.f32 %v2460_v13, %v4751_v45  ;;  %v2461_v30 = vmul.f32 %v2402_v8, %v2269_v9  ;;  %v2165_v58 = vpop.permute.xlu1 %2164  ;;  %v1761_v45 = vmul.f32 0.17677669, %v4924_v52 }
 0x262   : > { %v2270_v7 = vsel %vm1028_vm1, %v2165_v58, %v2229_v5  ;;  %v1985_v8 = vcombine.high %v1983_v39, %v1983_v39  ;;  %v2006_v16 = vrot.slane %v1984_v61, %v4633_v15  ;;  %v2314_v9 = vrot.slane %v1992_v55, %v4669_v50 }
 0x263   : > { %v3713_v23 = vpack.c.bf16 %v2476_v12, %v2472_v40  ;;  %v2477_v63 = vadd.f32 %v2461_v30, %v4754_v46  ;;  %v2462_v24 = vmul.f32 %v2406_v11, %v2270_v7  ;;  %v2231_v19 = vpop.permute.xlu0 %2230  ;;  %v5046_v57 = vrot.slane %v3709_v1, %v4560_v43 }
 0x264   : > { %v2069_v6 = vcombine.high %v1761_v45, %v1761_v45  ;;  %v2076_v31 = vrot.slane %v1761_v45, %v4633_v15  ;;  %v2013_v1 = vrot.slane %v1985_v8, %v4633_v15  ;;  %v2014_v30 = vcombine.high %v1992_v55, %v1992_v55 }
 0x265   : > { %v3710_v51 = vpack.c.bf16 %v2477_v63, %v2473_v0  ;;  %v2478_v2 = vadd.f32 %v2462_v24, %v4758_v48  ;;  %v2233_v56 = vpop.permute.xlu1 %2232  ;;  %v5054_v28 = vrot.slane %v3713_v23, %v4560_v43  ;;  %v2330_v7 = vrot.slane %v1999_v54, %v4669_v50 }
 0x266   : > { %v2083_v18 = vrot.slane %v2069_v6, %v4633_v15  ;;  %v2084_v49 = vcombine.high %v2076_v31, %v2076_v31  ;;  %v2092_v38 = vrot.slane %v2076_v31, %v4633_v15  ;;  %v2318_v23 = vrot.slane %v2006_v16, %v4669_v50 }
 0x267   : > { %v5049_v34 = vrot.slane %v3710_v51, %v4560_v43  ;;  %v3714_v5 = vpack.c.bf16 %v2478_v2, %v2474_v27  ;;  %v5051_v46 = vpop.permute.xlu0 %2234  ;;  %v2334_v21 = vrot.slane %v2013_v1, %v4669_v50  ;;  %v2016_v51 = vcombine.high %v2006_v16, %v2006_v16 }
 0x268   : > { %v2085_v22 = vcombine.high %v2083_v18, %v2083_v18  ;;  %v2106_v53 = vrot.slane %v2084_v49, %v4633_v15  ;;  %v2099_v59 = vrot.slane %v2083_v18, %v4633_v15  ;;  %v2410_v62 = vrot.slane %v2092_v38, %v4669_v50 }
 0x269   : > { %v2551_v35 = vcombine.low %v5046_v57, %v5049_v34  ;;  %v5059_v48 = vrot.slane %v3714_v5, %v4560_v43  ;;  %v5061_v52 = vpop.permute.xlu1 %2236  ;;  %v2114_v24 = vcombine.high %v2092_v38, %v2092_v38  ;;  %v2015_v2 = vcombine.high %v1999_v54, %v1999_v54 }
 0x26a   : > { %v2113_v40 = vrot.slane %v2085_v22, %v4633_v15  ;;  %v2414_v12 = vrot.slane %v2106_v53, %v4669_v50  ;;  %v2426_v0 = vrot.slane %v2099_v59, %v4669_v50  ;;  %v2367_v45 = vmul.f32 %v2314_v9, %v4809_v29 }
 0x26b   : > { %v2601_v44 = vcombine.low %v5054_v28, %v5059_v48  ;;  %v2239_v17 = vpop.permute.xlu0 %2238  ;;  %v2116_v5 = vcombine.high %v2106_v53, %v2106_v53  ;;  %v2017_v4 = vcombine.high %v2013_v1, %v2013_v1  ;;  %v2371_v42 = vmul.f32 %v2330_v7, %v4831_v33  ;;  %v4075_v48 = vld [vmem:[#allocation2 + $0x10] sm:$0xff]  }
 0x26c   : > { %v2430_v15 = vrot.slane %v2113_v40, %v4669_v50  ;;  %v2115_v39 = vcombine.high %v2099_v59, %v2099_v59  ;;  %v2368_v49 = vmul.f32 %v2318_v23, %v4817_v26  ;;  %v2418_v38 = vrot.slane %v2114_v24, %v4669_v50 }
 0x26d   : > { %v2241_v14 = vpop.permute.xlu1 %2240  ;;  %v2322_v53 = vrot.slane %v2014_v30, %v4669_v50  ;;  %v2338_v26 = vrot.slane %v2015_v2, %v4669_v50  ;;  %v2326_v54 = vrot.slane %v2016_v51, %v4669_v50 }
 0x26f   : > { %v2167_v25 = vpop.permute.xlu0 %2166  ;;  %v2369_v30 = vmul.f32 %v2322_v53, %v4820_v20  ;;  %v2370_v24 = vmul.f32 %v2326_v54, %v4828_v32  ;;  %v4076_v53 = vld [vmem:[#allocation2 + $0x18] sm:$0xff]  }
 0x270   : > { %v2271_v41 = vsel %vm1028_vm1, %v2167_v25, %v2231_v19  ;;  %v2372_v25 = vmul.f32 %v2334_v21, %v4839_v36 }
 0x271   : > { %v2169_v11 = vpop.permute.xlu1 %2168  ;;  %v2463_v27 = vmul.f32 %v2410_v62, %v2271_v41 }
 0x272   : > { %v2272_v63 = vsel %vm1028_vm1, %v2169_v11, %v2233_v56  ;;  %v2422_v11 = vrot.slane %v2116_v5, %v4669_v50 }
 0x273   : > { %v2171_v13 = vpop.permute.xlu0 %2170  ;;  %v2464_v31 = vmul.f32 %v2414_v12, %v2272_v63  ;;  %v2479_v22 = vadd.f32 %v2463_v27, %v2367_v45  ;;  %v5357_v27 = vld [vmem:[#allocation13_spill] sm:$0xff] }
 0x274   : > { %v2273_v33 = vsel %vm1028_vm1, %v2171_v13, %v5051_v46  ;;  %v2342_v46 = vrot.slane %v2017_v4, %v4669_v50  ;;  %v2558_v4 = vrot.slane %v2551_v35, %v4565_v47 }
 0x275   : > { %v2173_v58 = vpop.permute.xlu1 %2172  ;;  %v2480_v59 = vadd.f32 %v2464_v31, %v2368_v49  ;;  %v2465_v9 = vmul.f32 %v2418_v38, %v2273_v33  ;;  %v2797_v33 = vsel %vm2636_vm3, %v4076_v53, 0 }
 0x276   : > { %v2374_v51 = vmul.f32 %v2342_v46, %v5357_v27 }
 0x277   : > { %v2175_v19 = vpop.permute.xlu0 %2174 }
 0x278   : > { %v2275_v6 = vsel %vm1028_vm1, %v2175_v19, %v2239_v17  ;;  %v2117_v17 = vcombine.high %v2113_v40, %v2113_v40  ;;  %v2274_v40 = vsel %vm1028_vm1, %v2173_v58, %v5061_v52  ;;  %v2481_v58 = vadd.f32 %v2465_v9, %v2369_v30 }
 0x279   : > { %v2467_v18 = vmul.f32 %v2426_v0, %v2275_v6  ;;  %v2177_v56 = vpop.permute.xlu1 %2176  ;;  %v2466_v7 = vmul.f32 %v2422_v11, %v2274_v40  ;;  %v2373_v0 = vmul.f32 %v2338_v26, %v4853_v60  ;;  %v1363_v11 = vcombine.high %v4975_v3, %v5356_v37 }
 0x27a   : > { %v2276_v61 = vsel %vm1028_vm1, %v2177_v56, %v2241_v14  ;;  %v2434_v14 = vrot.slane %v2115_v39, %v4669_v50  ;;  %v2438_v13 = vrot.slane %v2117_v17, %v4669_v50  ;;  %v1370_v26 = vrot.slane %v4975_v3, %v4560_v43 }
 0x27b   : > { %v2483_v29 = vadd.f32 %v2467_v18, %v2371_v42  ;;  %v2468_v8 = vmul.f32 %v2430_v15, %v2276_v61  ;;  %v2179_v55 = vpop.permute.xlu0 %2178  ;;  %v2482_v15 = vadd.f32 %v2466_v7, %v2370_v24  ;;  %v2608_v18 = vrot.slane %v2601_v44, %v4565_v47 }
 0x27c   : > { %v2745_v44 = vsel %vm2636_vm3, %v4075_v48, 0  ;;  %v1436_v3 = vrot.slane %v4984_v10, %v4560_v43 }
 0x27d   : > { %v3711_v62 = vpack.c.bf16 %v2483_v29, %v2479_v22  ;;  %v2484_v16 = vadd.f32 %v2468_v8, %v2372_v25  ;;  %v2181_v36 = vpop.permute.xlu1 %2180  ;;  %v4074_v25 = vld [vmem:[#allocation2 + $0x8] sm:$0xff]  }
 0x27f   : > { %v3715_v41 = vpack.c.bf16 %v2484_v16, %v2480_v59  ;;  %v2243_v1 = vpop.permute.xlu0 %2242  ;;  %v2542_v45 = vrot.slane %v3711_v62, %v4560_v43  ;;  %v1377_v62 = vrot.slane %v1363_v11, %v4560_v43 }
 0x280   : > { %v2277_v12 = vsel %vm1028_vm1, %v2179_v55, %v2243_v1  ;;  %v2693_v55 = vsel %vm2636_vm3, %v4074_v25, 0 }
 0x281   : > { %v2469_v23 = vmul.f32 %v2434_v14, %v2277_v12  ;;  %v2245_v63 = vpop.permute.xlu1 %2244  ;;  %v2592_v60 = vrot.slane %v3715_v41, %v4560_v43  ;;  %v1429_v14 = vcombine.high %v4984_v10, %v5356_v37 }
 0x282   : > { %v2278_v52 = vsel %vm1028_vm1, %v2181_v36, %v2245_v63 }
 0x283   : > { %v2485_v21 = vadd.f32 %v2469_v23, %v2373_v0  ;;  %v2470_v19 = vmul.f32 %v2438_v13, %v2278_v52  ;;  %v1443_v30 = vrot.slane %v1429_v14, %v4560_v43 }
 0x285   : > { %v3712_v50 = vpack.c.bf16 %v2485_v21, %v2481_v58  ;;  %v2486_v2 = vadd.f32 %v2470_v19, %v2374_v51 }
 0x287   : > { %v2550_v20 = vrot.slane %v3712_v50, %v4560_v43  ;;  %v3716_v5 = vpack.c.bf16 %v2486_v2, %v2482_v15 }
 0x289   : > { %v2559_v6 = vcombine.low %v2542_v45, %v2550_v20  ;;  %v2600_v32 = vrot.slane %v3716_v5, %v4560_v43 }
 0x28b   : > { %v2566_v31 = vrot.slane %v2559_v6, %v4565_v47  ;;  %v2609_v42 = vcombine.low %v2592_v60, %v2600_v32 }
 0x28d   : > { %v2616_v56 = vrot.slane %v2609_v42, %v4565_v47  ;;  %v2567_v39 = vcombine.low %v2558_v4, %v2566_v31  ;;  %v2568_v49 = vcombine.high %v2558_v4, %v2566_v31 }
 0x28f   : > { %v2617_v38 = vcombine.low %v2608_v18, %v2616_v56  ;;  %v2618_v61 = vcombine.high %v2608_v18, %v2616_v56  ;;  %v2622_v22 = vshrl.u32 %v2567_v39, 16  ;;  %v2628_v29 = vshrl.u32 %v2568_v49, 16 }
 0x291   : > { %v2621_v8 = vpack.i.b16 %v2617_v38, %v2567_v39  ;;  %v2623_v57 = vshrl.u32 %v2617_v38, 16  ;;  %v2627_v34 = vpack.i.b16 %v2618_v61, %v2568_v49  ;;  %v2629_v35 = vshrl.u32 %v2618_v61, 16 }
 0x293   : > { %3875 = vmatmul.mubr.msk.bf16.vlgmr.msra.gmra.mxu1 %vm2636_vm3, %v2621_v8  ;;  %v2624_v17 = vpack.i.b16 %v2623_v57, %v2622_v22  ;;  %v2630_v28 = vpack.i.b16 %v2629_v35, %v2628_v29 }
 0x294   : > { %3879 = vmatpush3.bf16.xpose.msra.mxu1 %v2693_v55  ;;  %3880 = vmatprep.mubr.msk.bf16.mxu1 %vm4264_vm0, %v5356_v37 }
 0x295   : > { %3884 = vmatprep.subr.bf16.mxu1 %v5356_v37 }
 0x29b   : > { %3881 = vmatmul.mubr.msk.bf16.vlgmr.msra.gmra.mxu1 %vm2636_vm3, %v2624_v17 }
 0x29c   : > { %3885 = vmatpush3.bf16.xpose.msra.mxu1 %v2745_v44  ;;  %3886 = vmatprep.mubr.msk.bf16.mxu1 %vm4264_vm0, %v5356_v37 }
 0x29d   : > { %3890 = vmatprep.subr.bf16.mxu1 %v5356_v37 }
 0x2a2   : > { %v1358_v59 = vpop.permute.xlu0 %1357 }
 0x2a3   : > { %3887 = vmatmul.mubr.msk.bf16.vlgmr.msra.gmra.mxu1 %vm2636_vm3, %v2627_v34  ;;  %v1378_v16 = vcombine.high %v1358_v59, %v5356_v37  ;;  %v1385_v36 = vrot.slane %v1358_v59, %v4560_v43 }
 0x2a4   : > { %3891 = vmatpush3.bf16.xpose.msra.mxu1 %v2797_v33  ;;  %3892 = vmatprep.mubr.msk.bf16.mxu1 %vm4264_vm0, %v5356_v37 }
 0x2a5   : > { %3896 = vmatprep.subr.bf16.mxu1 %v5356_v37  ;;  %v1392_v54 = vrot.slane %v1378_v16, %v4560_v43  ;;  %v1393_v40 = vcombine.low %v1370_v26, %v1385_v36  ;;  %v1394_v9 = vcombine.high %v1370_v26, %v1385_v36 }
 0x2a6   : > { %v1360_v41 = vpop.permute.xlu1 %1359 }
 0x2a7   : > { %v1401_v1 = vrot.slane %v1393_v40, %v4565_v47  ;;  %v1408_v46 = vrot.slane %v1394_v9, %v4565_v47  ;;  %v1409_v13 = vcombine.low %v1377_v62, %v1392_v54  ;;  %v1410_v12 = vcombine.high %v1377_v62, %v1392_v54 }
 0x2a8   : > { %v1444_v7 = vcombine.high %v1360_v41, %v5356_v37  ;;  %v1451_v0 = vrot.slane %v1360_v41, %v4560_v43 }
 0x2a9   : > { %v1417_v23 = vrot.slane %v1409_v13, %v4565_v47  ;;  %v1424_v63 = vrot.slane %v1410_v12, %v4565_v47  ;;  %v1495_v24 = vcombine.low %v1401_v1, %v1408_v46  ;;  %v3689_v52 = vcombine.high %v1401_v1, %v1408_v46 }
 0x2aa   : > { %v1458_v10 = vrot.slane %v1444_v7, %v4560_v43  ;;  %v1459_v58 = vcombine.low %v1436_v3, %v1451_v0  ;;  %v1460_v21 = vcombine.high %v1436_v3, %v1451_v0 }
 0x2ab   : > { %3893 = vmatmul.mubr.msk.bf16.vlgmr.msra.gmra.mxu1 %vm2636_vm3, %v2630_v28  ;;  %v1502_v27 = vrot.slane %v1495_v24, %v4560_v43  ;;  %v1510_v51 = vrot.slane %v3689_v52, %v4560_v43  ;;  %v1511_v19 = vcombine.low %v1417_v23, %v1424_v63  ;;  %v3690_v15 = vcombine.high %v1417_v23, %v1424_v63 }
 0x2ac   : > { %3898 = vmatprep.mubr.msk.bf16.mxu1 %vm4264_vm0, %v5356_v37  ;;  %v1467_v50 = vrot.slane %v1459_v58, %v4565_v47  ;;  %v1474_v2 = vrot.slane %v1460_v21, %v4565_v47  ;;  %v1475_v45 = vcombine.low %v1443_v30, %v1458_v10  ;;  %v1476_v20 = vcombine.high %v1443_v30, %v1458_v10 }
 0x2ad   : > { %v1518_v5 = vrot.slane %v1511_v19, %v4560_v43  ;;  %v1526_v60 = vrot.slane %v3690_v15, %v4560_v43  ;;  %v1527_v6 = vcombine.low %v1502_v27, %v1510_v51 }
 0x2ae   : > { %v1483_v32 = vrot.slane %v1475_v45, %v4565_v47  ;;  %v1490_v4 = vrot.slane %v1476_v20, %v4565_v47  ;;  %v1545_v31 = vcombine.low %v1467_v50, %v1474_v2  ;;  %v3691_v42 = vcombine.high %v1467_v50, %v1474_v2 }
 0x2af   : > { %v1534_v18 = vrot.slane %v1527_v6, %v4565_v47  ;;  %v1535_v56 = vcombine.low %v1518_v5, %v1526_v60 }
 0x2b0   : > { %v1552_v39 = vrot.slane %v1545_v31, %v4560_v43  ;;  %v1560_v49 = vrot.slane %v3691_v42, %v4560_v43  ;;  %v1561_v38 = vcombine.low %v1483_v32, %v1490_v4  ;;  %v3692_v25 = vcombine.high %v1483_v32, %v1490_v4 }
 0x2b1   : > { %v1542_v61 = vrot.slane %v1535_v56, %v4565_v47 }
 0x2b2   : > { %v1568_v22 = vrot.slane %v1561_v38, %v4560_v43  ;;  %v1576_v29 = vrot.slane %v3692_v25, %v4560_v43  ;;  %v1577_v8 = vcombine.low %v1552_v39, %v1560_v49 }
 0x2b3   : > { %v1543_v57 = vcombine.low %v1534_v18, %v1542_v61  ;;  %v1544_v34 = vcombine.high %v1534_v18, %v1542_v61 }
 0x2b4   : > { %v1584_v35 = vrot.slane %v1577_v8, %v4565_v47  ;;  %v1585_v55 = vcombine.low %v1568_v22, %v1576_v29 }
 0x2b5   : > { %v3755_v17 = vpack.c.bf16 %v1543_v57, %v1543_v57  ;;  %v3757_v28 = vpack.c.bf16 %v1544_v34, %v1544_v34 }
 0x2b6   : > { %v1592_v48 = vrot.slane %v1585_v55, %v4565_v47 }
 0x2b7   : > { %1634 = vst.msk [vmem:[#allocation3] sm:$0xf] %vm1611_vm2, %v3755_v17  ;;  %1636 = vst.msk [vmem:[#allocation3 + $0x8] sm:$0xf] %vm1611_vm2, %v3755_v17 }
 0x2b8   : > { %1638 = vst.msk [vmem:[#allocation3 + $0x10] sm:$0xf] %vm1611_vm2, %v3757_v28  ;;  %1640 = vst.msk [vmem:[#allocation3 + $0x18] sm:$0xf] %vm1611_vm2, %v3757_v28  ;;  %v1593_v44 = vcombine.low %v1584_v35, %v1592_v48  ;;  %v1594_v53 = vcombine.high %v1584_v35, %v1592_v48 }
 0x2ba   : > { %v3756_v33 = vpack.c.bf16 %v1593_v44, %v1593_v44  ;;  %v3758_v11 = vpack.c.bf16 %v1594_v53, %v1594_v53 }
 0x2bc   : > { %1635 = vst.msk [vmem:[#allocation3 + $0x4] sm:$0xf] %vm1611_vm2, %v3756_v33  ;;  %1637 = vst.msk [vmem:[#allocation3 + $0xc] sm:$0xf] %vm1611_vm2, %v3756_v33 }
 0x2bd   : > { %1639 = vst.msk [vmem:[#allocation3 + $0x14] sm:$0xf] %vm1611_vm2, %v3758_v11  ;;  %1641 = vst.msk [vmem:[#allocation3 + $0x1c] sm:$0xf] %vm1611_vm2, %v3758_v11 }
 0x2c3   : > { %v4077_v26 = vld [vmem:[#allocation3] sm:$0xff]   ;;  %v4078_v8 = vld [vmem:[#allocation3 + $0x8] sm:$0xff]  }
 0x2c4   : > { %3897 = vmatpush3.bf16.msra.mxu1 %v4077_v26  ;;  %v4079_v11 = vld [vmem:[#allocation3 + $0x10] sm:$0xff]  }
 0x2c5   : > { %3902 = vmatprep.subr.bf16.mxu1 %v5356_v37 }
 0x353   : > { %v2677_v59 = vpop.f32.mrf.mxu1 }
 0x354   : > { %v2840_v62 = vsel %vm1028_vm1, %v2677_v59, -inf }
 0x355   : > { %2841 = vmax.xlane.f32.xlu0 %v2840_v62  ;;  %v3876_v16 = vpop.f32.mrf.mxu1 }
 0x357   : > { %v2680_v36 = vpop.f32.mrf.mxu1 }
 0x358   : > { %v2843_v14 = vsel %vm1028_vm1, %v2680_v36, -inf }
 0x359   : > { %2844 = vmax.xlane.f32.xlu1 %v2843_v14  ;;  %v3877_v54 = vpop.f32.mrf.mxu1  ;;  %v4080_v14 = vld [vmem:[#allocation3 + $0x18] sm:$0xff]  }
 0x35b   : > { %v2729_v40 = vpop.f32.mrf.mxu1 }
 0x35c   : > { %v2846_v9 = vsel %vm1028_vm1, %v2729_v40, -inf }
 0x35d   : > { %2847 = vmax.xlane.f32.xlu0 %v2846_v9  ;;  %v3882_v3 = vpop.f32.mrf.mxu1 }
 0x35f   : > { %v2732_v41 = vpop.f32.mrf.mxu1 }
 0x360   : > { %v2849_v1 = vsel %vm1028_vm1, %v2732_v41, -inf }
 0x361   : > { %2850 = vmax.xlane.f32.xlu0 %v2849_v1  ;;  %v3883_v46 = vpop.f32.mrf.mxu1  ;;  %v4081_v1 = vld [vmem:[%s5342_s4 + $0x38] sm:$0xff]  }
 0x362   : > { %3921 = vmatpush3.bf16.msra.mxu0 %v4081_v1  ;;  %v4082_v46 = vld [vmem:[%s5342_s4 + $0x30] sm:$0xff]  }
 0x363   : > { %v2781_v13 = vpop.f32.mrf.mxu1  ;;  %3922 = vmatprep.subr.bf16.mxu0 %v5356_v37 }
 0x364   : > { %v2852_v12 = vsel %vm1028_vm1, %v2781_v13, -inf }
 0x365   : > { %2853 = vmax.xlane.f32.xlu1 %v2852_v12  ;;  %v3888_v30 = vpop.f32.mrf.mxu1  ;;  %v4084_v12 = vld [vmem:[%s5342_s4 + $0x20] sm:$0xff]  }
 0x366   : > { %3923 = vmatpush3.bf16.msra.mxu0 %v4082_v46  ;;  %v4085_v30 = vld [vmem:[%s5342_s4 + $0x18] sm:$0xff]  }
 0x367   : > { %v2784_v7 = vpop.f32.mrf.mxu1  ;;  %3924 = vmatprep.subr.bf16.mxu0 %v5356_v37 }
 0x368   : > { %v2855_v0 = vsel %vm1028_vm1, %v2784_v7, -inf }
 0x369   : > { %2856 = vmax.xlane.f32.xlu0 %v2855_v0  ;;  %v3889_v23 = vpop.f32.mrf.mxu1 }
 0x36b   : > { %v2833_v63 = vpop.f32.mrf.mxu1 }
 0x36c   : > { %v2858_v24 = vsel %vm1028_vm1, %v2833_v63, -inf }
 0x36d   : > { %2859 = vmax.xlane.f32.xlu1 %v2858_v24  ;;  %v3894_v52 = vpop.f32.mrf.mxu1 }
 0x36f   : > { %v2836_v10 = vpop.f32.mrf.mxu1 }
 0x370   : > { %v2861_v58 = vsel %vm1028_vm1, %v2836_v10, -inf }
 0x371   : > { %2862 = vmax.xlane.f32.xlu0 %v2861_v58  ;;  %v3895_v21 = vpop.f32.mrf.mxu1 }
 0x3de   : > { %v2842_v27 = vpop.xlane.xlu0 %2841 }
 0x3df   : > { %v2864_v51 = vsub.f32 %v2677_v59, %v2842_v27 }
 0x3e1   : > { %v2872_v19 = vmul.f32 1.442695, %v2864_v51 }
 0x3e2   : > { %v2845_v15 = vpop.xlane.xlu1 %2844 }
 0x3e3   : > { %4089 = vpow2.f32 %v2872_v19  ;;  %v2865_v50 = vsub.f32 %v2680_v36, %v2845_v15 }
 0x3e5   : > { %v2874_v2 = vmul.f32 1.442695, %v2865_v50 }
 0x3e6   : > { %v2848_v45 = vpop.xlane.xlu0 %2847 }
 0x3e7   : > { %4091 = vpow2.f32 %v2874_v2  ;;  %v2866_v20 = vsub.f32 %v2729_v40, %v2848_v45 }
 0x3e9   : > { %v2876_v5 = vmul.f32 1.442695, %v2866_v20 }
 0x3ea   : > { %v2851_v60 = vpop.xlane.xlu0 %2850 }
 0x3eb   : > { %4093 = vpow2.f32 %v2876_v5  ;;  %v2867_v6 = vsub.f32 %v2732_v41, %v2851_v60 }
 0x3ed   : > { %v2878_v32 = vmul.f32 1.442695, %v2867_v6 }
 0x3ee   : > { %v2854_v4 = vpop.xlane.xlu1 %2853 }
 0x3ef   : > { %4095 = vpow2.f32 %v2878_v32  ;;  %v2868_v31 = vsub.f32 %v2781_v13, %v2854_v4  ;;  %v4083_v13 = vld [vmem:[%s5342_s4 + $0x28] sm:$0xff]  }
 0x3f0   : > { %v4090_v42 = vpop.eup %4089  ;;  %3925 = vmatpush3.bf16.msra.mxu0 %v4083_v13 }
 0x3f1   : > { %v2880_v18 = vmul.f32 1.442695, %v2868_v31  ;;  %v2888_v56 = vsel %vm1028_vm1, %v4090_v42, 0.0  ;;  %3926 = vmatprep.subr.bf16.mxu0 %v5356_v37 }
 0x3f2   : > { %v2857_v39 = vpop.xlane.xlu0 %2856  ;;  %2889 = vadd.xlane.f32.xlu1 %v2888_v56 }
 0x3f3   : > { %4097 = vpow2.f32 %v2880_v18  ;;  %v2869_v49 = vsub.f32 %v2784_v7, %v2857_v39  ;;  %v4086_v7 = vld [vmem:[%s5342_s4 + $0x10] sm:$0xff]  }
 0x3f4   : > { %v4092_v38 = vpop.eup %4091  ;;  %3927 = vmatpush3.bf16.msra.mxu0 %v4084_v12 }
 0x3f5   : > { %v2882_v25 = vmul.f32 1.442695, %v2869_v49  ;;  %v2891_v61 = vsel %vm1028_vm1, %v4092_v38, 0.0  ;;  %v2912_v22 = vpack.c.bf16 %v4092_v38, %v4090_v42  ;;  %3928 = vmatprep.subr.bf16.mxu0 %v5356_v37 }
 0x3f6   : > { %2892 = vadd.xlane.f32.xlu0 %v2891_v61  ;;  %v2860_v29 = vpop.xlane.xlu1 %2859 }
 0x3f7   : > { %4099 = vpow2.f32 %v2882_v25  ;;  %v2870_v57 = vsub.f32 %v2833_v63, %v2860_v29  ;;  %3899 = vmatmul.mubr.msk.bf16.vlgmr.msra.gmra.mxu1 %vm1028_vm1, %v2912_v22 }
 0x3f8   : > { %v4094_v34 = vpop.eup %4093  ;;  %3903 = vmatpush3.bf16.msra.mxu1 %v4078_v8  ;;  %3904 = vmatprep.mubr.msk.bf16.mxu1 %vm4264_vm0, %v5356_v37 }
 0x3f9   : > { %v2884_v35 = vmul.f32 1.442695, %v2870_v57  ;;  %v2894_v55 = vsel %vm1028_vm1, %v4094_v34, 0.0  ;;  %3908 = vmatprep.subr.bf16.mxu1 %v5356_v37  ;;  %3929 = vmatpush3.bf16.msra.mxu0 %v4085_v30 }
 0x3fa   : > { %2895 = vadd.xlane.f32.xlu1 %v2894_v55  ;;  %v2863_v17 = vpop.xlane.xlu0 %2862  ;;  %3930 = vmatprep.subr.bf16.mxu0 %v5356_v37 }
 0x3fb   : > { %4101 = vpow2.f32 %v2884_v35  ;;  %v2871_v28 = vsub.f32 %v2836_v10, %v2863_v17 }
 0x3fc   : > { %v4096_v48 = vpop.eup %4095 }
 0x3fd   : > { %v2886_v44 = vmul.f32 1.442695, %v2871_v28  ;;  %v2897_v53 = vsel %vm1028_vm1, %v4096_v48, 0.0  ;;  %v2913_v33 = vpack.c.bf16 %v4096_v48, %v4094_v34  ;;  %3931 = vmatpush3.bf16.msra.mxu0 %v4086_v7 }
 0x3fe   : > { %2898 = vadd.xlane.f32.xlu0 %v2897_v53  ;;  %3932 = vmatprep.subr.bf16.mxu0 %v5356_v37 }
 0x3ff   : > { %4103 = vpow2.f32 %v2886_v44  ;;  %3905 = vmatmul.mubr.msk.bf16.vlgmr.msra.gmra.mxu1 %vm1028_vm1, %v2913_v33 }
 0x400   : > { %v4098_v26 = vpop.eup %4097  ;;  %3909 = vmatpush3.bf16.msra.mxu1 %v4079_v11  ;;  %3910 = vmatprep.mubr.msk.bf16.mxu1 %vm4264_vm0, %v5356_v37 }
 0x401   : > { %v2900_v59 = vsel %vm1028_vm1, %v4098_v26, 0.0  ;;  %3914 = vmatprep.subr.bf16.mxu1 %v5356_v37 }
 0x402   : > { %2901 = vadd.xlane.f32.xlu1 %v2900_v59 }
 0x404   : > { %v4100_v62 = vpop.eup %4099 }
 0x405   : > { %v2903_v16 = vsel %vm1028_vm1, %v4100_v62, 0.0  ;;  %v2914_v36 = vpack.c.bf16 %v4100_v62, %v4098_v26 }
 0x406   : > { %2904 = vadd.xlane.f32.xlu0 %v2903_v16 }
 0x407   : > { %3911 = vmatmul.mubr.msk.bf16.vlgmr.msra.gmra.mxu1 %vm1028_vm1, %v2914_v36 }
 0x408   : > { %v4102_v54 = vpop.eup %4101  ;;  %3915 = vmatpush3.bf16.msra.mxu1 %v4080_v14  ;;  %3916 = vmatprep.mubr.msk.bf16.mxu1 %vm4264_vm0, %v5356_v37 }
 0x409   : > { %v2906_v40 = vsel %vm1028_vm1, %v4102_v54, 0.0 }
 0x40a   : > { %2907 = vadd.xlane.f32.xlu1 %v2906_v40 }
 0x40c   : > { %v4104_v9 = vpop.eup %4103 }
 0x40d   : > { %v2909_v3 = vsel %vm1028_vm1, %v4104_v9, 0.0  ;;  %v2915_v41 = vpack.c.bf16 %v4104_v9, %v4102_v54 }
 0x40e   : > { %2910 = vadd.xlane.f32.xlu0 %v2909_v3 }
 0x40f   : > { %3917 = vmatmul.mubr.msk.bf16.vlgmr.msra.gmra.mxu1 %vm1028_vm1, %v2915_v41 }
 0x47b   : > { %v2890_v0 = vpop.xlane.xlu1 %2889 }
 0x47f   : > { %v2893_v23 = vpop.xlane.xlu0 %2892 }
 0x483   : > { %v2896_v63 = vpop.xlane.xlu1 %2895 }
 0x487   : > { %v2899_v10 = vpop.xlane.xlu0 %2898 }
 0x48b   : > { %v2902_v58 = vpop.xlane.xlu1 %2901 }
 0x48c   : > { %4105 = vrcp.f32 %v2902_v58 }
 0x48d   : > { %4107 = vrcp.f32 %v2890_v0 }
 0x48e   : > { %4109 = vrcp.f32 %v2896_v63 }
 0x48f   : > { %v2905_v51 = vpop.xlane.xlu0 %2904 }
 0x493   : > { %v2908_v19 = vpop.xlane.xlu1 %2907 }
 0x494   : > { %4111 = vrcp.f32 %v2908_v19 }
 0x495   : > { %4113 = vrcp.f32 %v2905_v51 }
 0x496   : > { %4115 = vrcp.f32 %v2893_v23 }
 0x497   : > { %v2911_v2 = vpop.xlane.xlu0 %2910 }
 0x498   : > { %4117 = vrcp.f32 %v2911_v2 }
 0x499   : > { %4119 = vrcp.f32 %v2899_v10  ;;  %v4106_v6 = vpop.eup %4105 }
 0x49a   : > { %v4108_v31 = vpop.eup %4107 }
 0x49b   : > { %v4110_v56 = vpop.eup %4109 }
 0x4a1   : > { %v4112_v39 = vpop.eup %4111 }
 0x4a2   : > { %v4114_v25 = vpop.eup %4113 }
 0x4a3   : > { %v4116_v34 = vpop.eup %4115 }
 0x4a5   : > { %v4118_v17 = vpop.eup %4117 }
 0x4a6   : > { %v4120_v53 = vpop.eup %4119 }
 0x4b7   : > { %v2959_v24 = vpop.f32.mrf.mxu1 }
 0x4b8   : > { %v3124_v42 = vmul.f32 %v4108_v31, %v2959_v24 }
 0x4b9   : > { %v3900_v52 = vpop.f32.mrf.mxu1 }
 0x4bb   : > { %v2962_v21 = vpop.f32.mrf.mxu1 }
 0x4bc   : > { %v3125_v28 = vmul.f32 %v4116_v34, %v2962_v21 }
 0x4bd   : > { %v3901_v27 = vpop.f32.mrf.mxu1 }
 0x4bf   : > { %v3009_v15 = vpop.f32.mrf.mxu1 }
 0x4c0   : > { %v3126_v61 = vmul.f32 %v4110_v56, %v3009_v15 }
 0x4c1   : > { %v3906_v50 = vpop.f32.mrf.mxu1 }
 0x4c3   : > { %v3012_v45 = vpop.f32.mrf.mxu1 }
 0x4c4   : > { %v3127_v62 = vmul.f32 %v4120_v53, %v3012_v45 }
 0x4c5   : > { %v3907_v20 = vpop.f32.mrf.mxu1 }
 0x4c7   : > { %v3059_v5 = vpop.f32.mrf.mxu1 }
 0x4c8   : > { %v3128_v32 = vmul.f32 %v4106_v6, %v3059_v5 }
 0x4c9   : > { %v3912_v60 = vpop.f32.mrf.mxu1 }
 0x4ca   : > { %v3132_v49 = vcombine.low %v3124_v42, %v3128_v32  ;;  %v3133_v22 = vcombine.high %v3124_v42, %v3128_v32 }
 0x4cb   : > { %v3062_v4 = vpop.f32.mrf.mxu1 }
 0x4cc   : > { %v3129_v8 = vmul.f32 %v4114_v25, %v3062_v4  ;;  %v3140_v48 = vrot.slane %v3132_v49, %v4560_v43  ;;  %v3147_v33 = vrot.slane %v3133_v22, %v4560_v43 }
 0x4cd   : > { %v3913_v18 = vpop.f32.mrf.mxu1 }
 0x4ce   : > { %v3200_v16 = vcombine.low %v3125_v28, %v3129_v8  ;;  %v3201_v36 = vcombine.high %v3125_v28, %v3129_v8 }
 0x4cf   : > { %v3109_v38 = vpop.f32.mrf.mxu1 }
 0x4d0   : > { %v3130_v29 = vmul.f32 %v4112_v39, %v3109_v38  ;;  %v3208_v7 = vrot.slane %v3200_v16, %v4560_v43  ;;  %v3215_v0 = vrot.slane %v3201_v36, %v4560_v43 }
 0x4d1   : > { %v3918_v57 = vpop.f32.mrf.mxu1 }
 0x4d2   : > { %v3148_v35 = vcombine.low %v3126_v61, %v3130_v29  ;;  %v3149_v55 = vcombine.high %v3126_v61, %v3130_v29  ;;  %v4087_v61 = vld [vmem:[%s5342_s4 + $0x8] sm:$0xff]  }
 0x4d3   : > { %v3112_v44 = vpop.f32.mrf.mxu1  ;;  %3933 = vmatpush3.bf16.msra.mxu0 %v4087_v61 }
 0x4d4   : > { %v3156_v11 = vrot.slane %v3148_v35, %v4560_v43  ;;  %v3163_v26 = vrot.slane %v3149_v55, %v4560_v43  ;;  %v3131_v59 = vmul.f32 %v4118_v17, %v3112_v44  ;;  %3934 = vmatprep.subr.bf16.mxu0 %v5356_v37 }
 0x4d5   : > { %v3919_v14 = vpop.f32.mrf.mxu1 }
 0x4d6   : > { %v3164_v54 = vcombine.low %v3140_v48, %v3156_v11  ;;  %v3165_v40 = vcombine.high %v3140_v48, %v3156_v11  ;;  %v3180_v9 = vcombine.low %v3147_v33, %v3163_v26  ;;  %v3181_v3 = vcombine.high %v3147_v33, %v3163_v26  ;;  %v4088_v26 = vld [vmem:[%s5342_s4] sm:$0xff]  }
 0x4d7   : > { %v3216_v41 = vcombine.low %v3127_v62, %v3131_v59  ;;  %v3217_v1 = vcombine.high %v3127_v62, %v3131_v59  ;;  %3935 = vmatpush3.bf16.msra.mxu0 %v4088_v26 }
 0x4d8   : > { %v3172_v46 = vrot.slane %v3164_v54, %v4565_v47  ;;  %v3179_v13 = vrot.slane %v3165_v40, %v4565_v47  ;;  %v3188_v12 = vrot.slane %v3180_v9, %v4565_v47  ;;  %v3195_v30 = vrot.slane %v3181_v3, %v4565_v47 }
 0x4d9   : > { %v3224_v23 = vrot.slane %v3216_v41, %v4560_v43  ;;  %v3231_v63 = vrot.slane %v3217_v1, %v4560_v43 }
 0x4da   : > { %v3268_v24 = vcombine.low %v3172_v46, %v3179_v13  ;;  %v3733_v52 = vcombine.high %v3172_v46, %v3179_v13  ;;  %v3284_v10 = vcombine.low %v3188_v12, %v3195_v30  ;;  %v3734_v58 = vcombine.high %v3188_v12, %v3195_v30 }
 0x4db   : > { %v3232_v21 = vcombine.low %v3208_v7, %v3224_v23  ;;  %v3233_v27 = vcombine.high %v3208_v7, %v3224_v23  ;;  %v3248_v51 = vcombine.low %v3215_v0, %v3231_v63  ;;  %v3249_v19 = vcombine.high %v3215_v0, %v3231_v63 }
 0x4dc   : > { %v3275_v15 = vrot.slane %v3268_v24, %v4560_v43  ;;  %v3283_v50 = vrot.slane %v3733_v52, %v4560_v43  ;;  %v3291_v2 = vrot.slane %v3284_v10, %v4560_v43  ;;  %v3299_v45 = vrot.slane %v3734_v58, %v4560_v43 }
 0x4dd   : > { %v3240_v20 = vrot.slane %v3232_v21, %v4565_v47  ;;  %v3247_v5 = vrot.slane %v3233_v27, %v4565_v47  ;;  %v3256_v60 = vrot.slane %v3248_v51, %v4565_v47  ;;  %v3263_v6 = vrot.slane %v3249_v19, %v4565_v47 }
 0x4de   : > { %v3301_v32 = vcombine.high %v3275_v15, %v3283_v50  ;;  %v3317_v4 = vcombine.high %v3291_v2, %v3299_v45  ;;  %v3300_v31 = vcombine.low %v3275_v15, %v3283_v50  ;;  %v3316_v42 = vcombine.low %v3291_v2, %v3299_v45 }
 0x4df   : > { %v3336_v18 = vcombine.low %v3240_v20, %v3247_v5  ;;  %v3735_v56 = vcombine.high %v3240_v20, %v3247_v5  ;;  %v3352_v39 = vcombine.low %v3256_v60, %v3263_v6  ;;  %v3736_v49 = vcombine.high %v3256_v60, %v3263_v6 }
 0x4e0   : > { %v3308_v38 = vrot.slane %v3300_v31, %v4565_v47  ;;  %v3324_v25 = vrot.slane %v3316_v42, %v4565_v47  ;;  %v3315_v34 = vrot.slane %v3301_v32, %v4565_v47  ;;  %v3331_v35 = vrot.slane %v3317_v4, %v4565_v47 }
 0x4e1   : > { %v3343_v22 = vrot.slane %v3336_v18, %v4560_v43  ;;  %v3351_v29 = vrot.slane %v3735_v56, %v4560_v43  ;;  %v3359_v8 = vrot.slane %v3352_v39, %v4560_v43  ;;  %v3367_v57 = vrot.slane %v3736_v49, %v4560_v43 }
 0x4e2   : > { %v3332_v55 = vcombine.low %v3308_v38, %v3324_v25  ;;  %v3334_v59 = vcombine.low %v3315_v34, %v3331_v35  ;;  %v3333_v16 = vcombine.high %v3308_v38, %v3324_v25  ;;  %v3335_v9 = vcombine.high %v3315_v34, %v3331_v35 }
 0x4e3   : > { %v3369_v17 = vcombine.high %v3343_v22, %v3351_v29  ;;  %v3385_v28 = vcombine.high %v3359_v8, %v3367_v57  ;;  %v3368_v48 = vcombine.low %v3343_v22, %v3351_v29  ;;  %v3384_v44 = vcombine.low %v3359_v8, %v3367_v57 }
 0x4e5   : > { %v3383_v53 = vrot.slane %v3369_v17, %v4565_v47  ;;  %v3399_v33 = vrot.slane %v3385_v28, %v4565_v47  ;;  %v3376_v11 = vrot.slane %v3368_v48, %v4565_v47  ;;  %v3392_v43 = vrot.slane %v3384_v44, %v4565_v47 }
 0x4e7   : > { %v3402_v62 = vcombine.low %v3383_v53, %v3399_v33  ;;  %v3400_v36 = vcombine.low %v3376_v11, %v3392_v43  ;;  %v3401_v14 = vcombine.high %v3376_v11, %v3392_v43  ;;  %v3403_v40 = vcombine.high %v3383_v53, %v3399_v33 }
 0x4e9   : > { %v4035_v54 = vpack.i.bf16 %v3402_v62, %v3334_v59  ;;  %v4030_v37 = vpack.i.bf16 %v3401_v14, %v3333_v16  ;;  %v4040_v3 = vpack.i.bf16 %v3403_v40, %v3335_v9 }
 0x4eb   : > { %4036 = vrot.lane.b32.xlu0 %v4035_v54, %s4266_s20  ;;  %4031 = vrot.lane.b32.xlu1 %v4030_v37, %s4267_s15 }
 0x4ef   : > { %4041 = vrot.lane.b32.xlu1 %v4040_v3, %s4265_s17  ;;  %s313_s17 = sand.u32 1, %s4241_s25  }
 0x4f0   : > { %s3670_s20 = sshll.u32 %s313_s17, 4  ;;  %s5293_s12 = scalar_lea.sflag [#allocation6], %s313_s17 }
 0x4f1   : > { %s315_s15 = scalar_lea.vmem [#allocation9], %s3670_s20 }
 0x4f2   : > { %s3560_s22 = sshll.u32 %s315_s15, 4  ;;  %s5286_s22 = int_to_ptr.vmem [resolvable:$true] %s3560_s22 }
 0x4f3   : > { %s4173_s18 = scalar_lea.vmem %s5286_s22, 256  ;;  %p4180_p0 = scmp.lt.s32.totalorder %s5286_s22, %s4178_s16 }
 0x4f4   : > { %p4174_p8 = scmp.ne.s32.totalorder %s5286_s22, %s4173_s18  ;;  %p4181_p6 = scmp.lt.s32.totalorder %s4179_s19, %s4173_s18 }
 0x4f6   : > { %p4175_p11 = pnand %p4174_p8, %p5358_p10  ;;  %p4182_p7 = por %p4181_p6, %p4180_p0 }
 0x4f8   : > { %p4176_p13 = pneg %p4175_p11 }
 0x4fa   : > { %p4183_p9 = pnand %p4182_p7, %p4176_p13 }
 0x55d   : > { %v4037_v47 = vpop.permute.xlu0 %4036  ;;  %v4032_v41 = vpop.permute.xlu1 %4031 }
 0x55e   : > { %v4034_v1 = vunpack.i.h.bf16 %v4032_v41  ;;  %v4033_v46 = vunpack.i.l.bf16 %v4032_v41  ;;  %v4039_v13 = vunpack.i.h.bf16 %v4037_v47  ;;  %v4038_v12 = vunpack.i.l.bf16 %v4037_v47 }
 0x560   : > { %v3429_v30 = vsel %vm2636_vm3, %v3400_v36, %v4034_v1  ;;  %v3428_v7 = vsel %vm2636_vm3, %v3332_v55, %v4033_v46 }
 0x561   : > { %v4042_v0 = vpop.permute.xlu1 %4041  ;;  %v3431_v24 = vsel %vm3430_vm4, %v3428_v7, %v4038_v12  ;;  %v3432_v52 = vsel %vm3430_vm4, %v3429_v30, %v4039_v13 }
 0x562   : > { %v4044_v23 = vunpack.i.h.bf16 %v4042_v0  ;;  %v4043_v63 = vunpack.i.l.bf16 %v4042_v0 }
 0x564   : > { %v3434_v10 = vsel %vm3433_vm5, %v3431_v24, %v4043_v63  ;;  %v3435_v58 = vsel %vm3433_vm5, %v3432_v52, %v4044_v23 }
 0x565   : > { %v3436_v21 = vpack.c.bf16 %v3435_v58, %v3434_v10 }
 0x567   : > { %3937 = vmatmul.mubr.bf16.vlgmr.msra.gmra.mxu0 %v3436_v21 }
 0x627   : > { %v3535_v27 = vpop.f32.mrf.mxu0 }
 0x628   : > { %3542 = vst [vmem:[%s315_s15] sm:$0xff] %v3535_v27 }
 0x629   : > { %v3938_v51 = vpop.f32.mrf.mxu0 }
 0x62b   : > { %v3538_v19 = vpop.f32.mrf.mxu0 }
 0x62c   : > { %3543 = vst [vmem:[%s315_s15 + $0x8] sm:$0xff] %v3538_v19 }
 0x62d   : > { %v3939_v15 = vpop.f32.mrf.mxu0 }
 0x62e   : > { %4186 = shalt.err (!%p4183_p9)
}
 0x62f   : > { %s4187_s21 = scalar_lea.hbm %s5291_s10, 256  ;;  %s4191_s15 = scalar_lea.hbm %s5345_s7, 512 }
 0x630   : > { %p4188_p12 = scmp.ne.s32.totalorder %s5291_s10, %s4187_s21  ;;  %p4192_p5 = scmp.lt.s32.totalorder %s5291_s10, %s5345_s7 }
 0x631   : > { %p4193_p3 = scmp.lt.s32.totalorder %s4191_s15, %s4187_s21 }
 0x632   : > { %p4189_p1 = pnand %p4188_p12, %p5358_p10 }
 0x633   : > { %p4194_p4 = por %p4193_p3, %p4192_p5 }
 0x634   : > { %p4190_p2 = pneg %p4189_p1 }
 0x636   : > { %p4195_p8 = pnand %p4194_p4, %p4190_p2 }
 0x638   : > { %4198 = shalt.err (!%p4195_p8)
}
 0x639   : > { %s4274_s8 = smov 128   ;;  %s4275_s18 = smov 8  }
 0x63a   : > { %3948 = dma.vmem_to_hbm [thread:$0]  (%p5358_p10), %s5286_s22, 256, %s5291_s10, %s5293_s12, %s4274_s8, %s4274_s8, %s4275_s18  }
 0x63b PF: > { %p3965_p11 = scmp.ge.s32.totalorder %s4257_s29, 2  ;;  %s3575_s27 = sand.u32 1, %s4237_s24  }
 0x63c   : > { %p5359_p13 = scmp.ne.s32.totalorder %s5351_s13, 0  ;;  %s3576_s16 = scalar_lea.sflag [#allocation6], %s3575_s27 }
 0x63e   : > { %p3958_p0 = pnand %p3965_p11, %p5359_p13 }
 0x640   : > { %p3959_p6 = pneg %p3958_p0 }
 0x642   : > { %4232 = dma.done.wait (%p3959_p6), %s3576_s16, 256  }
 0x643   : > { %4234 = vsyncadd (%p3959_p6), %s3576_s16, 4294967040  ;;  %s22_s29 = sadd.s32 1, %s4257_s29   ;;  %s5360_s24 = smov %s4241_s25 }
 0x644   : > { %p19_p7 = scmp.ge.s32.totalorder %s22_s29, 4   ;;  %s5361_s25 = smov %s4245_s26 }
 0x645   : > { %s5362_s26 = smov %s4369_s14  ;;  %s5363_s27 = smov %s4253_s28 }
 0x646   : > { %s5364_s28 = smov %s5366_s9  ;;  %21 = sbr.rel (!%p19_p7) target bundleno = 6 (0x6), region = 99 }
 0x64b   :  { %3581 = vsyncpa [#allocation5], 1 }
 0x64c   :  { %3583 = vsyncpa [#allocation5 + $0x1], 1 }
 0x64d   :  { %3584 = vsyncpa [#allocation8], 1 }
 0x64e   :  { %3585 = vsyncpa [#allocation6], 1 }
 0x64f   :  { %3587 = vsyncpa [#allocation6 + $0x1], 1 }

</bundles_post_ra>
